<compile_context>
chip_gen: v7x
topology: tpu7x:2x2x1
jax: 0.10.0
libtpu: 0.0.40
codegen_flags: <defaults>
</compile_context>

<pallas_src>
import jax
import jax.numpy as jnp
from jax.experimental import pallas as pl
from jax.experimental.pallas import tpu as pltpu


# ------------------------------- Pallas kernel -------------------------------

def _resblock_kernel(xp_ref, w1_ref, w2_ref, prm_ref, o_ref, y1p_ref):
    # xp_ref : (Hp, Wp, C)  reflect-padded input, channels-last (one batch element)
    # w*_ref : (9, Cin, Cout), k = dy*3 + dx
    # prm_ref: (4, C) rows = [gamma1, beta1, gamma2, beta2]
    # o_ref  : (HW, C)
    # y1p_ref: (Hp, Wp, C) VMEM scratch holding the reflect-padded stage-1 output
    Hp, Wp, C = xp_ref.shape
    H, W = Hp - 2, Wp - 2
    HW = H * W

    def conv3x3(src_ref, w_ref):
        # 3x3 'same' conv over a reflect-padded map as 9 shifted MXU matmuls.
        acc = jnp.zeros((HW, C), jnp.float32)
        for k in range(9):
            dy, dx = k // 3, k % 3
            xs = src_ref[dy:dy + H, dx:dx + W, :].reshape(HW, C)
            acc = acc + jnp.dot(xs, w_ref[k], preferred_element_type=jnp.float32)
        return acc

    def cond_instance_norm(acc, g, bt):
        # torch.std semantics: unbiased (N-1) variance, no eps (matches the module).
        mean = jnp.mean(acc, axis=0, keepdims=True)
        cen = acc - mean
        var = jnp.sum(cen * cen, axis=0, keepdims=True) * (1.0 / (HW - 1))
        return cen * (g * jax.lax.rsqrt(var)) + bt          # rsqrt -> EUP, gamma folded

    g1, bt1 = prm_ref[0:1, :], prm_ref[1:2, :]
    g2, bt2 = prm_ref[2:3, :], prm_ref[3:4, :]

    # ---- stage 1: conv1 -> conditional instance norm -> ReLU -----------------
    y1 = cond_instance_norm(conv3x3(xp_ref, w1_ref), g1, bt1)
    y1 = jnp.maximum(y1, 0.0).reshape(H, W, C)

    # ---- rebuild the reflection halo of y1 directly in VMEM scratch ----------
    rows = jnp.concatenate([y1[1:2], y1, y1[H - 2:H - 1]], axis=0)           # (Hp, W, C)
    y1p_ref[...] = jnp.concatenate(
        [rows[:, 1:2, :], rows, rows[:, W - 2:W - 1, :]], axis=1)            # (Hp, Wp, C)

    # ---- stage 2: conv2 -> conditional instance norm -> + residual -----------
    y2 = cond_instance_norm(conv3x3(y1p_ref, w2_ref), g2, bt2)
    res = xp_ref[1:H + 1, 1:W + 1, :].reshape(HW, C)         # residual from resident block
    o_ref[...] = y2 + res


# --------------------------------- wrapper -----------------------------------

def residual_block(x, gammas, betas, w1, b1, w2, b2):
    """x:(B,C,H,W), gammas/betas:(B,2C,1,1), w*:(C,C,3,3), b*:(C,)."""
    x = x.astype(jnp.float32)
    B, C, H, W = x.shape
    Hp, Wp, HW = H + 2, W + 2, H * W
    assert W % 8 == 0, "in-kernel (H,W,C)->(HW,C) flatten assumes W % 8 == 0"

    # Pure layout glue in XLA: channels-last + reflection pad (done once).
    xp = jnp.pad(jnp.transpose(x, (0, 2, 3, 1)),
                 ((0, 0), (1, 1), (1, 1), (0, 0)), mode="reflect")           # (B,Hp,Wp,C)

    # (Cout, Cin, 3, 3) -> (9, Cin, Cout), k = dy*3 + dx.
    w1k = jnp.transpose(w1.astype(jnp.float32), (2, 3, 1, 0)).reshape(9, C, C)
    w2k = jnp.transpose(w2.astype(jnp.float32), (2, 3, 1, 0)).reshape(9, C, C)
    # NOTE: b1/b2 are deliberately NOT sent to the kernel — a per-channel conv bias
    # is cancelled exactly by the instance-norm mean subtraction (dead work).

    g1 = gammas[:, 0:C, 0, 0].astype(jnp.float32)
    bt1 = betas[:, 0:C, 0, 0].astype(jnp.float32)
    g2 = gammas[:, C:2 * C, 0, 0].astype(jnp.float32)
    bt2 = betas[:, C:2 * C, 0, 0].astype(jnp.float32)
    params = jnp.stack([g1, bt1, g2, bt2], axis=1)                           # (B, 4, C)

    out = pl.pallas_call(
        _resblock_kernel,
        out_shape=jax.ShapeDtypeStruct((B, HW, C), jnp.float32),
        grid=(B,),
        in_specs=[
            pl.BlockSpec((None, Hp, Wp, C), lambda b: (b, 0, 0, 0)),   # padded x
            pl.BlockSpec((9, C, C), lambda b: (0, 0, 0)),              # w1 (resident)
            pl.BlockSpec((9, C, C), lambda b: (0, 0, 0)),              # w2 (resident)
            pl.BlockSpec((None, 4, C), lambda b: (b, 0, 0)),           # [g1,bt1,g2,bt2]
        ],
        out_specs=pl.BlockSpec((None, HW, C), lambda b: (b, 0, 0)),
        scratch_shapes=[pltpu.VMEM((Hp, Wp, C), jnp.float32)],
        compiler_params=pltpu.CompilerParams(dimension_semantics=("parallel",)),
    )(xp, w1k, w2k, params)

    return jnp.transpose(out.reshape(B, H, W, C), (0, 3, 1, 2))


# --------------------------- plain-JAX reference -----------------------------

def _conv_layer_ref(x, w, b):
    xp = jnp.pad(x, ((0, 0), (0, 0), (1, 1), (1, 1)), mode="reflect")
    y = jax.lax.conv_general_dilated(
        xp, w, window_strides=(1, 1), padding="VALID",
        dimension_numbers=("NCHW", "OIHW", "NCHW"))
    return y + b[None, :, None, None]


def _cin_ref(x, g, bt):
    n = x.shape[2] * x.shape[3]
    mean = jnp.mean(x, axis=(2, 3), keepdims=True)
    var = jnp.sum((x - mean) ** 2, axis=(2, 3), keepdims=True) / (n - 1)
    return (x - mean) / jnp.sqrt(var) * g + bt


def _reference(x, gammas, betas, w1, b1, w2, b2):
    C = x.shape[1]
    out = jnp.maximum(_cin_ref(_conv_layer_ref(x, w1, b1),
                               gammas[:, 0:C], betas[:, 0:C]), 0.0)
    out = _cin_ref(_conv_layer_ref(out, w2, b2),
                   gammas[:, C:2 * C], betas[:, C:2 * C])
    return out + x


# ------------------------------------ main ------------------------------------

if __name__ == "__main__":
    key = jax.random.PRNGKey(0)
    B, C, H, W = 2, 4, 16, 16
    ks = jax.random.split(key, 7)

    x = jax.random.normal(ks[0], (B, C, H, W), jnp.float32)
    gammas = 1.0 + 0.1 * jax.random.normal(ks[1], (B, 2 * C, 1, 1), jnp.float32)
    betas = 0.1 * jax.random.normal(ks[2], (B, 2 * C, 1, 1), jnp.float32)
    w1 = 0.1 * jax.random.normal(ks[3], (C, C, 3, 3), jnp.float32)
    b1 = 0.1 * jax.random.normal(ks[4], (C,), jnp.float32)
    w2 = 0.1 * jax.random.normal(ks[5], (C, C, 3, 3), jnp.float32)
    b2 = 0.1 * jax.random.normal(ks[6], (C,), jnp.float32)

    out = jax.block_until_ready(residual_block(x, gammas, betas, w1, b1, w2, b2))
    ref = _reference(x, gammas, betas, w1, b1, w2, b2)

    assert out.shape == (B, C, H, W)
    if not bool(jnp.allclose(out, ref, rtol=2e-4, atol=2e-4)):
        raise AssertionError("Pallas kernel result does not match reference")
    print("KERNEL_OK")
</pallas_src>

<mosaic_0001>
module attributes {stable_mosaic.version = 11 : i64} {
  func.func @_resblock_kernel(%arg0: i32, %arg1: memref<1x18x18x4xf32, #tpu.memory_space<vmem>>, %arg2: memref<9x4x4xf32, #tpu.memory_space<vmem>>, %arg3: memref<9x4x4xf32, #tpu.memory_space<vmem>>, %arg4: memref<1x4x4xf32, #tpu.memory_space<vmem>>, %arg5: memref<1x256x4xf32, #tpu.memory_space<vmem>>, %arg6: memref<18x18x4xf32, #tpu.memory_space<vmem>>) attributes {dimension_semantics = [#tpu.dimension_semantics<parallel>], iteration_bounds = array<i64: 2>, scalar_prefetch = 0 : i64, scratch_operands = 1 : i64, tpu.core_type = #tpu.core_type<tc>, window_params = [{transform_indices = @transform_0, window_bounds = array<i64: 1, 18, 18, 4>}, {pipeline_mode = #tpu.pipeline_mode<synchronous>, transform_indices = @transform_1, window_bounds = array<i64: 9, 4, 4>}, {pipeline_mode = #tpu.pipeline_mode<synchronous>, transform_indices = @transform_2, window_bounds = array<i64: 9, 4, 4>}, {transform_indices = @transform_3, window_bounds = array<i64: 1, 4, 4>}, {transform_indices = @transform_4, window_bounds = array<i64: 1, 256, 4>}]} {
    %c0 = arith.constant 0 : index
    %c0_0 = arith.constant 0 : index
    %c0_1 = arith.constant 0 : index
    %0 = vector.load %arg4[%c0, %c0_0, %c0_1] : memref<1x4x4xf32, #tpu.memory_space<vmem>>, vector<1x1x4xf32>
    %1 = vector.shape_cast %0 : vector<1x1x4xf32> to vector<1x4xf32>
    %c0_2 = arith.constant 0 : index
    %c1 = arith.constant 1 : index
    %c0_3 = arith.constant 0 : index
    %2 = vector.load %arg4[%c0_2, %c1, %c0_3] : memref<1x4x4xf32, #tpu.memory_space<vmem>>, vector<1x1x4xf32>
    %3 = vector.shape_cast %2 : vector<1x1x4xf32> to vector<1x4xf32>
    %c0_4 = arith.constant 0 : index
    %c2 = arith.constant 2 : index
    %c0_5 = arith.constant 0 : index
    %4 = vector.load %arg4[%c0_4, %c2, %c0_5] : memref<1x4x4xf32, #tpu.memory_space<vmem>>, vector<1x1x4xf32>
    %5 = vector.shape_cast %4 : vector<1x1x4xf32> to vector<1x4xf32>
    %c0_6 = arith.constant 0 : index
    %c3 = arith.constant 3 : index
    %c0_7 = arith.constant 0 : index
    %6 = vector.load %arg4[%c0_6, %c3, %c0_7] : memref<1x4x4xf32, #tpu.memory_space<vmem>>, vector<1x1x4xf32>
    %7 = vector.shape_cast %6 : vector<1x1x4xf32> to vector<1x4xf32>
    %cst = arith.constant 0.000000e+00 : f32
    %8 = vector.broadcast %cst : f32 to vector<256x4xf32>
    %c0_8 = arith.constant 0 : index
    %c0_9 = arith.constant 0 : index
    %c0_10 = arith.constant 0 : index
    %c0_11 = arith.constant 0 : index
    %9 = vector.load %arg1[%c0_8, %c0_9, %c0_10, %c0_11] : memref<1x18x18x4xf32, #tpu.memory_space<vmem>>, vector<1x16x16x4xf32>
    %10 = vector.shape_cast %9 : vector<1x16x16x4xf32> to vector<16x16x4xf32>
    %11 = vector.shape_cast %10 : vector<16x16x4xf32> to vector<256x4xf32>
    %c0_12 = arith.constant 0 : index
    %c0_13 = arith.constant 0 : index
    %c0_14 = arith.constant 0 : index
    %12 = vector.load %arg2[%c0_12, %c0_13, %c0_14] : memref<9x4x4xf32, #tpu.memory_space<vmem>>, vector<1x4x4xf32>
    %13 = vector.shape_cast %12 : vector<1x4x4xf32> to vector<4x4xf32>
    %cst_15 = arith.constant dense<0.000000e+00> : vector<256x4xf32>
    %14 = tpu.matmul %11, %13, %cst_15 {dimension_numbers = #tpu.dot_dimension_numbers<[1], [0], [0], [1], [0, 0, 1, 1], [], []>} : vector<256x4xf32>, vector<4x4xf32>, vector<256x4xf32> -> vector<256x4xf32>
    %15 = arith.addf %8, %14 : vector<256x4xf32>
    %c0_16 = arith.constant 0 : index
    %c0_17 = arith.constant 0 : index
    %c1_18 = arith.constant 1 : index
    %c0_19 = arith.constant 0 : index
    %16 = vector.load %arg1[%c0_16, %c0_17, %c1_18, %c0_19] : memref<1x18x18x4xf32, #tpu.memory_space<vmem>>, vector<1x16x16x4xf32>
    %17 = vector.shape_cast %16 : vector<1x16x16x4xf32> to vector<16x16x4xf32>
    %18 = vector.shape_cast %17 : vector<16x16x4xf32> to vector<256x4xf32>
    %c1_20 = arith.constant 1 : index
    %c0_21 = arith.constant 0 : index
    %c0_22 = arith.constant 0 : index
    %19 = vector.load %arg2[%c1_20, %c0_21, %c0_22] : memref<9x4x4xf32, #tpu.memory_space<vmem>>, vector<1x4x4xf32>
    %20 = vector.shape_cast %19 : vector<1x4x4xf32> to vector<4x4xf32>
    %cst_23 = arith.constant dense<0.000000e+00> : vector<256x4xf32>
    %21 = tpu.matmul %18, %20, %cst_23 {dimension_numbers = #tpu.dot_dimension_numbers<[1], [0], [0], [1], [0, 0, 1, 1], [], []>} : vector<256x4xf32>, vector<4x4xf32>, vector<256x4xf32> -> vector<256x4xf32>
    %22 = arith.addf %15, %21 : vector<256x4xf32>
    %c0_24 = arith.constant 0 : index
    %c0_25 = arith.constant 0 : index
    %c2_26 = arith.constant 2 : index
    %c0_27 = arith.constant 0 : index
    %23 = vector.load %arg1[%c0_24, %c0_25, %c2_26, %c0_27] : memref<1x18x18x4xf32, #tpu.memory_space<vmem>>, vector<1x16x16x4xf32>
    %24 = vector.shape_cast %23 : vector<1x16x16x4xf32> to vector<16x16x4xf32>
    %25 = vector.shape_cast %24 : vector<16x16x4xf32> to vector<256x4xf32>
    %c2_28 = arith.constant 2 : index
    %c0_29 = arith.constant 0 : index
    %c0_30 = arith.constant 0 : index
    %26 = vector.load %arg2[%c2_28, %c0_29, %c0_30] : memref<9x4x4xf32, #tpu.memory_space<vmem>>, vector<1x4x4xf32>
    %27 = vector.shape_cast %26 : vector<1x4x4xf32> to vector<4x4xf32>
    %cst_31 = arith.constant dense<0.000000e+00> : vector<256x4xf32>
    %28 = tpu.matmul %25, %27, %cst_31 {dimension_numbers = #tpu.dot_dimension_numbers<[1], [0], [0], [1], [0, 0, 1, 1], [], []>} : vector<256x4xf32>, vector<4x4xf32>, vector<256x4xf32> -> vector<256x4xf32>
    %29 = arith.addf %22, %28 : vector<256x4xf32>
    %c0_32 = arith.constant 0 : index
    %c1_33 = arith.constant 1 : index
    %c0_34 = arith.constant 0 : index
    %c0_35 = arith.constant 0 : index
    %30 = vector.load %arg1[%c0_32, %c1_33, %c0_34, %c0_35] : memref<1x18x18x4xf32, #tpu.memory_space<vmem>>, vector<1x16x16x4xf32>
    %31 = vector.shape_cast %30 : vector<1x16x16x4xf32> to vector<16x16x4xf32>
    %32 = vector.shape_cast %31 : vector<16x16x4xf32> to vector<256x4xf32>
    %c3_36 = arith.constant 3 : index
    %c0_37 = arith.constant 0 : index
    %c0_38 = arith.constant 0 : index
    %33 = vector.load %arg2[%c3_36, %c0_37, %c0_38] : memref<9x4x4xf32, #tpu.memory_space<vmem>>, vector<1x4x4xf32>
    %34 = vector.shape_cast %33 : vector<1x4x4xf32> to vector<4x4xf32>
    %cst_39 = arith.constant dense<0.000000e+00> : vector<256x4xf32>
    %35 = tpu.matmul %32, %34, %cst_39 {dimension_numbers = #tpu.dot_dimension_numbers<[1], [0], [0], [1], [0, 0, 1, 1], [], []>} : vector<256x4xf32>, vector<4x4xf32>, vector<256x4xf32> -> vector<256x4xf32>
    %36 = arith.addf %29, %35 : vector<256x4xf32>
    %c0_40 = arith.constant 0 : index
    %c1_41 = arith.constant 1 : index
    %c1_42 = arith.constant 1 : index
    %c0_43 = arith.constant 0 : index
    %37 = vector.load %arg1[%c0_40, %c1_41, %c1_42, %c0_43] : memref<1x18x18x4xf32, #tpu.memory_space<vmem>>, vector<1x16x16x4xf32>
    %38 = vector.shape_cast %37 : vector<1x16x16x4xf32> to vector<16x16x4xf32>
    %39 = vector.shape_cast %38 : vector<16x16x4xf32> to vector<256x4xf32>
    %c4 = arith.constant 4 : index
    %c0_44 = arith.constant 0 : index
    %c0_45 = arith.constant 0 : index
    %40 = vector.load %arg2[%c4, %c0_44, %c0_45] : memref<9x4x4xf32, #tpu.memory_space<vmem>>, vector<1x4x4xf32>
    %41 = vector.shape_cast %40 : vector<1x4x4xf32> to vector<4x4xf32>
    %cst_46 = arith.constant dense<0.000000e+00> : vector<256x4xf32>
    %42 = tpu.matmul %39, %41, %cst_46 {dimension_numbers = #tpu.dot_dimension_numbers<[1], [0], [0], [1], [0, 0, 1, 1], [], []>} : vector<256x4xf32>, vector<4x4xf32>, vector<256x4xf32> -> vector<256x4xf32>
    %43 = arith.addf %36, %42 : vector<256x4xf32>
    %c0_47 = arith.constant 0 : index
    %c1_48 = arith.constant 1 : index
    %c2_49 = arith.constant 2 : index
    %c0_50 = arith.constant 0 : index
    %44 = vector.load %arg1[%c0_47, %c1_48, %c2_49, %c0_50] : memref<1x18x18x4xf32, #tpu.memory_space<vmem>>, vector<1x16x16x4xf32>
    %45 = vector.shape_cast %44 : vector<1x16x16x4xf32> to vector<16x16x4xf32>
    %46 = vector.shape_cast %45 : vector<16x16x4xf32> to vector<256x4xf32>
    %c5 = arith.constant 5 : index
    %c0_51 = arith.constant 0 : index
    %c0_52 = arith.constant 0 : index
    %47 = vector.load %arg2[%c5, %c0_51, %c0_52] : memref<9x4x4xf32, #tpu.memory_space<vmem>>, vector<1x4x4xf32>
    %48 = vector.shape_cast %47 : vector<1x4x4xf32> to vector<4x4xf32>
    %cst_53 = arith.constant dense<0.000000e+00> : vector<256x4xf32>
    %49 = tpu.matmul %46, %48, %cst_53 {dimension_numbers = #tpu.dot_dimension_numbers<[1], [0], [0], [1], [0, 0, 1, 1], [], []>} : vector<256x4xf32>, vector<4x4xf32>, vector<256x4xf32> -> vector<256x4xf32>
    %50 = arith.addf %43, %49 : vector<256x4xf32>
    %c0_54 = arith.constant 0 : index
    %c2_55 = arith.constant 2 : index
    %c0_56 = arith.constant 0 : index
    %c0_57 = arith.constant 0 : index
    %51 = vector.load %arg1[%c0_54, %c2_55, %c0_56, %c0_57] : memref<1x18x18x4xf32, #tpu.memory_space<vmem>>, vector<1x16x16x4xf32>
    %52 = vector.shape_cast %51 : vector<1x16x16x4xf32> to vector<16x16x4xf32>
    %53 = vector.shape_cast %52 : vector<16x16x4xf32> to vector<256x4xf32>
    %c6 = arith.constant 6 : index
    %c0_58 = arith.constant 0 : index
    %c0_59 = arith.constant 0 : index
    %54 = vector.load %arg2[%c6, %c0_58, %c0_59] : memref<9x4x4xf32, #tpu.memory_space<vmem>>, vector<1x4x4xf32>
    %55 = vector.shape_cast %54 : vector<1x4x4xf32> to vector<4x4xf32>
    %cst_60 = arith.constant dense<0.000000e+00> : vector<256x4xf32>
    %56 = tpu.matmul %53, %55, %cst_60 {dimension_numbers = #tpu.dot_dimension_numbers<[1], [0], [0], [1], [0, 0, 1, 1], [], []>} : vector<256x4xf32>, vector<4x4xf32>, vector<256x4xf32> -> vector<256x4xf32>
    %57 = arith.addf %50, %56 : vector<256x4xf32>
    %c0_61 = arith.constant 0 : index
    %c2_62 = arith.constant 2 : index
    %c1_63 = arith.constant 1 : index
    %c0_64 = arith.constant 0 : index
    %58 = vector.load %arg1[%c0_61, %c2_62, %c1_63, %c0_64] : memref<1x18x18x4xf32, #tpu.memory_space<vmem>>, vector<1x16x16x4xf32>
    %59 = vector.shape_cast %58 : vector<1x16x16x4xf32> to vector<16x16x4xf32>
    %60 = vector.shape_cast %59 : vector<16x16x4xf32> to vector<256x4xf32>
    %c7 = arith.constant 7 : index
    %c0_65 = arith.constant 0 : index
    %c0_66 = arith.constant 0 : index
    %61 = vector.load %arg2[%c7, %c0_65, %c0_66] : memref<9x4x4xf32, #tpu.memory_space<vmem>>, vector<1x4x4xf32>
    %62 = vector.shape_cast %61 : vector<1x4x4xf32> to vector<4x4xf32>
    %cst_67 = arith.constant dense<0.000000e+00> : vector<256x4xf32>
    %63 = tpu.matmul %60, %62, %cst_67 {dimension_numbers = #tpu.dot_dimension_numbers<[1], [0], [0], [1], [0, 0, 1, 1], [], []>} : vector<256x4xf32>, vector<4x4xf32>, vector<256x4xf32> -> vector<256x4xf32>
    %64 = arith.addf %57, %63 : vector<256x4xf32>
    %c0_68 = arith.constant 0 : index
    %c2_69 = arith.constant 2 : index
    %c2_70 = arith.constant 2 : index
    %c0_71 = arith.constant 0 : index
    %65 = vector.load %arg1[%c0_68, %c2_69, %c2_70, %c0_71] : memref<1x18x18x4xf32, #tpu.memory_space<vmem>>, vector<1x16x16x4xf32>
    %66 = vector.shape_cast %65 : vector<1x16x16x4xf32> to vector<16x16x4xf32>
    %67 = vector.shape_cast %66 : vector<16x16x4xf32> to vector<256x4xf32>
    %c8 = arith.constant 8 : index
    %c0_72 = arith.constant 0 : index
    %c0_73 = arith.constant 0 : index
    %68 = vector.load %arg2[%c8, %c0_72, %c0_73] : memref<9x4x4xf32, #tpu.memory_space<vmem>>, vector<1x4x4xf32>
    %69 = vector.shape_cast %68 : vector<1x4x4xf32> to vector<4x4xf32>
    %cst_74 = arith.constant dense<0.000000e+00> : vector<256x4xf32>
    %70 = tpu.matmul %67, %69, %cst_74 {dimension_numbers = #tpu.dot_dimension_numbers<[1], [0], [0], [1], [0, 0, 1, 1], [], []>} : vector<256x4xf32>, vector<4x4xf32>, vector<256x4xf32> -> vector<256x4xf32>
    %71 = arith.addf %64, %70 : vector<256x4xf32>
    %cst_75 = arith.constant dense<0.000000e+00> : vector<4xf32>
    %72 = vector.multi_reduction <add>, %71, %cst_75 [0] : vector<256x4xf32> to vector<4xf32>
    %73 = vector.shape_cast %72 : vector<4xf32> to vector<1x4xf32>
    %cst_76 = arith.constant 2.560000e+02 : f32
    %74 = vector.broadcast %cst_76 : f32 to vector<1x4xf32>
    %75 = arith.divf %73, %74 : vector<1x4xf32>
    %76 = vector.broadcast %75 : vector<1x4xf32> to vector<256x4xf32>
    %77 = arith.subf %71, %76 : vector<256x4xf32>
    %78 = arith.mulf %77, %77 : vector<256x4xf32>
    %cst_77 = arith.constant dense<0.000000e+00> : vector<4xf32>
    %79 = vector.multi_reduction <add>, %78, %cst_77 [0] : vector<256x4xf32> to vector<4xf32>
    %80 = vector.shape_cast %79 : vector<4xf32> to vector<1x4xf32>
    %cst_78 = arith.constant 0.00392156886 : f32
    %81 = vector.broadcast %cst_78 : f32 to vector<1x4xf32>
    %82 = arith.mulf %80, %81 : vector<1x4xf32>
    %83 = math.rsqrt %82 : vector<1x4xf32>
    %84 = arith.mulf %1, %83 : vector<1x4xf32>
    %85 = vector.broadcast %84 : vector<1x4xf32> to vector<256x4xf32>
    %86 = arith.mulf %77, %85 : vector<256x4xf32>
    %87 = vector.broadcast %3 : vector<1x4xf32> to vector<256x4xf32>
    %88 = arith.addf %86, %87 : vector<256x4xf32>
    %cst_79 = arith.constant 0.000000e+00 : f32
    %89 = vector.broadcast %cst_79 : f32 to vector<256x4xf32>
    %90 = arith.maximumf %88, %89 : vector<256x4xf32>
    %91 = vector.shape_cast %90 : vector<256x4xf32> to vector<16x16x4xf32>
    %92 = vector.extract_strided_slice %91 {offsets = [1, 0, 0], sizes = [1, 16, 4], strides = [1, 1, 1]} : vector<16x16x4xf32> to vector<1x16x4xf32>
    %93 = vector.extract_strided_slice %91 {offsets = [14, 0, 0], sizes = [1, 16, 4], strides = [1, 1, 1]} : vector<16x16x4xf32> to vector<1x16x4xf32>
    %94 = tpu.concatenate %92, %91, %93 in 0 : vector<1x16x4xf32>, vector<16x16x4xf32>, vector<1x16x4xf32> -> vector<18x16x4xf32>
    %95 = vector.extract_strided_slice %94 {offsets = [0, 1, 0], sizes = [18, 1, 4], strides = [1, 1, 1]} : vector<18x16x4xf32> to vector<18x1x4xf32>
    %96 = vector.extract_strided_slice %94 {offsets = [0, 14, 0], sizes = [18, 1, 4], strides = [1, 1, 1]} : vector<18x16x4xf32> to vector<18x1x4xf32>
    %97 = tpu.concatenate %95, %94, %96 in 1 : vector<18x1x4xf32>, vector<18x16x4xf32>, vector<18x1x4xf32> -> vector<18x18x4xf32>
    %c0_80 = arith.constant 0 : index
    %c0_81 = arith.constant 0 : index
    %c0_82 = arith.constant 0 : index
    %98 = vector.load %arg6[%c0_80, %c0_81, %c0_82] : memref<18x18x4xf32, #tpu.memory_space<vmem>>, vector<18x18x4xf32>
    tpu.vector_store %arg6[%c0_80, %c0_81, %c0_82], %97 {strides = array<i32>} : memref<18x18x4xf32, #tpu.memory_space<vmem>>, vector<18x18x4xf32>,
    %cst_83 = arith.constant 0.000000e+00 : f32
    %99 = vector.broadcast %cst_83 : f32 to vector<256x4xf32>
    %c0_84 = arith.constant 0 : index
    %c0_85 = arith.constant 0 : index
    %c0_86 = arith.constant 0 : index
    %100 = vector.load %arg6[%c0_84, %c0_85, %c0_86] : memref<18x18x4xf32, #tpu.memory_space<vmem>>, vector<16x16x4xf32>
    %101 = vector.shape_cast %100 : vector<16x16x4xf32> to vector<256x4xf32>
    %c0_87 = arith.constant 0 : index
    %c0_88 = arith.constant 0 : index
    %c0_89 = arith.constant 0 : index
    %102 = vector.load %arg3[%c0_87, %c0_88, %c0_89] : memref<9x4x4xf32, #tpu.memory_space<vmem>>, vector<1x4x4xf32>
    %103 = vector.shape_cast %102 : vector<1x4x4xf32> to vector<4x4xf32>
    %cst_90 = arith.constant dense<0.000000e+00> : vector<256x4xf32>
    %104 = tpu.matmul %101, %103, %cst_90 {dimension_numbers = #tpu.dot_dimension_numbers<[1], [0], [0], [1], [0, 0, 1, 1], [], []>} : vector<256x4xf32>, vector<4x4xf32>, vector<256x4xf32> -> vector<256x4xf32>
    %105 = arith.addf %99, %104 : vector<256x4xf32>
    %c0_91 = arith.constant 0 : index
    %c1_92 = arith.constant 1 : index
    %c0_93 = arith.constant 0 : index
    %106 = vector.load %arg6[%c0_91, %c1_92, %c0_93] : memref<18x18x4xf32, #tpu.memory_space<vmem>>, vector<16x16x4xf32>
    %107 = vector.shape_cast %106 : vector<16x16x4xf32> to vector<256x4xf32>
    %c1_94 = arith.constant 1 : index
    %c0_95 = arith.constant 0 : index
    %c0_96 = arith.constant 0 : index
    %108 = vector.load %arg3[%c1_94, %c0_95, %c0_96] : memref<9x4x4xf32, #tpu.memory_space<vmem>>, vector<1x4x4xf32>
    %109 = vector.shape_cast %108 : vector<1x4x4xf32> to vector<4x4xf32>
    %cst_97 = arith.constant dense<0.000000e+00> : vector<256x4xf32>
    %110 = tpu.matmul %107, %109, %cst_97 {dimension_numbers = #tpu.dot_dimension_numbers<[1], [0], [0], [1], [0, 0, 1, 1], [], []>} : vector<256x4xf32>, vector<4x4xf32>, vector<256x4xf32> -> vector<256x4xf32>
    %111 = arith.addf %105, %110 : vector<256x4xf32>
    %c0_98 = arith.constant 0 : index
    %c2_99 = arith.constant 2 : index
    %c0_100 = arith.constant 0 : index
    %112 = vector.load %arg6[%c0_98, %c2_99, %c0_100] : memref<18x18x4xf32, #tpu.memory_space<vmem>>, vector<16x16x4xf32>
    %113 = vector.shape_cast %112 : vector<16x16x4xf32> to vector<256x4xf32>
    %c2_101 = arith.constant 2 : index
    %c0_102 = arith.constant 0 : index
    %c0_103 = arith.constant 0 : index
    %114 = vector.load %arg3[%c2_101, %c0_102, %c0_103] : memref<9x4x4xf32, #tpu.memory_space<vmem>>, vector<1x4x4xf32>
    %115 = vector.shape_cast %114 : vector<1x4x4xf32> to vector<4x4xf32>
    %cst_104 = arith.constant dense<0.000000e+00> : vector<256x4xf32>
    %116 = tpu.matmul %113, %115, %cst_104 {dimension_numbers = #tpu.dot_dimension_numbers<[1], [0], [0], [1], [0, 0, 1, 1], [], []>} : vector<256x4xf32>, vector<4x4xf32>, vector<256x4xf32> -> vector<256x4xf32>
    %117 = arith.addf %111, %116 : vector<256x4xf32>
    %c1_105 = arith.constant 1 : index
    %c0_106 = arith.constant 0 : index
    %c0_107 = arith.constant 0 : index
    %118 = vector.load %arg6[%c1_105, %c0_106, %c0_107] : memref<18x18x4xf32, #tpu.memory_space<vmem>>, vector<16x16x4xf32>
    %119 = vector.shape_cast %118 : vector<16x16x4xf32> to vector<256x4xf32>
    %c3_108 = arith.constant 3 : index
    %c0_109 = arith.constant 0 : index
    %c0_110 = arith.constant 0 : index
    %120 = vector.load %arg3[%c3_108, %c0_109, %c0_110] : memref<9x4x4xf32, #tpu.memory_space<vmem>>, vector<1x4x4xf32>
    %121 = vector.shape_cast %120 : vector<1x4x4xf32> to vector<4x4xf32>
    %cst_111 = arith.constant dense<0.000000e+00> : vector<256x4xf32>
    %122 = tpu.matmul %119, %121, %cst_111 {dimension_numbers = #tpu.dot_dimension_numbers<[1], [0], [0], [1], [0, 0, 1, 1], [], []>} : vector<256x4xf32>, vector<4x4xf32>, vector<256x4xf32> -> vector<256x4xf32>
    %123 = arith.addf %117, %122 : vector<256x4xf32>
    %c1_112 = arith.constant 1 : index
    %c1_113 = arith.constant 1 : index
    %c0_114 = arith.constant 0 : index
    %124 = vector.load %arg6[%c1_112, %c1_113, %c0_114] : memref<18x18x4xf32, #tpu.memory_space<vmem>>, vector<16x16x4xf32>
    %125 = vector.shape_cast %124 : vector<16x16x4xf32> to vector<256x4xf32>
    %c4_115 = arith.constant 4 : index
    %c0_116 = arith.constant 0 : index
    %c0_117 = arith.constant 0 : index
    %126 = vector.load %arg3[%c4_115, %c0_116, %c0_117] : memref<9x4x4xf32, #tpu.memory_space<vmem>>, vector<1x4x4xf32>
    %127 = vector.shape_cast %126 : vector<1x4x4xf32> to vector<4x4xf32>
    %cst_118 = arith.constant dense<0.000000e+00> : vector<256x4xf32>
    %128 = tpu.matmul %125, %127, %cst_118 {dimension_numbers = #tpu.dot_dimension_numbers<[1], [0], [0], [1], [0, 0, 1, 1], [], []>} : vector<256x4xf32>, vector<4x4xf32>, vector<256x4xf32> -> vector<256x4xf32>
    %129 = arith.addf %123, %128 : vector<256x4xf32>
    %c1_119 = arith.constant 1 : index
    %c2_120 = arith.constant 2 : index
    %c0_121 = arith.constant 0 : index
    %130 = vector.load %arg6[%c1_119, %c2_120, %c0_121] : memref<18x18x4xf32, #tpu.memory_space<vmem>>, vector<16x16x4xf32>
    %131 = vector.shape_cast %130 : vector<16x16x4xf32> to vector<256x4xf32>
    %c5_122 = arith.constant 5 : index
    %c0_123 = arith.constant 0 : index
    %c0_124 = arith.constant 0 : index
    %132 = vector.load %arg3[%c5_122, %c0_123, %c0_124] : memref<9x4x4xf32, #tpu.memory_space<vmem>>, vector<1x4x4xf32>
    %133 = vector.shape_cast %132 : vector<1x4x4xf32> to vector<4x4xf32>
    %cst_125 = arith.constant dense<0.000000e+00> : vector<256x4xf32>
    %134 = tpu.matmul %131, %133, %cst_125 {dimension_numbers = #tpu.dot_dimension_numbers<[1], [0], [0], [1], [0, 0, 1, 1], [], []>} : vector<256x4xf32>, vector<4x4xf32>, vector<256x4xf32> -> vector<256x4xf32>
    %135 = arith.addf %129, %134 : vector<256x4xf32>
    %c2_126 = arith.constant 2 : index
    %c0_127 = arith.constant 0 : index
    %c0_128 = arith.constant 0 : index
    %136 = vector.load %arg6[%c2_126, %c0_127, %c0_128] : memref<18x18x4xf32, #tpu.memory_space<vmem>>, vector<16x16x4xf32>
    %137 = vector.shape_cast %136 : vector<16x16x4xf32> to vector<256x4xf32>
    %c6_129 = arith.constant 6 : index
    %c0_130 = arith.constant 0 : index
    %c0_131 = arith.constant 0 : index
    %138 = vector.load %arg3[%c6_129, %c0_130, %c0_131] : memref<9x4x4xf32, #tpu.memory_space<vmem>>, vector<1x4x4xf32>
    %139 = vector.shape_cast %138 : vector<1x4x4xf32> to vector<4x4xf32>
    %cst_132 = arith.constant dense<0.000000e+00> : vector<256x4xf32>
    %140 = tpu.matmul %137, %139, %cst_132 {dimension_numbers = #tpu.dot_dimension_numbers<[1], [0], [0], [1], [0, 0, 1, 1], [], []>} : vector<256x4xf32>, vector<4x4xf32>, vector<256x4xf32> -> vector<256x4xf32>
    %141 = arith.addf %135, %140 : vector<256x4xf32>
    %c2_133 = arith.constant 2 : index
    %c1_134 = arith.constant 1 : index
    %c0_135 = arith.constant 0 : index
    %142 = vector.load %arg6[%c2_133, %c1_134, %c0_135] : memref<18x18x4xf32, #tpu.memory_space<vmem>>, vector<16x16x4xf32>
    %143 = vector.shape_cast %142 : vector<16x16x4xf32> to vector<256x4xf32>
    %c7_136 = arith.constant 7 : index
    %c0_137 = arith.constant 0 : index
    %c0_138 = arith.constant 0 : index
    %144 = vector.load %arg3[%c7_136, %c0_137, %c0_138] : memref<9x4x4xf32, #tpu.memory_space<vmem>>, vector<1x4x4xf32>
    %145 = vector.shape_cast %144 : vector<1x4x4xf32> to vector<4x4xf32>
    %cst_139 = arith.constant dense<0.000000e+00> : vector<256x4xf32>
    %146 = tpu.matmul %143, %145, %cst_139 {dimension_numbers = #tpu.dot_dimension_numbers<[1], [0], [0], [1], [0, 0, 1, 1], [], []>} : vector<256x4xf32>, vector<4x4xf32>, vector<256x4xf32> -> vector<256x4xf32>
    %147 = arith.addf %141, %146 : vector<256x4xf32>
    %c2_140 = arith.constant 2 : index
    %c2_141 = arith.constant 2 : index
    %c0_142 = arith.constant 0 : index
    %148 = vector.load %arg6[%c2_140, %c2_141, %c0_142] : memref<18x18x4xf32, #tpu.memory_space<vmem>>, vector<16x16x4xf32>
    %149 = vector.shape_cast %148 : vector<16x16x4xf32> to vector<256x4xf32>
    %c8_143 = arith.constant 8 : index
    %c0_144 = arith.constant 0 : index
    %c0_145 = arith.constant 0 : index
    %150 = vector.load %arg3[%c8_143, %c0_144, %c0_145] : memref<9x4x4xf32, #tpu.memory_space<vmem>>, vector<1x4x4xf32>
    %151 = vector.shape_cast %150 : vector<1x4x4xf32> to vector<4x4xf32>
    %cst_146 = arith.constant dense<0.000000e+00> : vector<256x4xf32>
    %152 = tpu.matmul %149, %151, %cst_146 {dimension_numbers = #tpu.dot_dimension_numbers<[1], [0], [0], [1], [0, 0, 1, 1], [], []>} : vector<256x4xf32>, vector<4x4xf32>, vector<256x4xf32> -> vector<256x4xf32>
    %153 = arith.addf %147, %152 : vector<256x4xf32>
    %cst_147 = arith.constant dense<0.000000e+00> : vector<4xf32>
    %154 = vector.multi_reduction <add>, %153, %cst_147 [0] : vector<256x4xf32> to vector<4xf32>
    %155 = vector.shape_cast %154 : vector<4xf32> to vector<1x4xf32>
    %cst_148 = arith.constant 2.560000e+02 : f32
    %156 = vector.broadcast %cst_148 : f32 to vector<1x4xf32>
    %157 = arith.divf %155, %156 : vector<1x4xf32>
    %158 = vector.broadcast %157 : vector<1x4xf32> to vector<256x4xf32>
    %159 = arith.subf %153, %158 : vector<256x4xf32>
    %160 = arith.mulf %159, %159 : vector<256x4xf32>
    %cst_149 = arith.constant dense<0.000000e+00> : vector<4xf32>
    %161 = vector.multi_reduction <add>, %160, %cst_149 [0] : vector<256x4xf32> to vector<4xf32>
    %162 = vector.shape_cast %161 : vector<4xf32> to vector<1x4xf32>
    %cst_150 = arith.constant 0.00392156886 : f32
    %163 = vector.broadcast %cst_150 : f32 to vector<1x4xf32>
    %164 = arith.mulf %162, %163 : vector<1x4xf32>
    %165 = math.rsqrt %164 : vector<1x4xf32>
    %166 = arith.mulf %5, %165 : vector<1x4xf32>
    %167 = vector.broadcast %166 : vector<1x4xf32> to vector<256x4xf32>
    %168 = arith.mulf %159, %167 : vector<256x4xf32>
    %169 = vector.broadcast %7 : vector<1x4xf32> to vector<256x4xf32>
    %170 = arith.addf %168, %169 : vector<256x4xf32>
    %c0_151 = arith.constant 0 : index
    %c1_152 = arith.constant 1 : index
    %c1_153 = arith.constant 1 : index
    %c0_154 = arith.constant 0 : index
    %171 = vector.load %arg1[%c0_151, %c1_152, %c1_153, %c0_154] : memref<1x18x18x4xf32, #tpu.memory_space<vmem>>, vector<1x16x16x4xf32>
    %172 = vector.shape_cast %171 : vector<1x16x16x4xf32> to vector<16x16x4xf32>
    %173 = vector.shape_cast %172 : vector<16x16x4xf32> to vector<256x4xf32>
    %174 = arith.addf %170, %173 : vector<256x4xf32>
    %c0_155 = arith.constant 0 : index
    %c0_156 = arith.constant 0 : index
    %c0_157 = arith.constant 0 : index
    %175 = vector.load %arg5[%c0_155, %c0_156, %c0_157] : memref<1x256x4xf32, #tpu.memory_space<vmem>>, vector<1x256x4xf32>
    %176 = vector.shape_cast %175 : vector<1x256x4xf32> to vector<256x4xf32>
    %177 = vector.shape_cast %174 : vector<256x4xf32> to vector<1x256x4xf32>
    tpu.vector_store %arg5[%c0_155, %c0_156, %c0_157], %177 {strides = array<i32>} : memref<1x256x4xf32, #tpu.memory_space<vmem>>, vector<1x256x4xf32>,
    return
  }
  func.func @transform_0(%arg0: i32) -> (i32, i32, i32, i32) {
    %c0_i32 = arith.constant 0 : i32
    %c0_i32_0 = arith.constant 0 : i32
    %c0_i32_1 = arith.constant 0 : i32
    %c0_i32_2 = arith.constant 0 : i32
    return %arg0, %c0_i32, %c0_i32_0, %c0_i32_1 : i32, i32, i32, i32
  }
  func.func @transform_1(%arg0: i32) -> (i32, i32, i32) {
    %c0_i32 = arith.constant 0 : i32
    %c0_i32_0 = arith.constant 0 : i32
    %c0_i32_1 = arith.constant 0 : i32
    %c0_i32_2 = arith.constant 0 : i32
    return %c0_i32, %c0_i32_0, %c0_i32_1 : i32, i32, i32
  }
  func.func @transform_2(%arg0: i32) -> (i32, i32, i32) {
    %c0_i32 = arith.constant 0 : i32
    %c0_i32_0 = arith.constant 0 : i32
    %c0_i32_1 = arith.constant 0 : i32
    %c0_i32_2 = arith.constant 0 : i32
    return %c0_i32, %c0_i32_0, %c0_i32_1 : i32, i32, i32
  }
  func.func @transform_3(%arg0: i32) -> (i32, i32, i32) {
    %c0_i32 = arith.constant 0 : i32
    %c0_i32_0 = arith.constant 0 : i32
    %c0_i32_1 = arith.constant 0 : i32
    return %arg0, %c0_i32, %c0_i32_0 : i32, i32, i32
  }
  func.func @transform_4(%arg0: i32) -> (i32, i32, i32) {
    %c0_i32 = arith.constant 0 : i32
    %c0_i32_0 = arith.constant 0 : i32
    %c0_i32_1 = arith.constant 0 : i32
    return %arg0, %c0_i32, %c0_i32_0 : i32, i32, i32
  }
}

</mosaic_0001>

<bundles_post_ra>
// kernel: tpu_custom_call.1
= control target key start
LH: loop header
LB: loop body
LE: loop exit
PB: predicated region body
PF: predicated region fallthrough
CT: control target
= control target key end

     0   :  { %s11047_s15 = smov 0   ;;  %s14053_s0 = inlined_call_operand.vmem [shape: f32[2,18,18,4], index: 0, kind: input, shape index: {}]   ;;  %s14054_s1 = inlined_call_operand.vmem [shape: f32[9,4,4], index: 1, kind: input, shape index: {}]   ;;  %s14055_s2 = inlined_call_operand.vmem [shape: f32[9,4,4], index: 2, kind: input, shape index: {}]   ;;  %s14056_s3 = inlined_call_operand.vmem [shape: f32[2,4,4], index: 3, kind: input, shape index: {}]   ;;  %s14057_s4 = inlined_call_operand.vmem [shape: f32[2,256,4], index: 4, kind: output, shape index: {}]  }
   0x1 LB: > { %s8147_s16 = sadd.s32 4294967295, %s11020_s15   ;;  %p8151_p0 = scmp.ge.s32.totalorder %s11020_s15, 1  ;;  %s11020_s15 = sphi %s11047_s15, %s14_s15  }
   0x2   : > { %p171_p1 = scmp.lt.s32.totalorder %s11020_s15, 3 }
   0x4   : > { %p172_p2 = pnand %p8151_p0, %p171_p1 }
   0x6   : > { %175 = sbr.rel (%p172_p2) target bundleno = 1934 (0x78e), region = 36 }
   0xd   : > { %v8156_v0 = vld [vmem:[%s14054_s1 + $0x4] sm:$0xf]  ;;  %vm383_vm0 = vcmask 1043456   ;;  %p201_p3 = scmp.lt.s32.totalorder %s8147_s16, 1  ;;  %v251_v1 = vld [vmem:[%s14054_s1] sm:$0xf] }
   0xe   : > { %9589 = vmatprep.subr.msk.mxu0 %vm383_vm0, %v8156_v0  ;;  %vm286_vm1 = vcmask 31744   ;;  %v11081_v5 = vld [vmem:[%s14054_s1 + $0x8] sm:$0xf]  ;;  %v11243_v38 = vld [vmem:[%s14054_s1 + $0xc] sm:$0xf]  ;;  %vm4043_vm2 = vcmask 1040384  }
   0xf   : > { %9590 = vmatpush3.msk.msra.mxu0 %vm383_vm0, %v8156_v0  ;;  %s14448_s16 = smov (!%p201_p3, %s8147_s16), 1  ;;  %vm4206_vm3 = vcmask 25600  }
  0x10   : > { %9639 = vmatprep.subr.msk.mxu0 %vm383_vm0, %v251_v1  ;;  %s11001_s21 = smul.u32 432, %s14448_s16  ;;  %s8153_s19 = sshll.u32 %s14448_s16, 2 }
  0x11   : > { %s12280_s22 = scalar_lea.vmem %s14056_s3, %s8153_s19  ;;  %s8994_s12 = sshll.u32 %s14448_s16, 8 }
  0x12   : > { %s11070_s24 = scalar_lea.vmem %s14053_s0, %s11001_s21  ;;  %s13938_s14 = scalar_lea.vmem %s14057_s4, %s8994_s12 }
  0x13   : > { %v252_v2 = vld [vmem:[%s11070_s24 + $0x1] sm:$0xff]  ;;  %v253_v3 = vld [vmem:[%s11070_s24 + $0x9] sm:$0xff]  ;;  %v11075_v4 = vld [vmem:[%s11070_s24 + $0x19] sm:$0xff] }
  0x14   : > { %9591 = vmatprep.mubr.msk.f32.mxu0 %vm286_vm1, %v252_v2  ;;  %v11088_v6 = vld [vmem:[%s11070_s24 + $0x21] sm:$0xff]  ;;  %v11091_v7 = vld [vmem:[%s11070_s24 + $0x31] sm:$0xff]  ;;  %v11100_v8 = vld [vmem:[%s11070_s24 + $0x39] sm:$0xff] }
  0x15   : > { %9592 = vmatmul.mubr.msk.f32.vlgmr.msra.gmra.mrb[0].mxu0 %vm286_vm1, %v253_v3  ;;  %v11103_v9 = vld [vmem:[%s11070_s24 + $0x49] sm:$0xff]  ;;  %v11110_v10 = vld [vmem:[%s11070_s24 + $0x51] sm:$0xff]  ;;  %v11113_v11 = vld [vmem:[%s11070_s24 + $0x61] sm:$0xff] }
  0x16   : > { %9640 = vmatpush3.msk.msra.mxu0 %vm383_vm0, %v251_v1  ;;  %9594 = vmatprep.mubr.msk.f32.mxu0 %vm286_vm1, %v11075_v4  ;;  %v11120_v12 = vld [vmem:[%s11070_s24 + $0x69] sm:$0xff]  ;;  %v11123_v13 = vld [vmem:[%s11070_s24 + $0x79] sm:$0xff]  ;;  %v11130_v14 = vld [vmem:[%s11070_s24 + $0x81] sm:$0xff] }
  0x17   : > { %9689 = vmatprep.subr.msk.mxu0 %vm383_vm0, %v11081_v5  ;;  %v11133_v15 = vld [vmem:[%s11070_s24 + $0x91] sm:$0xff]  ;;  %v11140_v16 = vld [vmem:[%s11070_s24 + $0x99] sm:$0xff]  ;;  %v11143_v17 = vld [vmem:[%s11070_s24 + $0xa9] sm:$0xff] }
  0x18   : > { %v11150_v18 = vld [vmem:[%s11070_s24 + $0xb1] sm:$0xff]  ;;  %v11153_v19 = vld [vmem:[%s11070_s24 + $0xc1] sm:$0xff]  ;;  %v11160_v20 = vld [vmem:[%s11070_s24 + $0xc9] sm:$0xff] }
  0x19   : > { %9595 = vmatmul.mubr.msk.f32.gmra.mrb[2].mxu0 %vm286_vm1, %v11088_v6  ;;  %v11163_v21 = vld [vmem:[%s11070_s24 + $0xd9] sm:$0xff]  ;;  %v11170_v22 = vld [vmem:[%s11070_s24 + $0xe1] sm:$0xff]  ;;  %v11173_v23 = vld [vmem:[%s11070_s24 + $0xf1] sm:$0xff] }
  0x1a   : > { %9597 = vmatprep.mubr.msk.f32.mxu0 %vm286_vm1, %v11091_v7  ;;  %v11180_v24 = vld [vmem:[%s11070_s24 + $0xf9] sm:$0xff]  ;;  %v11183_v25 = vld [vmem:[%s11070_s24 + $0x109] sm:$0xff]  ;;  %v11190_v26 = vld [vmem:[%s11070_s24 + $0x111] sm:$0xff] }
  0x1b   : > { %v11193_v27 = vld [vmem:[%s11070_s24 + $0x121] sm:$0xff]  ;;  %v11200_v28 = vld [vmem:[%s11070_s24 + $0x129] sm:$0xff]  ;;  %v11203_v29 = vld [vmem:[%s11070_s24 + $0x139] sm:$0xff] }
  0x1c   : > { %14206 = vst [vmem:[#allocation3_spill] sm:$0xff] %v11193_v27  ;;  %14207 = vst [vmem:[#allocation4_spill] sm:$0xff] %v11200_v28  ;;  %v11210_v30 = vld [vmem:[%s11070_s24 + $0x141] sm:$0xff]  ;;  %v11213_v31 = vld [vmem:[%s11070_s24 + $0x151] sm:$0xff] }
  0x1d   : > { %9598 = vmatmul.mubr.msk.f32.gmra.mrb[4].mxu0 %vm286_vm1, %v11100_v8  ;;  %14208 = vst [vmem:[#allocation5_spill] sm:$0xff] %v11203_v29  ;;  %14209 = vst [vmem:[#allocation6_spill] sm:$0xff] %v11210_v30  ;;  %v11220_v32 = vld [vmem:[%s11070_s24 + $0x159] sm:$0xff]  ;;  %v11223_v33 = vld [vmem:[%s11070_s24 + $0x169] sm:$0xff] }
  0x1e   : > { %9600 = vmatprep.mubr.msk.f32.mxu0 %vm286_vm1, %v11103_v9  ;;  %14210 = vst [vmem:[#allocation7_spill] sm:$0xff] %v11213_v31  ;;  %14211 = vst [vmem:[#allocation8_spill] sm:$0xff] %v11220_v32  ;;  %v11230_v34 = vld [vmem:[%s11070_s24 + $0x171] sm:$0xff]  ;;  %v219_v35 = vld [vmem:[%s11070_s24] sm:$0xff] }
  0x1f   : > { %14212 = vst [vmem:[#allocation9_spill] sm:$0xff] %v11223_v33  ;;  %14213 = vst [vmem:[#allocation10_spill] sm:$0xff] %v11230_v34  ;;  %v220_v36 = vld [vmem:[%s11070_s24 + $0x8] sm:$0xff]  ;;  %v11238_v37 = vld [vmem:[%s11070_s24 + $0x18] sm:$0xff] }
  0x20   : > { %v11251_v39 = vld [vmem:[%s11070_s24 + $0x20] sm:$0xff]  ;;  %v11254_v40 = vld [vmem:[%s11070_s24 + $0x30] sm:$0xff]  ;;  %v11263_v41 = vld [vmem:[%s11070_s24 + $0x38] sm:$0xff] }
  0x21   : > { %9601 = vmatmul.mubr.msk.f32.gmra.mrb[6].mxu0 %vm286_vm1, %v11110_v10  ;;  %v11266_v42 = vld [vmem:[%s11070_s24 + $0x48] sm:$0xff]  ;;  %v11273_v43 = vld [vmem:[%s11070_s24 + $0x50] sm:$0xff]  ;;  %v11276_v44 = vld [vmem:[%s11070_s24 + $0x60] sm:$0xff] }
  0x22   : > { %9603 = vmatprep.mubr.msk.f32.mxu0 %vm286_vm1, %v11113_v11  ;;  %v11283_v45 = vld [vmem:[%s11070_s24 + $0x68] sm:$0xff]  ;;  %v11286_v46 = vld [vmem:[%s11070_s24 + $0x78] sm:$0xff]  ;;  %v11293_v47 = vld [vmem:[%s11070_s24 + $0x80] sm:$0xff] }
  0x23   : > { %v11296_v48 = vld [vmem:[%s11070_s24 + $0x90] sm:$0xff]  ;;  %v11303_v49 = vld [vmem:[%s11070_s24 + $0x98] sm:$0xff]  ;;  %v11306_v50 = vld [vmem:[%s11070_s24 + $0xa8] sm:$0xff] }
  0x24   : > { %v11313_v51 = vld [vmem:[%s11070_s24 + $0xb0] sm:$0xff]  ;;  %v11316_v52 = vld [vmem:[%s11070_s24 + $0xc0] sm:$0xff]  ;;  %v11323_v53 = vld [vmem:[%s11070_s24 + $0xc8] sm:$0xff] }
  0x25   : > { %9604 = vmatmul.mubr.msk.f32.gmra.mrb[8].mxu0 %vm286_vm1, %v11120_v12  ;;  %v11326_v54 = vld [vmem:[%s11070_s24 + $0xd8] sm:$0xff]  ;;  %v11333_v55 = vld [vmem:[%s11070_s24 + $0xe0] sm:$0xff]  ;;  %v11336_v56 = vld [vmem:[%s11070_s24 + $0xf0] sm:$0xff] }
  0x26   : > { %9606 = vmatprep.mubr.msk.f32.mxu0 %vm286_vm1, %v11123_v13  ;;  %v11343_v57 = vld [vmem:[%s11070_s24 + $0xf8] sm:$0xff]  ;;  %v11346_v58 = vld [vmem:[%s11070_s24 + $0x108] sm:$0xff]  ;;  %v11353_v59 = vld [vmem:[%s11070_s24 + $0x110] sm:$0xff] }
  0x27   : > { %v11356_v60 = vld [vmem:[%s11070_s24 + $0x120] sm:$0xff]  ;;  %v11363_v61 = vld [vmem:[%s11070_s24 + $0x128] sm:$0xff]  ;;  %v11366_v62 = vld [vmem:[%s11070_s24 + $0x138] sm:$0xff] }
  0x28   : > { %v11373_v63 = vld [vmem:[%s11070_s24 + $0x140] sm:$0xff]  ;;  %v11376_v0 = vld [vmem:[%s11070_s24 + $0x150] sm:$0xff]  ;;  %v11383_v1 = vld [vmem:[%s11070_s24 + $0x158] sm:$0xff] }
  0x29   : > { %9607 = vmatmul.mubr.msk.f32.gmra.mrb[10].mxu0 %vm286_vm1, %v11130_v14  ;;  %v11386_v2 = vld [vmem:[%s11070_s24 + $0x168] sm:$0xff]  ;;  %v11393_v3 = vld [vmem:[%s11070_s24 + $0x170] sm:$0xff] }
  0x2a   : > { %9609 = vmatprep.mubr.msk.f32.mxu0 %vm286_vm1, %v11133_v15 }
  0x2d   : > { %9610 = vmatmul.mubr.msk.f32.gmra.mrb[12].mxu0 %vm286_vm1, %v11140_v16 }
  0x2e   : > { %9612 = vmatprep.mubr.msk.f32.mxu0 %vm286_vm1, %v11143_v17 }
  0x31   : > { %9613 = vmatmul.mubr.msk.f32.gmra.mrb[14].mxu0 %vm286_vm1, %v11150_v18 }
  0x32   : > { %9615 = vmatprep.mubr.msk.f32.mxu0 %vm286_vm1, %v11153_v19 }
  0x35   : > { %9616 = vmatmul.mubr.msk.f32.gmra.mrb[16].mxu0 %vm286_vm1, %v11160_v20 }
  0x36   : > { %9618 = vmatprep.mubr.msk.f32.mxu0 %vm286_vm1, %v11163_v21 }
  0x39   : > { %9619 = vmatmul.mubr.msk.f32.gmra.mrb[18].mxu0 %vm286_vm1, %v11170_v22 }
  0x3a   : > { %9621 = vmatprep.mubr.msk.f32.mxu0 %vm286_vm1, %v11173_v23 }
  0x3d   : > { %9622 = vmatmul.mubr.msk.f32.gmra.mrb[20].mxu0 %vm286_vm1, %v11180_v24 }
  0x3e   : > { %9624 = vmatprep.mubr.msk.f32.mxu0 %vm286_vm1, %v11183_v25 }
  0x41   : > { %9625 = vmatmul.mubr.msk.f32.gmra.mrb[22].mxu0 %vm286_vm1, %v11190_v26 }
  0x42   : > { %9627 = vmatprep.mubr.msk.f32.mxu0 %vm286_vm1, %v11193_v27 }
  0x45   : > { %9628 = vmatmul.mubr.msk.f32.gmra.mrb[24].mxu0 %vm286_vm1, %v11200_v28 }
  0x46   : > { %9630 = vmatprep.mubr.msk.f32.mxu0 %vm286_vm1, %v11203_v29 }
  0x49   : > { %9631 = vmatmul.mubr.msk.f32.gmra.mrb[26].mxu0 %vm286_vm1, %v11210_v30 }
  0x4a   : > { %9633 = vmatprep.mubr.msk.f32.mxu0 %vm286_vm1, %v11213_v31 }
  0x4d   : > { %9634 = vmatmul.mubr.msk.f32.gmra.mrb[28].mxu0 %vm286_vm1, %v11220_v32  ;;  %v11439_v32 = vld [vmem:[%s11070_s24 + $0x62] sm:$0xff] }
  0x4e   : > { %9636 = vmatprep.mubr.msk.f32.mxu0 %vm286_vm1, %v11223_v33  ;;  %v11417_v33 = vld [vmem:[%s11070_s24 + $0x32] sm:$0xff]  ;;  %14220 = vst [vmem:[#allocation17_spill] sm:$0xff] %v11439_v32 }
  0x4f   : > { %14216 = vst [vmem:[#allocation13_spill] sm:$0xff] %v11417_v33 }
  0x51   : > { %9637 = vmatmul.mubr.msk.f32.gmra.mrb[30].mxu0 %vm286_vm1, %v11230_v34  ;;  %v11406_v34 = vld [vmem:[%s14054_s1 + $0x10] sm:$0xf] }
  0x52   : > { %9641 = vmatprep.mubr.msk.f32.mxu0 %vm286_vm1, %v219_v35  ;;  %v937_v35 = vld [vmem:[%s11070_s24 + $0xa] sm:$0xff] }
  0x55   : > { %9642 = vmatmul.mubr.msk.f32.vlgmr.msra.gmra.mrb[0].mxu0 %vm286_vm1, %v220_v36  ;;  %v11401_v36 = vld [vmem:[%s11070_s24 + $0x1a] sm:$0xff] }
  0x56   : > { %9690 = vmatpush3.msk.msra.mxu0 %vm383_vm0, %v11081_v5  ;;  %9644 = vmatprep.mubr.msk.f32.mxu0 %vm286_vm1, %v11238_v37  ;;  %v936_v5 = vld [vmem:[%s11070_s24 + $0x2] sm:$0xff]  ;;  %14214 = vst [vmem:[#allocation11_spill] sm:$0xff] %v11401_v36 }
  0x57   : > { %9739 = vmatprep.subr.msk.mxu0 %vm383_vm0, %v11243_v38 }
  0x59   : > { %9645 = vmatmul.mubr.msk.f32.gmra.mrb[2].mxu0 %vm286_vm1, %v11251_v39 }
  0x5a   : > { %9647 = vmatprep.mubr.msk.f32.mxu0 %vm286_vm1, %v11254_v40 }
  0x5d   : > { %9648 = vmatmul.mubr.msk.f32.gmra.mrb[4].mxu0 %vm286_vm1, %v11263_v41 }
  0x5e   : > { %9650 = vmatprep.mubr.msk.f32.mxu0 %vm286_vm1, %v11266_v42 }
  0x61   : > { %9651 = vmatmul.mubr.msk.f32.gmra.mrb[6].mxu0 %vm286_vm1, %v11273_v43 }
  0x62   : > { %9653 = vmatprep.mubr.msk.f32.mxu0 %vm286_vm1, %v11276_v44 }
  0x65   : > { %9654 = vmatmul.mubr.msk.f32.gmra.mrb[8].mxu0 %vm286_vm1, %v11283_v45 }
  0x66   : > { %9656 = vmatprep.mubr.msk.f32.mxu0 %vm286_vm1, %v11286_v46 }
  0x69   : > { %9657 = vmatmul.mubr.msk.f32.gmra.mrb[10].mxu0 %vm286_vm1, %v11293_v47 }
  0x6a   : > { %9659 = vmatprep.mubr.msk.f32.mxu0 %vm286_vm1, %v11296_v48 }
  0x6d   : > { %9660 = vmatmul.mubr.msk.f32.gmra.mrb[12].mxu0 %vm286_vm1, %v11303_v49 }
  0x6e   : > { %9662 = vmatprep.mubr.msk.f32.mxu0 %vm286_vm1, %v11306_v50 }
  0x71   : > { %9663 = vmatmul.mubr.msk.f32.gmra.mrb[14].mxu0 %vm286_vm1, %v11313_v51 }
  0x72   : > { %9665 = vmatprep.mubr.msk.f32.mxu0 %vm286_vm1, %v11316_v52 }
  0x75   : > { %9666 = vmatmul.mubr.msk.f32.gmra.mrb[16].mxu0 %vm286_vm1, %v11323_v53 }
  0x76   : > { %9668 = vmatprep.mubr.msk.f32.mxu0 %vm286_vm1, %v11326_v54 }
  0x79   : > { %9669 = vmatmul.mubr.msk.f32.gmra.mrb[18].mxu0 %vm286_vm1, %v11333_v55 }
  0x7a   : > { %9671 = vmatprep.mubr.msk.f32.mxu0 %vm286_vm1, %v11336_v56 }
  0x7d   : > { %9672 = vmatmul.mubr.msk.f32.gmra.mrb[20].mxu0 %vm286_vm1, %v11343_v57 }
  0x7e   : > { %9674 = vmatprep.mubr.msk.f32.mxu0 %vm286_vm1, %v11346_v58 }
  0x81   : > { %9675 = vmatmul.mubr.msk.f32.gmra.mrb[22].mxu0 %vm286_vm1, %v11353_v59 }
  0x82   : > { %9677 = vmatprep.mubr.msk.f32.mxu0 %vm286_vm1, %v11356_v60 }
  0x85   : > { %9678 = vmatmul.mubr.msk.f32.gmra.mrb[24].mxu0 %vm286_vm1, %v11363_v61 }
  0x86   : > { %9680 = vmatprep.mubr.msk.f32.mxu0 %vm286_vm1, %v11366_v62 }
  0x89   : > { %9681 = vmatmul.mubr.msk.f32.gmra.mrb[26].mxu0 %vm286_vm1, %v11373_v63 }
  0x8a   : > { %9683 = vmatprep.mubr.msk.f32.mxu0 %vm286_vm1, %v11376_v0 }
  0x8d   : > { %9684 = vmatmul.mubr.msk.f32.gmra.mrb[28].mxu0 %vm286_vm1, %v11383_v1 }
  0x8e   : > { %9686 = vmatprep.mubr.msk.f32.mxu0 %vm286_vm1, %v11386_v2 }
  0x91   : > { %9687 = vmatmul.mubr.msk.f32.gmra.mrb[30].mxu0 %vm286_vm1, %v11393_v3 }
  0x92   : > { %9691 = vmatprep.mubr.msk.f32.mxu0 %vm286_vm1, %v936_v5  ;;  %v11414_v5 = vld [vmem:[%s11070_s24 + $0x22] sm:$0xff] }
  0x93   : > { %14215 = vst [vmem:[#allocation12_spill] sm:$0xff] %v11414_v5 }
  0x95   : > { %9692 = vmatmul.mubr.msk.f32.vlgmr.msra.gmra.mrb[0].mxu0 %vm286_vm1, %v937_v35  ;;  %v11429_v35 = vld [vmem:[%s11070_s24 + $0x4a] sm:$0xff] }
  0x96   : > { %9740 = vmatpush3.msk.msra.mxu0 %vm383_vm0, %v11243_v38  ;;  %9694 = vmatprep.mubr.msk.f32.mxu0 %vm286_vm1, %v11401_v36  ;;  %v11426_v38 = vld [vmem:[%s11070_s24 + $0x3a] sm:$0xff]  ;;  %14218 = vst [vmem:[#allocation15_spill] sm:$0xff] %v11429_v35  ;;  %v11436_v36 = vld [vmem:[%s11070_s24 + $0x52] sm:$0xff] }
  0x97   : > { %9789 = vmatprep.subr.msk.mxu0 %vm383_vm0, %v11406_v34  ;;  %14217 = vst [vmem:[#allocation14_spill] sm:$0xff] %v11426_v38  ;;  %14219 = vst [vmem:[#allocation16_spill] sm:$0xff] %v11436_v36 }
  0x99   : > { %9695 = vmatmul.mubr.msk.f32.gmra.mrb[2].mxu0 %vm286_vm1, %v11414_v5  ;;  %v11449_v5 = vld [vmem:[%s11070_s24 + $0x7a] sm:$0xff] }
  0x9a   : > { %9697 = vmatprep.mubr.msk.f32.mxu0 %vm286_vm1, %v11417_v33  ;;  %v11446_v33 = vld [vmem:[%s11070_s24 + $0x6a] sm:$0xff]  ;;  %14222 = vst [vmem:[#allocation19_spill] sm:$0xff] %v11449_v5 }
  0x9b   : > { %14221 = vst [vmem:[#allocation18_spill] sm:$0xff] %v11446_v33 }
  0x9d   : > { %9698 = vmatmul.mubr.msk.f32.gmra.mrb[4].mxu0 %vm286_vm1, %v11426_v38  ;;  %v11459_v38 = vld [vmem:[%s11070_s24 + $0x92] sm:$0xff] }
  0x9e   : > { %9700 = vmatprep.mubr.msk.f32.mxu0 %vm286_vm1, %v11429_v35  ;;  %v11456_v35 = vld [vmem:[%s11070_s24 + $0x82] sm:$0xff]  ;;  %14224 = vst [vmem:[#allocation21_spill] sm:$0xff] %v11459_v38 }
  0x9f   : > { %14223 = vst [vmem:[#allocation20_spill] sm:$0xff] %v11456_v35 }
  0xa1   : > { %9701 = vmatmul.mubr.msk.f32.gmra.mrb[6].mxu0 %vm286_vm1, %v11436_v36  ;;  %v11469_v36 = vld [vmem:[%s11070_s24 + $0xaa] sm:$0xff] }
  0xa2   : > { %9703 = vmatprep.mubr.msk.f32.mxu0 %vm286_vm1, %v11439_v32  ;;  %v11466_v32 = vld [vmem:[%s11070_s24 + $0x9a] sm:$0xff]  ;;  %14226 = vst [vmem:[#allocation23_spill] sm:$0xff] %v11469_v36 }
  0xa3   : > { %14225 = vst [vmem:[#allocation22_spill] sm:$0xff] %v11466_v32 }
  0xa5   : > { %9704 = vmatmul.mubr.msk.f32.gmra.mrb[8].mxu0 %vm286_vm1, %v11446_v33  ;;  %v11479_v33 = vld [vmem:[%s11070_s24 + $0xc2] sm:$0xff] }
  0xa6   : > { %9706 = vmatprep.mubr.msk.f32.mxu0 %vm286_vm1, %v11449_v5  ;;  %v11476_v5 = vld [vmem:[%s11070_s24 + $0xb2] sm:$0xff]  ;;  %14228 = vst [vmem:[#allocation25_spill] sm:$0xff] %v11479_v33 }
  0xa7   : > { %14227 = vst [vmem:[#allocation24_spill] sm:$0xff] %v11476_v5 }
  0xa9   : > { %9707 = vmatmul.mubr.msk.f32.gmra.mrb[10].mxu0 %vm286_vm1, %v11456_v35  ;;  %v11489_v35 = vld [vmem:[%s11070_s24 + $0xda] sm:$0xff] }
  0xaa   : > { %9709 = vmatprep.mubr.msk.f32.mxu0 %vm286_vm1, %v11459_v38  ;;  %v11486_v38 = vld [vmem:[%s11070_s24 + $0xca] sm:$0xff]  ;;  %14230 = vst [vmem:[#allocation27_spill] sm:$0xff] %v11489_v35 }
  0xab   : > { %14229 = vst [vmem:[#allocation26_spill] sm:$0xff] %v11486_v38 }
  0xad   : > { %9710 = vmatmul.mubr.msk.f32.gmra.mrb[12].mxu0 %vm286_vm1, %v11466_v32  ;;  %v11499_v32 = vld [vmem:[%s11070_s24 + $0xf2] sm:$0xff] }
  0xae   : > { %9712 = vmatprep.mubr.msk.f32.mxu0 %vm286_vm1, %v11469_v36  ;;  %v11496_v36 = vld [vmem:[%s11070_s24 + $0xe2] sm:$0xff]  ;;  %14232 = vst [vmem:[#allocation29_spill] sm:$0xff] %v11499_v32 }
  0xaf   : > { %14231 = vst [vmem:[#allocation28_spill] sm:$0xff] %v11496_v36 }
  0xb1   : > { %9713 = vmatmul.mubr.msk.f32.gmra.mrb[14].mxu0 %vm286_vm1, %v11476_v5  ;;  %v11509_v5 = vld [vmem:[%s11070_s24 + $0x10a] sm:$0xff] }
  0xb2   : > { %9715 = vmatprep.mubr.msk.f32.mxu0 %vm286_vm1, %v11479_v33  ;;  %v11506_v33 = vld [vmem:[%s11070_s24 + $0xfa] sm:$0xff]  ;;  %14234 = vst [vmem:[#allocation31_spill] sm:$0xff] %v11509_v5 }
  0xb3   : > { %14233 = vst [vmem:[#allocation30_spill] sm:$0xff] %v11506_v33 }
  0xb5   : > { %9716 = vmatmul.mubr.msk.f32.gmra.mrb[16].mxu0 %vm286_vm1, %v11486_v38  ;;  %v11519_v38 = vld [vmem:[%s11070_s24 + $0x122] sm:$0xff] }
  0xb6   : > { %9718 = vmatprep.mubr.msk.f32.mxu0 %vm286_vm1, %v11489_v35  ;;  %v11516_v35 = vld [vmem:[%s11070_s24 + $0x112] sm:$0xff]  ;;  %14236 = vst [vmem:[#allocation33_spill] sm:$0xff] %v11519_v38 }
  0xb7   : > { %14235 = vst [vmem:[#allocation32_spill] sm:$0xff] %v11516_v35 }
  0xb9   : > { %9719 = vmatmul.mubr.msk.f32.gmra.mrb[18].mxu0 %vm286_vm1, %v11496_v36  ;;  %v11529_v36 = vld [vmem:[%s11070_s24 + $0x13a] sm:$0xff] }
  0xba   : > { %9721 = vmatprep.mubr.msk.f32.mxu0 %vm286_vm1, %v11499_v32  ;;  %v11526_v32 = vld [vmem:[%s11070_s24 + $0x12a] sm:$0xff]  ;;  %14237 = vst [vmem:[#allocation34_spill] sm:$0xff] %v11529_v36 }
  0xbd   : > { %9722 = vmatmul.mubr.msk.f32.gmra.mrb[20].mxu0 %vm286_vm1, %v11506_v33  ;;  %v11539_v33 = vld [vmem:[%s11070_s24 + $0x152] sm:$0xff] }
  0xbe   : > { %9724 = vmatprep.mubr.msk.f32.mxu0 %vm286_vm1, %v11509_v5  ;;  %v11536_v5 = vld [vmem:[%s11070_s24 + $0x142] sm:$0xff]  ;;  %14238 = vst [vmem:[#allocation35_spill] sm:$0xff] %v11539_v33 }
  0xc1   : > { %9725 = vmatmul.mubr.msk.f32.gmra.mrb[22].mxu0 %vm286_vm1, %v11516_v35  ;;  %v11549_v35 = vld [vmem:[%s11070_s24 + $0x16a] sm:$0xff] }
  0xc2   : > { %9727 = vmatprep.mubr.msk.f32.mxu0 %vm286_vm1, %v11519_v38  ;;  %v11546_v38 = vld [vmem:[%s11070_s24 + $0x15a] sm:$0xff]  ;;  %14239 = vst [vmem:[#allocation36_spill] sm:$0xff] %v11549_v35 }
  0xc5   : > { %9728 = vmatmul.mubr.msk.f32.gmra.mrb[24].mxu0 %vm286_vm1, %v11526_v32 }
  0xc6   : > { %9730 = vmatprep.mubr.msk.f32.mxu0 %vm286_vm1, %v11529_v36  ;;  %v11556_v36 = vld [vmem:[%s11070_s24 + $0x172] sm:$0xff] }
  0xc9   : > { %9731 = vmatmul.mubr.msk.f32.gmra.mrb[26].mxu0 %vm286_vm1, %v11536_v5 }
  0xca   : > { %9733 = vmatprep.mubr.msk.f32.mxu0 %vm286_vm1, %v11539_v33  ;;  %v8421_v33 = vld [vmem:[%s14054_s1 + $0x14] sm:$0xf] }
  0xcd   : > { %9734 = vmatmul.mubr.msk.f32.gmra.mrb[28].mxu0 %vm286_vm1, %v11546_v38 }
  0xce   : > { %9736 = vmatprep.mubr.msk.f32.mxu0 %vm286_vm1, %v11549_v35 }
  0xd1   : > { %9737 = vmatmul.mubr.msk.f32.gmra.mrb[30].mxu0 %vm286_vm1, %v11556_v36 }
  0xd2   : > { %9741 = vmatprep.mubr.msk.f32.mxu0 %vm286_vm1, %v11238_v37  ;;  %v11632_v37 = vld [vmem:[%s11070_s24 + $0x188] sm:$0xff] }
  0xd5   : > { %9742 = vmatmul.mubr.msk.f32.vlgmr.msra.gmra.mrb[0].mxu0 %vm286_vm1, %v11251_v39  ;;  %v8487_v39 = vld [vmem:[%s14054_s1 + $0x18] sm:$0xf] }
  0xd6   : > { %9790 = vmatpush3.msk.msra.mxu0 %vm383_vm0, %v11406_v34  ;;  %9744 = vmatprep.mubr.msk.f32.mxu0 %vm286_vm1, %v11254_v40  ;;  %v11625_v34 = vld [vmem:[%s11070_s24 + $0x180] sm:$0xff] }
  0xd7   : > { %9839 = vmatprep.subr.msk.mxu0 %vm383_vm0, %v8421_v33 }
  0xd9   : > { %9745 = vmatmul.mubr.msk.f32.gmra.mrb[2].mxu0 %vm286_vm1, %v11263_v41 }
  0xda   : > { %9747 = vmatprep.mubr.msk.f32.mxu0 %vm286_vm1, %v11266_v42 }
  0xdd   : > { %9748 = vmatmul.mubr.msk.f32.gmra.mrb[4].mxu0 %vm286_vm1, %v11273_v43 }
  0xde   : > { %9750 = vmatprep.mubr.msk.f32.mxu0 %vm286_vm1, %v11276_v44 }
  0xe1   : > { %9751 = vmatmul.mubr.msk.f32.gmra.mrb[6].mxu0 %vm286_vm1, %v11283_v45 }
  0xe2   : > { %9753 = vmatprep.mubr.msk.f32.mxu0 %vm286_vm1, %v11286_v46 }
  0xe5   : > { %9754 = vmatmul.mubr.msk.f32.gmra.mrb[8].mxu0 %vm286_vm1, %v11293_v47 }
  0xe6   : > { %9756 = vmatprep.mubr.msk.f32.mxu0 %vm286_vm1, %v11296_v48 }
  0xe9   : > { %9757 = vmatmul.mubr.msk.f32.gmra.mrb[10].mxu0 %vm286_vm1, %v11303_v49 }
  0xea   : > { %9759 = vmatprep.mubr.msk.f32.mxu0 %vm286_vm1, %v11306_v50 }
  0xed   : > { %9760 = vmatmul.mubr.msk.f32.gmra.mrb[12].mxu0 %vm286_vm1, %v11313_v51 }
  0xee   : > { %9762 = vmatprep.mubr.msk.f32.mxu0 %vm286_vm1, %v11316_v52 }
  0xf1   : > { %9763 = vmatmul.mubr.msk.f32.gmra.mrb[14].mxu0 %vm286_vm1, %v11323_v53 }
  0xf2   : > { %9765 = vmatprep.mubr.msk.f32.mxu0 %vm286_vm1, %v11326_v54 }
  0xf5   : > { %9766 = vmatmul.mubr.msk.f32.gmra.mrb[16].mxu0 %vm286_vm1, %v11333_v55 }
  0xf6   : > { %9768 = vmatprep.mubr.msk.f32.mxu0 %vm286_vm1, %v11336_v56 }
  0xf9   : > { %9769 = vmatmul.mubr.msk.f32.gmra.mrb[18].mxu0 %vm286_vm1, %v11343_v57 }
  0xfa   : > { %9771 = vmatprep.mubr.msk.f32.mxu0 %vm286_vm1, %v11346_v58 }
  0xfd   : > { %9772 = vmatmul.mubr.msk.f32.gmra.mrb[20].mxu0 %vm286_vm1, %v11353_v59 }
  0xfe   : > { %9774 = vmatprep.mubr.msk.f32.mxu0 %vm286_vm1, %v11356_v60 }
 0x101   : > { %9775 = vmatmul.mubr.msk.f32.gmra.mrb[22].mxu0 %vm286_vm1, %v11363_v61 }
 0x102   : > { %9777 = vmatprep.mubr.msk.f32.mxu0 %vm286_vm1, %v11366_v62 }
 0x105   : > { %9778 = vmatmul.mubr.msk.f32.gmra.mrb[24].mxu0 %vm286_vm1, %v11373_v63 }
 0x106   : > { %9780 = vmatprep.mubr.msk.f32.mxu0 %vm286_vm1, %v11376_v0 }
 0x109   : > { %9781 = vmatmul.mubr.msk.f32.gmra.mrb[26].mxu0 %vm286_vm1, %v11383_v1 }
 0x10a   : > { %9783 = vmatprep.mubr.msk.f32.mxu0 %vm286_vm1, %v11386_v2 }
 0x10d   : > { %9784 = vmatmul.mubr.msk.f32.gmra.mrb[28].mxu0 %vm286_vm1, %v11393_v3 }
 0x10e   : > { %9786 = vmatprep.mubr.msk.f32.mxu0 %vm286_vm1, %v11625_v34 }
 0x111   : > { %9787 = vmatmul.mubr.msk.f32.gmra.mrb[30].mxu0 %vm286_vm1, %v11632_v37 }
 0x112   : > { %9791 = vmatprep.mubr.msk.f32.mxu0 %vm286_vm1, %v11075_v4  ;;  %v14240_v4 = vld [vmem:[#allocation8_spill] sm:$0xff] }
 0x115   : > { %9792 = vmatmul.mubr.msk.f32.vlgmr.msra.gmra.mrb[0].mxu0 %vm286_vm1, %v11088_v6  ;;  %v14241_v6 = vld [vmem:[#allocation9_spill] sm:$0xff] }
 0x116   : > { %9840 = vmatpush3.msk.msra.mxu0 %vm383_vm0, %v8421_v33  ;;  %9794 = vmatprep.mubr.msk.f32.mxu0 %vm286_vm1, %v11091_v7  ;;  %v11700_v33 = vld [vmem:[%s11070_s24 + $0x181] sm:$0xff] }
 0x117   : > { %9889 = vmatprep.subr.msk.mxu0 %vm383_vm0, %v8487_v39  ;;  %14242 = vst [vmem:[#allocation37_spill] sm:$0xff] %v11700_v33 }
 0x119   : > { %9795 = vmatmul.mubr.msk.f32.gmra.mrb[2].mxu0 %vm286_vm1, %v11100_v8 }
 0x11a   : > { %9797 = vmatprep.mubr.msk.f32.mxu0 %vm286_vm1, %v11103_v9 }
 0x11d   : > { %9798 = vmatmul.mubr.msk.f32.gmra.mrb[4].mxu0 %vm286_vm1, %v11110_v10 }
 0x11e   : > { %9800 = vmatprep.mubr.msk.f32.mxu0 %vm286_vm1, %v11113_v11 }
 0x121   : > { %9801 = vmatmul.mubr.msk.f32.gmra.mrb[6].mxu0 %vm286_vm1, %v11120_v12 }
 0x122   : > { %9803 = vmatprep.mubr.msk.f32.mxu0 %vm286_vm1, %v11123_v13 }
 0x125   : > { %9804 = vmatmul.mubr.msk.f32.gmra.mrb[8].mxu0 %vm286_vm1, %v11130_v14 }
 0x126   : > { %9806 = vmatprep.mubr.msk.f32.mxu0 %vm286_vm1, %v11133_v15 }
 0x129   : > { %9807 = vmatmul.mubr.msk.f32.gmra.mrb[10].mxu0 %vm286_vm1, %v11140_v16 }
 0x12a   : > { %9809 = vmatprep.mubr.msk.f32.mxu0 %vm286_vm1, %v11143_v17 }
 0x12d   : > { %9810 = vmatmul.mubr.msk.f32.gmra.mrb[12].mxu0 %vm286_vm1, %v11150_v18 }
 0x12e   : > { %9812 = vmatprep.mubr.msk.f32.mxu0 %vm286_vm1, %v11153_v19 }
 0x131   : > { %9813 = vmatmul.mubr.msk.f32.gmra.mrb[14].mxu0 %vm286_vm1, %v11160_v20 }
 0x132   : > { %9815 = vmatprep.mubr.msk.f32.mxu0 %vm286_vm1, %v11163_v21 }
 0x135   : > { %9816 = vmatmul.mubr.msk.f32.gmra.mrb[16].mxu0 %vm286_vm1, %v11170_v22 }
 0x136   : > { %9818 = vmatprep.mubr.msk.f32.mxu0 %vm286_vm1, %v11173_v23 }
 0x139   : > { %9819 = vmatmul.mubr.msk.f32.gmra.mrb[18].mxu0 %vm286_vm1, %v11180_v24 }
 0x13a   : > { %9821 = vmatprep.mubr.msk.f32.mxu0 %vm286_vm1, %v11183_v25 }
 0x13d   : > { %9822 = vmatmul.mubr.msk.f32.gmra.mrb[20].mxu0 %vm286_vm1, %v11190_v26 }
 0x13e   : > { %9824 = vmatprep.mubr.msk.f32.mxu0 %vm286_vm1, %v11193_v27  ;;  %v14243_v27 = vld [vmem:[#allocation10_spill] sm:$0xff] }
 0x141   : > { %9825 = vmatmul.mubr.msk.f32.gmra.mrb[22].mxu0 %vm286_vm1, %v11200_v28  ;;  %v14255_v28 = vld [vmem:[#allocation21_spill] sm:$0xff] }
 0x142   : > { %9827 = vmatprep.mubr.msk.f32.mxu0 %vm286_vm1, %v11203_v29  ;;  %v11707_v29 = vld [vmem:[%s11070_s24 + $0x189] sm:$0xff] }
 0x143   : > { %14244 = vst [vmem:[#allocation38_spill] sm:$0xff] %v11707_v29 }
 0x145   : > { %9828 = vmatmul.mubr.msk.f32.gmra.mrb[24].mxu0 %vm286_vm1, %v11210_v30  ;;  %v14251_v30 = vld [vmem:[#allocation17_spill] sm:$0xff] }
 0x146   : > { %9830 = vmatprep.mubr.msk.f32.mxu0 %vm286_vm1, %v11213_v31  ;;  %v14245_v31 = vld [vmem:[#allocation11_spill] sm:$0xff] }
 0x149   : > { %9831 = vmatmul.mubr.msk.f32.gmra.mrb[26].mxu0 %vm286_vm1, %v14240_v4  ;;  %v14246_v4 = vld [vmem:[#allocation12_spill] sm:$0xff] }
 0x14a   : > { %9833 = vmatprep.mubr.msk.f32.mxu0 %vm286_vm1, %v14241_v6  ;;  %v8553_v6 = vld [vmem:[%s14054_s1 + $0x1c] sm:$0xf] }
 0x14d   : > { %9834 = vmatmul.mubr.msk.f32.gmra.mrb[28].mxu0 %vm286_vm1, %v14243_v27  ;;  %v14247_v27 = vld [vmem:[#allocation13_spill] sm:$0xff] }
 0x14e   : > { %9836 = vmatprep.mubr.msk.f32.mxu0 %vm286_vm1, %v11700_v33  ;;  %v14248_v33 = vld [vmem:[#allocation14_spill] sm:$0xff] }
 0x151   : > { %9837 = vmatmul.mubr.msk.f32.gmra.mrb[30].mxu0 %vm286_vm1, %v11707_v29  ;;  %v14249_v29 = vld [vmem:[#allocation15_spill] sm:$0xff] }
 0x152   : > { %9841 = vmatprep.mubr.msk.f32.mxu0 %vm286_vm1, %v14245_v31  ;;  %v14250_v31 = vld [vmem:[#allocation16_spill] sm:$0xff] }
 0x155   : > { %9842 = vmatmul.mubr.msk.f32.vlgmr.msra.gmra.mrb[0].mxu0 %vm286_vm1, %v14246_v4  ;;  %v14252_v4 = vld [vmem:[#allocation18_spill] sm:$0xff] }
 0x156   : > { %9890 = vmatpush3.msk.msra.mxu0 %vm383_vm0, %v8487_v39  ;;  %9844 = vmatprep.mubr.msk.f32.mxu0 %vm286_vm1, %v14247_v27  ;;  %v14253_v39 = vld [vmem:[#allocation19_spill] sm:$0xff]  ;;  %v14254_v27 = vld [vmem:[#allocation20_spill] sm:$0xff] }
 0x157   : > { %9939 = vmatprep.subr.msk.mxu0 %vm383_vm0, %v8553_v6 }
 0x159   : > { %9845 = vmatmul.mubr.msk.f32.gmra.mrb[2].mxu0 %vm286_vm1, %v14248_v33  ;;  %v14256_v33 = vld [vmem:[#allocation22_spill] sm:$0xff] }
 0x15a   : > { %9847 = vmatprep.mubr.msk.f32.mxu0 %vm286_vm1, %v14249_v29  ;;  %v14257_v29 = vld [vmem:[#allocation23_spill] sm:$0xff] }
 0x15d   : > { %9848 = vmatmul.mubr.msk.f32.gmra.mrb[4].mxu0 %vm286_vm1, %v14250_v31  ;;  %v14258_v31 = vld [vmem:[#allocation24_spill] sm:$0xff] }
 0x15e   : > { %9850 = vmatprep.mubr.msk.f32.mxu0 %vm286_vm1, %v14251_v30  ;;  %v14259_v30 = vld [vmem:[#allocation25_spill] sm:$0xff] }
 0x161   : > { %9851 = vmatmul.mubr.msk.f32.gmra.mrb[6].mxu0 %vm286_vm1, %v14252_v4 }
 0x162   : > { %9853 = vmatprep.mubr.msk.f32.mxu0 %vm286_vm1, %v14253_v39  ;;  %v14260_v39 = vld [vmem:[#allocation26_spill] sm:$0xff] }
 0x165   : > { %9854 = vmatmul.mubr.msk.f32.gmra.mrb[8].mxu0 %vm286_vm1, %v14254_v27  ;;  %v14261_v27 = vld [vmem:[#allocation27_spill] sm:$0xff] }
 0x166   : > { %9856 = vmatprep.mubr.msk.f32.mxu0 %vm286_vm1, %v14255_v28  ;;  %v14262_v28 = vld [vmem:[#allocation28_spill] sm:$0xff] }
 0x169   : > { %9857 = vmatmul.mubr.msk.f32.gmra.mrb[10].mxu0 %vm286_vm1, %v14256_v33  ;;  %v14263_v33 = vld [vmem:[#allocation29_spill] sm:$0xff] }
 0x16a   : > { %9859 = vmatprep.mubr.msk.f32.mxu0 %vm286_vm1, %v14257_v29  ;;  %v14264_v29 = vld [vmem:[#allocation30_spill] sm:$0xff] }
 0x16d   : > { %9860 = vmatmul.mubr.msk.f32.gmra.mrb[12].mxu0 %vm286_vm1, %v14258_v31  ;;  %v14265_v31 = vld [vmem:[#allocation31_spill] sm:$0xff] }
 0x16e   : > { %9862 = vmatprep.mubr.msk.f32.mxu0 %vm286_vm1, %v14259_v30  ;;  %v14266_v30 = vld [vmem:[#allocation32_spill] sm:$0xff] }
 0x171   : > { %9863 = vmatmul.mubr.msk.f32.gmra.mrb[14].mxu0 %vm286_vm1, %v14260_v39  ;;  %v14267_v39 = vld [vmem:[#allocation33_spill] sm:$0xff] }
 0x172   : > { %9865 = vmatprep.mubr.msk.f32.mxu0 %vm286_vm1, %v14261_v27  ;;  %v14268_v27 = vld [vmem:[#allocation34_spill] sm:$0xff] }
 0x175   : > { %9866 = vmatmul.mubr.msk.f32.gmra.mrb[16].mxu0 %vm286_vm1, %v14262_v28 }
 0x176   : > { %9868 = vmatprep.mubr.msk.f32.mxu0 %vm286_vm1, %v14263_v33  ;;  %v14269_v33 = vld [vmem:[#allocation35_spill] sm:$0xff] }
 0x179   : > { %9869 = vmatmul.mubr.msk.f32.gmra.mrb[18].mxu0 %vm286_vm1, %v14264_v29 }
 0x17a   : > { %9871 = vmatprep.mubr.msk.f32.mxu0 %vm286_vm1, %v14265_v31 }
 0x17d   : > { %9872 = vmatmul.mubr.msk.f32.gmra.mrb[20].mxu0 %vm286_vm1, %v14266_v30  ;;  %v11775_v30 = vld [vmem:[%s11070_s24 + $0x182] sm:$0xff] }
 0x17e   : > { %9874 = vmatprep.mubr.msk.f32.mxu0 %vm286_vm1, %v14267_v39 }
 0x181   : > { %9875 = vmatmul.mubr.msk.f32.gmra.mrb[22].mxu0 %vm286_vm1, %v11526_v32 }
 0x182   : > { %9877 = vmatprep.mubr.msk.f32.mxu0 %vm286_vm1, %v14268_v27  ;;  %v11782_v27 = vld [vmem:[%s11070_s24 + $0x18a] sm:$0xff] }
 0x185   : > { %9878 = vmatmul.mubr.msk.f32.gmra.mrb[24].mxu0 %vm286_vm1, %v11536_v5 }
 0x186   : > { %9880 = vmatprep.mubr.msk.f32.mxu0 %vm286_vm1, %v14269_v33 }
 0x189   : > { %9881 = vmatmul.mubr.msk.f32.gmra.mrb[26].mxu0 %vm286_vm1, %v11546_v38 }
 0x18a   : > { %9883 = vmatprep.mubr.msk.f32.mxu0 %vm286_vm1, %v11549_v35  ;;  %v8619_v35 = vld [vmem:[%s14054_s1 + $0x20] sm:$0xf] }
 0x18d   : > { %9884 = vmatmul.mubr.msk.f32.gmra.mrb[28].mxu0 %vm286_vm1, %v11556_v36 }
 0x18e   : > { %9886 = vmatprep.mubr.msk.f32.mxu0 %vm286_vm1, %v11775_v30 }
 0x191   : > { %9887 = vmatmul.mubr.msk.f32.gmra.mrb[30].mxu0 %vm286_vm1, %v11782_v27 }
 0x192   : > { %9891 = vmatprep.mubr.msk.f32.mxu0 %vm286_vm1, %v11254_v40  ;;  %v8485_v40 = vld [vmem:[%s11070_s24 + $0x198] sm:$0xff] }
 0x195   : > { %9892 = vmatmul.mubr.msk.f32.vlgmr.msra.gmra.mrb[0].mxu0 %vm286_vm1, %v11263_v41  ;;  %v8486_v41 = vld [vmem:[%s11070_s24 + $0x1a0] sm:$0xff] }
 0x196   : > { %9940 = vmatpush3.msk.msra.mxu0 %vm383_vm0, %v8553_v6  ;;  %9894 = vmatprep.mubr.msk.f32.mxu0 %vm286_vm1, %v11266_v42  ;;  %v14288_v42 = vld [vmem:[#allocation22_spill] sm:$0xff] }
 0x197   : > { %9989 = vmatprep.subr.msk.mxu0 %vm383_vm0, %v8619_v35 }
 0x199   : > { %9895 = vmatmul.mubr.msk.f32.gmra.mrb[2].mxu0 %vm286_vm1, %v11273_v43  ;;  %v14289_v43 = vld [vmem:[#allocation23_spill] sm:$0xff] }
 0x19a   : > { %9897 = vmatprep.mubr.msk.f32.mxu0 %vm286_vm1, %v11276_v44  ;;  %v14290_v44 = vld [vmem:[#allocation24_spill] sm:$0xff] }
 0x19d   : > { %9898 = vmatmul.mubr.msk.f32.gmra.mrb[4].mxu0 %vm286_vm1, %v11283_v45  ;;  %v14291_v45 = vld [vmem:[#allocation25_spill] sm:$0xff] }
 0x19e   : > { %9900 = vmatprep.mubr.msk.f32.mxu0 %vm286_vm1, %v11286_v46  ;;  %v14292_v46 = vld [vmem:[#allocation26_spill] sm:$0xff] }
 0x1a1   : > { %9901 = vmatmul.mubr.msk.f32.gmra.mrb[6].mxu0 %vm286_vm1, %v11293_v47  ;;  %v14293_v47 = vld [vmem:[#allocation27_spill] sm:$0xff] }
 0x1a2   : > { %9903 = vmatprep.mubr.msk.f32.mxu0 %vm286_vm1, %v11296_v48  ;;  %v14294_v48 = vld [vmem:[#allocation29_spill] sm:$0xff] }
 0x1a5   : > { %9904 = vmatmul.mubr.msk.f32.gmra.mrb[8].mxu0 %vm286_vm1, %v11303_v49  ;;  %v14295_v49 = vld [vmem:[#allocation32_spill] sm:$0xff] }
 0x1a6   : > { %9906 = vmatprep.mubr.msk.f32.mxu0 %vm286_vm1, %v11306_v50  ;;  %v8618_v50 = vld [vmem:[%s11070_s24 + $0x1a2] sm:$0xff] }
 0x1a9   : > { %9907 = vmatmul.mubr.msk.f32.gmra.mrb[10].mxu0 %vm286_vm1, %v11313_v51 }
 0x1aa   : > { %9909 = vmatprep.mubr.msk.f32.mxu0 %vm286_vm1, %v11316_v52 }
 0x1ad   : > { %9910 = vmatmul.mubr.msk.f32.gmra.mrb[12].mxu0 %vm286_vm1, %v11323_v53 }
 0x1ae   : > { %9912 = vmatprep.mubr.msk.f32.mxu0 %vm286_vm1, %v11326_v54 }
 0x1b1   : > { %9913 = vmatmul.mubr.msk.f32.gmra.mrb[14].mxu0 %vm286_vm1, %v11333_v55 }
 0x1b2   : > { %9915 = vmatprep.mubr.msk.f32.mxu0 %vm286_vm1, %v11336_v56 }
 0x1b5   : > { %9916 = vmatmul.mubr.msk.f32.gmra.mrb[16].mxu0 %vm286_vm1, %v11343_v57 }
 0x1b6   : > { %9918 = vmatprep.mubr.msk.f32.mxu0 %vm286_vm1, %v11346_v58 }
 0x1b9   : > { %9919 = vmatmul.mubr.msk.f32.gmra.mrb[18].mxu0 %vm286_vm1, %v11353_v59 }
 0x1ba   : > { %9921 = vmatprep.mubr.msk.f32.mxu0 %vm286_vm1, %v11356_v60 }
 0x1bd   : > { %9922 = vmatmul.mubr.msk.f32.gmra.mrb[20].mxu0 %vm286_vm1, %v11363_v61 }
 0x1be   : > { %9924 = vmatprep.mubr.msk.f32.mxu0 %vm286_vm1, %v11366_v62 }
 0x1c1   : > { %9925 = vmatmul.mubr.msk.f32.gmra.mrb[22].mxu0 %vm286_vm1, %v11373_v63 }
 0x1c2   : > { %9927 = vmatprep.mubr.msk.f32.mxu0 %vm286_vm1, %v11376_v0 }
 0x1c5   : > { %9928 = vmatmul.mubr.msk.f32.gmra.mrb[24].mxu0 %vm286_vm1, %v11383_v1 }
 0x1c6   : > { %9930 = vmatprep.mubr.msk.f32.mxu0 %vm286_vm1, %v11386_v2 }
 0x1c9   : > { %9931 = vmatmul.mubr.msk.f32.gmra.mrb[26].mxu0 %vm286_vm1, %v11393_v3 }
 0x1ca   : > { %9933 = vmatprep.mubr.msk.f32.mxu0 %vm286_vm1, %v11625_v34 }
 0x1cd   : > { %9934 = vmatmul.mubr.msk.f32.gmra.mrb[28].mxu0 %vm286_vm1, %v11632_v37 }
 0x1ce   : > { %9936 = vmatprep.mubr.msk.f32.mxu0 %vm286_vm1, %v8485_v40 }
 0x1d1   : > { %9937 = vmatmul.mubr.msk.f32.gmra.mrb[30].mxu0 %vm286_vm1, %v8486_v41 }
 0x1d2   : > { %9941 = vmatprep.mubr.msk.f32.mxu0 %vm286_vm1, %v11091_v7  ;;  %v14270_v7 = vld [vmem:[#allocation3_spill] sm:$0xff] }
 0x1d5   : > { %9942 = vmatmul.mubr.msk.f32.vlgmr.msra.gmra.mrb[0].mxu0 %vm286_vm1, %v11100_v8  ;;  %v14271_v8 = vld [vmem:[#allocation4_spill] sm:$0xff] }
 0x1d6   : > { %9990 = vmatpush3.msk.msra.mxu0 %vm383_vm0, %v8619_v35  ;;  %9944 = vmatprep.mubr.msk.f32.mxu0 %vm286_vm1, %v11103_v9  ;;  %v14272_v9 = vld [vmem:[#allocation5_spill] sm:$0xff] }
 0x1d9   : > { %9945 = vmatmul.mubr.msk.f32.gmra.mrb[2].mxu0 %vm286_vm1, %v11110_v10  ;;  %v14273_v10 = vld [vmem:[#allocation6_spill] sm:$0xff] }
 0x1da   : > { %9947 = vmatprep.mubr.msk.f32.mxu0 %vm286_vm1, %v11113_v11  ;;  %v14274_v11 = vld [vmem:[#allocation7_spill] sm:$0xff] }
 0x1dd   : > { %9948 = vmatmul.mubr.msk.f32.gmra.mrb[4].mxu0 %vm286_vm1, %v11120_v12  ;;  %v14275_v12 = vld [vmem:[#allocation8_spill] sm:$0xff] }
 0x1de   : > { %9950 = vmatprep.mubr.msk.f32.mxu0 %vm286_vm1, %v11123_v13  ;;  %v14276_v13 = vld [vmem:[#allocation9_spill] sm:$0xff] }
 0x1e1   : > { %9951 = vmatmul.mubr.msk.f32.gmra.mrb[6].mxu0 %vm286_vm1, %v11130_v14  ;;  %v14277_v14 = vld [vmem:[#allocation10_spill] sm:$0xff] }
 0x1e2   : > { %9953 = vmatprep.mubr.msk.f32.mxu0 %vm286_vm1, %v11133_v15  ;;  %v14278_v15 = vld [vmem:[#allocation37_spill] sm:$0xff] }
 0x1e5   : > { %9954 = vmatmul.mubr.msk.f32.gmra.mrb[8].mxu0 %vm286_vm1, %v11140_v16  ;;  %v8551_v16 = vld [vmem:[%s11070_s24 + $0x199] sm:$0xff] }
 0x1e6   : > { %9956 = vmatprep.mubr.msk.f32.mxu0 %vm286_vm1, %v11143_v17  ;;  %v14279_v17 = vld [vmem:[#allocation38_spill] sm:$0xff] }
 0x1e9   : > { %9957 = vmatmul.mubr.msk.f32.gmra.mrb[10].mxu0 %vm286_vm1, %v11150_v18  ;;  %v8552_v18 = vld [vmem:[%s11070_s24 + $0x1a1] sm:$0xff] }
 0x1ea   : > { %9959 = vmatprep.mubr.msk.f32.mxu0 %vm286_vm1, %v11153_v19  ;;  %v14280_v19 = vld [vmem:[#allocation13_spill] sm:$0xff] }
 0x1ed   : > { %9960 = vmatmul.mubr.msk.f32.gmra.mrb[12].mxu0 %vm286_vm1, %v11160_v20  ;;  %v14281_v20 = vld [vmem:[#allocation14_spill] sm:$0xff] }
 0x1ee   : > { %9962 = vmatprep.mubr.msk.f32.mxu0 %vm286_vm1, %v11163_v21  ;;  %v14282_v21 = vld [vmem:[#allocation15_spill] sm:$0xff] }
 0x1f1   : > { %9963 = vmatmul.mubr.msk.f32.gmra.mrb[14].mxu0 %vm286_vm1, %v11170_v22  ;;  %v14283_v22 = vld [vmem:[#allocation16_spill] sm:$0xff] }
 0x1f2   : > { %9965 = vmatprep.mubr.msk.f32.mxu0 %vm286_vm1, %v11173_v23  ;;  %v14284_v23 = vld [vmem:[#allocation17_spill] sm:$0xff] }
 0x1f5   : > { %9966 = vmatmul.mubr.msk.f32.gmra.mrb[16].mxu0 %vm286_vm1, %v11180_v24  ;;  %v14285_v24 = vld [vmem:[#allocation19_spill] sm:$0xff] }
 0x1f6   : > { %9968 = vmatprep.mubr.msk.f32.mxu0 %vm286_vm1, %v11183_v25  ;;  %v14286_v25 = vld [vmem:[#allocation20_spill] sm:$0xff] }
 0x1f9   : > { %9969 = vmatmul.mubr.msk.f32.gmra.mrb[18].mxu0 %vm286_vm1, %v11190_v26  ;;  %v14287_v26 = vld [vmem:[#allocation21_spill] sm:$0xff] }
 0x1fa   : > { %9971 = vmatprep.mubr.msk.f32.mxu0 %vm286_vm1, %v14270_v7 }
 0x1fd   : > { %9972 = vmatmul.mubr.msk.f32.gmra.mrb[20].mxu0 %vm286_vm1, %v14271_v8 }
 0x1fe   : > { %9974 = vmatprep.mubr.msk.f32.mxu0 %vm286_vm1, %v14272_v9 }
 0x201   : > { %9975 = vmatmul.mubr.msk.f32.gmra.mrb[22].mxu0 %vm286_vm1, %v14273_v10 }
 0x202   : > { %9977 = vmatprep.mubr.msk.f32.mxu0 %vm286_vm1, %v14274_v11 }
 0x205   : > { %9978 = vmatmul.mubr.msk.f32.gmra.mrb[24].mxu0 %vm286_vm1, %v14275_v12 }
 0x206   : > { %9980 = vmatprep.mubr.msk.f32.mxu0 %vm286_vm1, %v14276_v13 }
 0x209   : > { %9981 = vmatmul.mubr.msk.f32.gmra.mrb[26].mxu0 %vm286_vm1, %v14277_v14 }
 0x20a   : > { %9983 = vmatprep.mubr.msk.f32.mxu0 %vm286_vm1, %v14278_v15 }
 0x20d   : > { %9984 = vmatmul.mubr.msk.f32.gmra.mrb[28].mxu0 %vm286_vm1, %v14279_v17 }
 0x20e   : > { %9986 = vmatprep.mubr.msk.f32.mxu0 %vm286_vm1, %v8551_v16 }
 0x211   : > { %9987 = vmatmul.mubr.msk.f32.gmra.mrb[30].mxu0 %vm286_vm1, %v8552_v18 }
 0x212   : > { %9991 = vmatprep.mubr.msk.f32.mxu0 %vm286_vm1, %v14280_v19 }
 0x215   : > { %9992 = vmatmul.mubr.msk.f32.vlgmr.msra.gmra.mrb[0].mxu0 %vm286_vm1, %v14281_v20 }
 0x216   : > { %9994 = vmatprep.mubr.msk.f32.mxu0 %vm286_vm1, %v14282_v21 }
 0x219   : > { %9995 = vmatmul.mubr.msk.f32.gmra.mrb[2].mxu0 %vm286_vm1, %v14283_v22 }
 0x21a   : > { %9997 = vmatprep.mubr.msk.f32.mxu0 %vm286_vm1, %v14284_v23 }
 0x21d   : > { %9998 = vmatmul.mubr.msk.f32.gmra.mrb[4].mxu0 %vm286_vm1, %v14252_v4 }
 0x21e   : > { %10000 = vmatprep.mubr.msk.f32.mxu0 %vm286_vm1, %v14285_v24 }
 0x221   : > { %10001 = vmatmul.mubr.msk.f32.gmra.mrb[6].mxu0 %vm286_vm1, %v14286_v25 }
 0x222   : > { %10003 = vmatprep.mubr.msk.f32.mxu0 %vm286_vm1, %v14287_v26 }
 0x225   : > { %10004 = vmatmul.mubr.msk.f32.gmra.mrb[8].mxu0 %vm286_vm1, %v14288_v42 }
 0x226   : > { %10006 = vmatprep.mubr.msk.f32.mxu0 %vm286_vm1, %v14289_v43 }
 0x229   : > { %10007 = vmatmul.mubr.msk.f32.gmra.mrb[10].mxu0 %vm286_vm1, %v14290_v44 }
 0x22a   : > { %10009 = vmatprep.mubr.msk.f32.mxu0 %vm286_vm1, %v14291_v45 }
 0x22d   : > { %10010 = vmatmul.mubr.msk.f32.gmra.mrb[12].mxu0 %vm286_vm1, %v14292_v46 }
 0x22e   : > { %10012 = vmatprep.mubr.msk.f32.mxu0 %vm286_vm1, %v14293_v47 }
 0x231   : > { %10013 = vmatmul.mubr.msk.f32.gmra.mrb[14].mxu0 %vm286_vm1, %v14262_v28  ;;  %v14296_v28 = vld [vmem:[#allocation34_spill] sm:$0xff] }
 0x232   : > { %10015 = vmatprep.mubr.msk.f32.mxu0 %vm286_vm1, %v14294_v48 }
 0x235   : > { %10016 = vmatmul.mubr.msk.f32.gmra.mrb[16].mxu0 %vm286_vm1, %v14264_v29  ;;  %v14297_v29 = vld [vmem:[#allocation36_spill] sm:$0xff] }
 0x236   : > { %10018 = vmatprep.mubr.msk.f32.mxu0 %vm286_vm1, %v14265_v31 }
 0x239   : > { %10019 = vmatmul.mubr.msk.f32.gmra.mrb[18].mxu0 %vm286_vm1, %v14295_v49 }
 0x23a   : > { %10021 = vmatprep.mubr.msk.f32.mxu0 %vm286_vm1, %v14267_v39 }
 0x23d   : > { %10022 = vmatmul.mubr.msk.f32.gmra.mrb[20].mxu0 %vm286_vm1, %v11526_v32  ;;  %v8617_v32 = vld [vmem:[%s11070_s24 + $0x19a] sm:$0xff] }
 0x23e   : > { %10024 = vmatprep.mubr.msk.f32.mxu0 %vm286_vm1, %v14296_v28 }
 0x241   : > { %10025 = vmatmul.mubr.msk.f32.gmra.mrb[22].mxu0 %vm286_vm1, %v11536_v5 }
 0x242   : > { %10027 = vmatprep.mubr.msk.f32.mxu0 %vm286_vm1, %v14269_v33 }
 0x245   : > { %10028 = vmatmul.mubr.msk.f32.gmra.mrb[24].mxu0 %vm286_vm1, %v11546_v38 }
 0x246   : > { %10030 = vmatprep.mubr.msk.f32.mxu0 %vm286_vm1, %v14297_v29 }
 0x249   : > { %10031 = vmatmul.mubr.msk.f32.gmra.mrb[26].mxu0 %vm286_vm1, %v11556_v36 }
 0x24a   : > { %10033 = vmatprep.mubr.msk.f32.mxu0 %vm286_vm1, %v11775_v30 }
 0x24d   : > { %10034 = vmatmul.mubr.msk.f32.gmra.mrb[28].mxu0 %vm286_vm1, %v11782_v27 }
 0x24e   : > { %10036 = vmatprep.mubr.msk.f32.mxu0 %vm286_vm1, %v8617_v32 }
 0x251   : > { %10037 = vmatmul.mubr.msk.f32.gmra.mrb[30].mxu0 %vm286_vm1, %v8618_v50 }
 0x2e8   : > { %v11984_v51 = vpop.f32.mrb[0].mxu0 }
 0x2e9   : > { %v3669_v52 = vsel %vm286_vm1, %v11984_v51, 0.0  ;;  %v11988_v53 = vpop.f32.mrb[1].mxu0 }
 0x2ea   : > { %v3668_v54 = vsel %vm286_vm1, %v11988_v53, 0.0 }
 0x2eb   : > { %v3670_v30 = vadd.f32 %v3669_v52, %v3668_v54 }
 0x2ec   : > { %v11992_v55 = vpop.f32.mrb[2].mxu0 }
 0x2ed   : > { %v11994_v56 = vpop.f32.mrb[3].mxu0  ;;  %v3673_v58 = vsel %vm286_vm1, %v11992_v55, 0.0 }
 0x2ee   : > { %v3671_v27 = vsel %vm286_vm1, %v11994_v56, 0.0 }
 0x2ef   : > { %v3672_v57 = vadd.f32 %v3671_v27, %v3670_v30 }
 0x2f0   : > { %v12000_v59 = vpop.f32.mrb[4].mxu0 }
 0x2f1   : > { %v12002_v60 = vpop.f32.mrb[5].mxu0  ;;  %v3674_v61 = vadd.f32 %v3673_v58, %v3672_v57  ;;  %v3677_v0 = vsel %vm286_vm1, %v12000_v59, 0.0 }
 0x2f2   : > { %v3675_v62 = vsel %vm286_vm1, %v12002_v60, 0.0 }
 0x2f3   : > { %v3676_v63 = vadd.f32 %v3675_v62, %v3674_v61 }
 0x2f4   : > { %v12008_v1 = vpop.f32.mrb[6].mxu0 }
 0x2f5   : > { %v12010_v2 = vpop.f32.mrb[7].mxu0  ;;  %v3678_v3 = vadd.f32 %v3677_v0, %v3676_v63  ;;  %v3681_v38 = vsel %vm286_vm1, %v12008_v1, 0.0 }
 0x2f6   : > { %v3679_v36 = vsel %vm286_vm1, %v12010_v2, 0.0 }
 0x2f7   : > { %v3680_v5 = vadd.f32 %v3679_v36, %v3678_v3 }
 0x2f8   : > { %v12016_v35 = vpop.f32.mrb[8].mxu0 }
 0x2f9   : > { %v12018_v34 = vpop.f32.mrb[9].mxu0  ;;  %v3682_v37 = vadd.f32 %v3681_v38, %v3680_v5  ;;  %v3685_v31 = vsel %vm286_vm1, %v12016_v35, 0.0 }
 0x2fa   : > { %v3683_v6 = vsel %vm286_vm1, %v12018_v34, 0.0 }
 0x2fb   : > { %v3684_v33 = vadd.f32 %v3683_v6, %v3682_v37 }
 0x2fc   : > { %v12024_v4 = vpop.f32.mrb[10].mxu0 }
 0x2fd   : > { %v12026_v39 = vpop.f32.mrb[11].mxu0  ;;  %v3686_v40 = vadd.f32 %v3685_v31, %v3684_v33  ;;  %v3689_v8 = vsel %vm286_vm1, %v12024_v4, 0.0 }
 0x2fe   : > { %v3687_v41 = vsel %vm286_vm1, %v12026_v39, 0.0 }
 0x2ff   : > { %v3688_v7 = vadd.f32 %v3687_v41, %v3686_v40 }
 0x300   : > { %v12032_v9 = vpop.f32.mrb[12].mxu0 }
 0x301   : > { %v12034_v10 = vpop.f32.mrb[13].mxu0  ;;  %v3690_v11 = vadd.f32 %v3689_v8, %v3688_v7  ;;  %v3693_v14 = vsel %vm286_vm1, %v12032_v9, 0.0 }
 0x302   : > { %v3691_v12 = vsel %vm286_vm1, %v12034_v10, 0.0 }
 0x303   : > { %v3692_v13 = vadd.f32 %v3691_v12, %v3690_v11 }
 0x304   : > { %v12040_v15 = vpop.f32.mrb[14].mxu0 }
 0x305   : > { %v12042_v16 = vpop.f32.mrb[15].mxu0  ;;  %v3694_v17 = vadd.f32 %v3693_v14, %v3692_v13  ;;  %v3697_v20 = vsel %vm286_vm1, %v12040_v15, 0.0 }
 0x306   : > { %v3695_v18 = vsel %vm286_vm1, %v12042_v16, 0.0 }
 0x307   : > { %v3696_v19 = vadd.f32 %v3695_v18, %v3694_v17 }
 0x308   : > { %v12048_v21 = vpop.f32.mrb[16].mxu0 }
 0x309   : > { %v12050_v22 = vpop.f32.mrb[17].mxu0  ;;  %v3698_v23 = vadd.f32 %v3697_v20, %v3696_v19  ;;  %v3701_v26 = vsel %vm286_vm1, %v12048_v21, 0.0 }
 0x30a   : > { %v3699_v24 = vsel %vm286_vm1, %v12050_v22, 0.0 }
 0x30b   : > { %v3700_v25 = vadd.f32 %v3699_v24, %v3698_v23 }
 0x30c   : > { %v12056_v42 = vpop.f32.mrb[18].mxu0 }
 0x30d   : > { %v12058_v43 = vpop.f32.mrb[19].mxu0  ;;  %v3702_v44 = vadd.f32 %v3701_v26, %v3700_v25  ;;  %v3705_v47 = vsel %vm286_vm1, %v12056_v42, 0.0 }
 0x30e   : > { %v3703_v45 = vsel %vm286_vm1, %v12058_v43, 0.0 }
 0x30f   : > { %v3704_v46 = vadd.f32 %v3703_v45, %v3702_v44 }
 0x310   : > { %v12064_v48 = vpop.f32.mrb[20].mxu0 }
 0x311   : > { %v12066_v49 = vpop.f32.mrb[21].mxu0  ;;  %v3706_v28 = vadd.f32 %v3705_v47, %v3704_v46  ;;  %v3709_v50 = vsel %vm286_vm1, %v12064_v48, 0.0 }
 0x312   : > { %v3707_v29 = vsel %vm286_vm1, %v12066_v49, 0.0 }
 0x313   : > { %v3708_v32 = vadd.f32 %v3707_v29, %v3706_v28 }
 0x314   : > { %v10026_v52 = vpop.f32.mrb[22].mxu0 }
 0x315   : > { %v3587_v54 = vpop.f32.mrb[23].mxu0  ;;  %v3710_v30 = vadd.f32 %v3709_v50, %v3708_v32  ;;  %v3713_v58 = vsel %vm286_vm1, %v10026_v52, 0.0 }
 0x316   : > { %v3711_v27 = vsel %vm286_vm1, %v3587_v54, 0.0 }
 0x317   : > { %v3712_v57 = vadd.f32 %v3711_v27, %v3710_v30 }
 0x318   : > { %v10029_v61 = vpop.f32.mrb[24].mxu0 }
 0x319   : > { %v3597_v62 = vpop.f32.mrb[25].mxu0  ;;  %v3714_v63 = vadd.f32 %v3713_v58, %v3712_v57  ;;  %v3717_v36 = vsel %vm286_vm1, %v10029_v61, 0.0 }
 0x31a   : > { %v3715_v0 = vsel %vm286_vm1, %v3597_v62, 0.0 }
 0x31b   : > { %v3716_v3 = vadd.f32 %v3715_v0, %v3714_v63 }
 0x31c   : > { %v10032_v5 = vpop.f32.mrb[26].mxu0 }
 0x31d   : > { %v3607_v38 = vpop.f32.mrb[27].mxu0  ;;  %v3718_v37 = vadd.f32 %v3717_v36, %v3716_v3  ;;  %v3721_v31 = vsel %vm286_vm1, %v10032_v5, 0.0 }
 0x31e   : > { %v3719_v6 = vsel %vm286_vm1, %v3607_v38, 0.0 }
 0x31f   : > { %v3720_v33 = vadd.f32 %v3719_v6, %v3718_v37 }
 0x320   : > { %v10035_v40 = vpop.f32.mrb[28].mxu0 }
 0x321   : > { %v3617_v41 = vpop.f32.mrb[29].mxu0  ;;  %v3722_v7 = vadd.f32 %v3721_v31, %v3720_v33  ;;  %v3725_v12 = vsel %vm286_vm1, %v10035_v40, 0.0 }
 0x322   : > { %v3723_v8 = vsel %vm286_vm1, %v3617_v41, 0.0 }
 0x323   : > { %v3724_v11 = vadd.f32 %v3723_v8, %v3722_v7 }
 0x324   : > { %v10038_v13 = vpop.f32.mrb[30].mxu0 }
 0x325   : > { %v3627_v14 = vpop.f32.mrb[31].mxu0  ;;  %v3726_v17 = vadd.f32 %v3725_v12, %v3724_v11  ;;  %v3729_v20 = vsel %vm286_vm1, %v10038_v13, 0.0 }
 0x326   : > { %v3727_v18 = vsel %vm286_vm1, %v3627_v14, 0.0 }
 0x327   : > { %v3728_v19 = vadd.f32 %v3727_v18, %v3726_v17 }
 0x329   : > { %v3730_v23 = vadd.f32 %v3729_v20, %v3728_v19 }
 0x32b   : > { %v3731_v24 = vrot.slane %v3730_v23, 4 }
 0x32d   : > { %v3732_v25 = vadd.f32 %v3731_v24, %v3730_v23 }
 0x32f   : > { %v3733_v26 = vrot.slane %v3732_v25, 2 }
 0x331   : > { %v3734_v44 = vadd.f32 %v3733_v26, %v3732_v25 }
 0x333   : > { %v3735_v45 = vrot.slane %v3734_v44, 1 }
 0x335   : > { %v3736_v46 = vadd.f32 %v3735_v45, %v3734_v44 }
 0x337   : > { %v3738_v47 = vmul.f32 0.00390625, %v3736_v46  ;;  %v8654_v46 = vld [vmem:[%s14055_s2 + $0x4] sm:$0xf] }
 0x338   : > { %10039 = vmatprep.subr.msk.mxu1 %vm383_vm0, %v8654_v46 }
 0x339   : > { %v12083_v28 = vsub.f32 %v11988_v53, %v3738_v47  ;;  %v12086_v29 = vsub.f32 %v11984_v51, %v3738_v47  ;;  %v12089_v32 = vsub.f32 %v11994_v56, %v3738_v47  ;;  %v12092_v50 = vsub.f32 %v11992_v55, %v3738_v47  ;;  %10040 = vmatpush3.msk.msra.mxu1 %vm383_vm0, %v8654_v46 }
 0x33a   : > { %v12095_v30 = vsub.f32 %v12002_v60, %v3738_v47  ;;  %v12098_v27 = vsub.f32 %v12000_v59, %v3738_v47  ;;  %v12101_v57 = vsub.f32 %v12010_v2, %v3738_v47  ;;  %v12104_v53 = vsub.f32 %v12008_v1, %v3738_v47 }
 0x33b   : > { %v12107_v51 = vsub.f32 %v12018_v34, %v3738_v47  ;;  %v12110_v56 = vsub.f32 %v12016_v35, %v3738_v47  ;;  %v12113_v55 = vsub.f32 %v12026_v39, %v3738_v47  ;;  %v12116_v60 = vsub.f32 %v12024_v4, %v3738_v47 }
 0x33c   : > { %v12119_v59 = vsub.f32 %v12034_v10, %v3738_v47  ;;  %v12122_v2 = vsub.f32 %v12032_v9, %v3738_v47  ;;  %v12125_v1 = vsub.f32 %v12042_v16, %v3738_v47  ;;  %v12128_v34 = vsub.f32 %v12040_v15, %v3738_v47 }
 0x33d   : > { %v12131_v35 = vsub.f32 %v12050_v22, %v3738_v47  ;;  %v12134_v39 = vsub.f32 %v12048_v21, %v3738_v47  ;;  %v12137_v4 = vsub.f32 %v12058_v43, %v3738_v47  ;;  %v12140_v10 = vsub.f32 %v12056_v42, %v3738_v47 }
 0x33e   : > { %v12143_v9 = vsub.f32 %v12066_v49, %v3738_v47  ;;  %v12146_v16 = vsub.f32 %v12064_v48, %v3738_v47  ;;  %v12148_v15 = vsub.f32 %v3587_v54, %v3738_v47  ;;  %v12150_v58 = vsub.f32 %v10026_v52, %v3738_v47 }
 0x33f   : > { %v12152_v22 = vsub.f32 %v3597_v62, %v3738_v47  ;;  %v12154_v21 = vsub.f32 %v10029_v61, %v3738_v47  ;;  %v12156_v63 = vsub.f32 %v3607_v38, %v3738_v47  ;;  %v12158_v43 = vsub.f32 %v10032_v5, %v3738_v47 }
 0x340   : > { %v12160_v42 = vsub.f32 %v3617_v41, %v3738_v47  ;;  %v12162_v0 = vsub.f32 %v10035_v40, %v3738_v47  ;;  %v12164_v49 = vsub.f32 %v3627_v14, %v3738_v47  ;;  %v12166_v48 = vsub.f32 %v10038_v13, %v3738_v47 }
 0x341   : > { %v3771_v52 = vmul.f32 %v12083_v28, %v12083_v28  ;;  %v3772_v54 = vmul.f32 %v12086_v29, %v12086_v29  ;;  %v3773_v61 = vmul.f32 %v12089_v32, %v12089_v32  ;;  %v3774_v62 = vmul.f32 %v12092_v50, %v12092_v50 }
 0x342   : > { %v3775_v38 = vmul.f32 %v12095_v30, %v12095_v30  ;;  %v3776_v33 = vmul.f32 %v12098_v27, %v12098_v27  ;;  %v3777_v41 = vmul.f32 %v12101_v57, %v12101_v57  ;;  %v3778_v11 = vmul.f32 %v12104_v53, %v12104_v53 }
 0x343   : > { %v3803_v3 = vsel %vm286_vm1, %v3771_v52, 0.0  ;;  %v3804_v36 = vsel %vm286_vm1, %v3772_v54, 0.0  ;;  %v3806_v37 = vsel %vm286_vm1, %v3773_v61, 0.0  ;;  %v3808_v31 = vsel %vm286_vm1, %v3774_v62, 0.0  ;;  %v12209_v52 = vld [vmem:[%s14055_s2] sm:$0xf] }
 0x344   : > { %v3805_v5 = vadd.f32 %v3804_v36, %v3803_v3  ;;  %v3810_v7 = vsel %vm286_vm1, %v3775_v38, 0.0  ;;  %v3812_v12 = vsel %vm286_vm1, %v3776_v33, 0.0  ;;  %v3779_v14 = vmul.f32 %v12107_v51, %v12107_v51  ;;  %14298 = vst [vmem:[#allocation11_spill] sm:$0xff] %v12209_v52  ;;  %10089 = vmatprep.subr.msk.mxu1 %vm383_vm0, %v12209_v52 }
 0x345   : > { %v3814_v17 = vsel %vm286_vm1, %v3777_v41, 0.0  ;;  %v3780_v19 = vmul.f32 %v12110_v56, %v12110_v56  ;;  %v3816_v20 = vsel %vm286_vm1, %v3778_v11, 0.0  ;;  %v3781_v24 = vmul.f32 %v12113_v55, %v12113_v55 }
 0x346   : > { %v3807_v6 = vadd.f32 %v3806_v37, %v3805_v5  ;;  %v3818_v25 = vsel %vm286_vm1, %v3779_v14, 0.0  ;;  %v3782_v44 = vmul.f32 %v12116_v60, %v12116_v60  ;;  %v3783_v54 = vmul.f32 %v12119_v59, %v12119_v59 }
 0x347   : > { %v3820_v45 = vsel %vm286_vm1, %v3780_v19, 0.0  ;;  %v3822_v61 = vsel %vm286_vm1, %v3781_v24, 0.0  ;;  %v3784_v3 = vmul.f32 %v12122_v2, %v12122_v2  ;;  %v3785_v38 = vmul.f32 %v12125_v1, %v12125_v1 }
 0x348   : > { %v3809_v40 = vadd.f32 %v3808_v31, %v3807_v6  ;;  %v3824_v36 = vsel %vm286_vm1, %v3782_v44, 0.0  ;;  %v3826_v37 = vsel %vm286_vm1, %v3783_v54, 0.0  ;;  %v3786_v33 = vmul.f32 %v12128_v34, %v12128_v34 }
 0x349   : > { %v3828_v31 = vsel %vm286_vm1, %v3784_v3, 0.0  ;;  %v3787_v41 = vmul.f32 %v12131_v35, %v12131_v35  ;;  %v3788_v11 = vmul.f32 %v12134_v39, %v12134_v39  ;;  %v3789_v14 = vmul.f32 %v12137_v4, %v12137_v4 }
 0x34a   : > { %v3811_v8 = vadd.f32 %v3810_v7, %v3809_v40  ;;  %v3830_v7 = vsel %vm286_vm1, %v3785_v38, 0.0  ;;  %v3790_v19 = vmul.f32 %v12140_v10, %v12140_v10  ;;  %v3791_v24 = vmul.f32 %v12143_v9, %v12143_v9 }
 0x34b   : > { %v3792_v44 = vmul.f32 %v12146_v16, %v12146_v16 }
 0x34c   : > { %v3813_v13 = vadd.f32 %v3812_v12, %v3811_v8  ;;  %v3832_v12 = vsel %vm286_vm1, %v3786_v33, 0.0  ;;  %v3842_v54 = vsel %vm286_vm1, %v3791_v24, 0.0 }
 0x34d   : > { %v3844_v3 = vsel %vm286_vm1, %v3792_v44, 0.0 }
 0x34e   : > { %v3815_v18 = vadd.f32 %v3814_v17, %v3813_v13  ;;  %v3834_v17 = vsel %vm286_vm1, %v3787_v41, 0.0 }
 0x350   : > { %v3817_v23 = vadd.f32 %v3816_v20, %v3815_v18  ;;  %v3836_v20 = vsel %vm286_vm1, %v3788_v11, 0.0 }
 0x352   : > { %v3819_v26 = vadd.f32 %v3818_v25, %v3817_v23  ;;  %v3838_v25 = vsel %vm286_vm1, %v3789_v14, 0.0 }
 0x354   : > { %v3821_v47 = vadd.f32 %v3820_v45, %v3819_v26  ;;  %v3840_v45 = vsel %vm286_vm1, %v3790_v19, 0.0 }
 0x356   : > { %v3823_v62 = vadd.f32 %v3822_v61, %v3821_v47  ;;  %v3793_v47 = vmul.f32 %v12148_v15, %v12148_v15 }
 0x358   : > { %v3825_v5 = vadd.f32 %v3824_v36, %v3823_v62  ;;  %v3794_v62 = vmul.f32 %v12150_v58, %v12150_v58  ;;  %v3846_v38 = vsel %vm286_vm1, %v3793_v47, 0.0 }
 0x35a   : > { %v3827_v6 = vadd.f32 %v3826_v37, %v3825_v5  ;;  %v3795_v5 = vmul.f32 %v12152_v22, %v12152_v22  ;;  %v3848_v33 = vsel %vm286_vm1, %v3794_v62, 0.0 }
 0x35c   : > { %v3829_v40 = vadd.f32 %v3828_v31, %v3827_v6  ;;  %v3796_v6 = vmul.f32 %v12154_v21, %v12154_v21  ;;  %v3850_v41 = vsel %vm286_vm1, %v3795_v5, 0.0 }
 0x35e   : > { %v3831_v8 = vadd.f32 %v3830_v7, %v3829_v40  ;;  %v3797_v40 = vmul.f32 %v12156_v63, %v12156_v63  ;;  %v3852_v11 = vsel %vm286_vm1, %v3796_v6, 0.0 }
 0x360   : > { %v3833_v13 = vadd.f32 %v3832_v12, %v3831_v8  ;;  %v3798_v8 = vmul.f32 %v12158_v43, %v12158_v43  ;;  %v3854_v14 = vsel %vm286_vm1, %v3797_v40, 0.0  ;;  %v215_v40 = vld [vmem:[%s12280_s22] sm:$0x1] }
 0x362   : > { %v3835_v18 = vadd.f32 %v3834_v17, %v3833_v13  ;;  %v3799_v13 = vmul.f32 %v12160_v42, %v12160_v42  ;;  %v3856_v19 = vsel %vm286_vm1, %v3798_v8, 0.0 }
 0x364   : > { %v3837_v23 = vadd.f32 %v3836_v20, %v3835_v18  ;;  %v3800_v18 = vmul.f32 %v12162_v0, %v12162_v0  ;;  %v3858_v24 = vsel %vm286_vm1, %v3799_v13, 0.0 }
 0x366   : > { %v3839_v26 = vadd.f32 %v3838_v25, %v3837_v23  ;;  %v3801_v23 = vmul.f32 %v12164_v49, %v12164_v49  ;;  %v3860_v44 = vsel %vm286_vm1, %v3800_v18, 0.0 }
 0x368   : > { %v3841_v46 = vadd.f32 %v3840_v45, %v3839_v26  ;;  %v3802_v26 = vmul.f32 %v12166_v48, %v12166_v48 }
 0x36a   : > { %v3843_v61 = vadd.f32 %v3842_v54, %v3841_v46  ;;  %v3862_v46 = vsel %vm286_vm1, %v3801_v23, 0.0  ;;  %v3864_v54 = vsel %vm286_vm1, %v3802_v26, 0.0 }
 0x36c   : > { %v3845_v36 = vadd.f32 %v3844_v3, %v3843_v61 }
 0x36e   : > { %v3847_v37 = vadd.f32 %v3846_v38, %v3845_v36 }
 0x370   : > { %v3849_v31 = vadd.f32 %v3848_v33, %v3847_v37  ;;  %v3875_v33 = vlaneseq }
 0x372   : > { %v3851_v7 = vadd.f32 %v3850_v41, %v3849_v31  ;;  %v12282_v31 = vshrl.u32 %v3875_v33, 7 }
 0x374   : > { %v3853_v12 = vadd.f32 %v3852_v11, %v3851_v7  ;;  %14299 = vst [vmem:[#allocation12_spill] sm:$0xff] %v12282_v31  ;;  %v14120_v41 = vsub.s32 0, %v12282_v31 }
 0x376   : > { %v3855_v17 = vadd.f32 %v3854_v14, %v3853_v12  ;;  %v12289_v12 = vld [vmem:[%s12280_s22 + $0x1] ss:$0 sm:$0xff] }
 0x378   : > { %v3857_v20 = vadd.f32 %v3856_v19, %v3855_v17 }
 0x37a   : > { %v3859_v25 = vadd.f32 %v3858_v24, %v3857_v20 }
 0x37c   : > { %v3861_v45 = vadd.f32 %v3860_v44, %v3859_v25 }
 0x37e   : > { %v3863_v47 = vadd.f32 %v3862_v46, %v3861_v45 }
 0x380   : > { %v3865_v61 = vadd.f32 %v3864_v54, %v3863_v47 }
 0x382   : > { %v3866_v62 = vrot.slane %v3865_v61, 4 }
 0x384   : > { %v3867_v3 = vadd.f32 %v3866_v62, %v3865_v61 }
 0x386   : > { %v3868_v36 = vrot.slane %v3867_v3, 2 }
 0x388   : > { %v3869_v5 = vadd.f32 %v3868_v36, %v3867_v3 }
 0x38a   : > { %v3870_v38 = vrot.slane %v3869_v5, 1 }
 0x38c   : > { %v3871_v37 = vadd.f32 %v3870_v38, %v3869_v5 }
 0x38e   : > { %v3872_v6 = vmul.f32 0.003921569, %v3871_v37 }
 0x390   : > { %11010 = vrsqrt.f32 %v3872_v6 }
 0x39a   : > { %v11011_v7 = vpop.eup %11010 }
 0x39b   : > { %v3874_v8 = vmul.f32 %v11011_v7, %v215_v40 }
 0x39d   : > { %v3878_v11 = vrot.slane %v3874_v8, %v14120_v41 }
 0x39f   : > { %v3909_v13 = vmul.f32 %v3878_v11, %v12164_v49  ;;  %v3910_v14 = vmul.f32 %v3878_v11, %v12166_v48  ;;  %v3879_v17 = vmul.f32 %v3878_v11, %v12083_v28  ;;  %v3880_v18 = vmul.f32 %v3878_v11, %v12086_v29 }
 0x3a0   : > { %v3881_v19 = vmul.f32 %v3878_v11, %v12089_v32  ;;  %v3882_v20 = vmul.f32 %v3878_v11, %v12092_v50  ;;  %v3883_v23 = vmul.f32 %v3878_v11, %v12095_v30  ;;  %v3884_v24 = vmul.f32 %v3878_v11, %v12098_v27 }
 0x3a1   : > { %v3945_v25 = vadd.f32 %v12289_v12, %v3909_v13  ;;  %v3946_v26 = vadd.f32 %v12289_v12, %v3910_v14  ;;  %v3885_v49 = vmul.f32 %v3878_v11, %v12101_v57  ;;  %v3886_v48 = vmul.f32 %v3878_v11, %v12104_v53 }
 0x3a2   : > { %v3887_v28 = vmul.f32 %v3878_v11, %v12107_v51  ;;  %v3888_v29 = vmul.f32 %v3878_v11, %v12110_v56  ;;  %v3889_v32 = vmul.f32 %v3878_v11, %v12113_v55  ;;  %v3890_v50 = vmul.f32 %v3878_v11, %v12116_v60 }
 0x3a3   : > { %v3977_v44 = vmax.f32 %v3945_v25, 0.0  ;;  %v3978_v30 = vmax.f32 %v3946_v26, 0.0  ;;  %v3891_v27 = vmul.f32 %v3878_v11, %v12119_v59  ;;  %v3892_v45 = vmul.f32 %v3878_v11, %v12122_v2 }
 0x3a4   : > { %v3893_v46 = vmul.f32 %v3878_v11, %v12125_v1  ;;  %v3894_v57 = vmul.f32 %v3878_v11, %v12128_v34  ;;  %v3895_v53 = vmul.f32 %v3878_v11, %v12131_v35  ;;  %v3896_v51 = vmul.f32 %v3878_v11, %v12134_v39 }
 0x3a5   : > { %v4010_v47 = vrot.slane %v3977_v44, 1  ;;  %v4089_v56 = vrot.slane %v3977_v44, 7  ;;  %v12313_v54 = vrot.slane %v3978_v30, 7  ;;  %v3897_v55 = vmul.f32 %v3878_v11, %v12137_v4 }
 0x3a6   : > { %v3898_v60 = vmul.f32 %v3878_v11, %v12140_v10  ;;  %v3899_v59 = vmul.f32 %v3878_v11, %v12143_v9  ;;  %v3900_v2 = vmul.f32 %v3878_v11, %v12146_v16  ;;  %v3901_v1 = vmul.f32 %v3878_v11, %v12148_v15 }
 0x3a7   : > { %14300 = vst [vmem:[#allocation18_spill] sm:$0xff] %v12313_v54  ;;  %v4091_v34 = vsel %vm4043_vm2, %v4089_v56, %v12313_v54  ;;  %v4187_v35 = vsel %vm4043_vm2, %v4010_v47, %v4089_v56  ;;  %v3902_v39 = vmul.f32 %v3878_v11, %v12150_v58  ;;  %v3903_v61 = vmul.f32 %v3878_v11, %v12152_v22 }
 0x3a8   : > { %4253 = vst.msk [vmem:[#allocation2 + $0x180] sm:$0xff] %vm286_vm1, %v4187_v35  ;;  %4254 = vst.msk [vmem:[#allocation2 + $0x188] sm:$0xff] %vm286_vm1, %v4091_v34  ;;  %v3904_v4 = vmul.f32 %v3878_v11, %v12154_v21  ;;  %v3905_v10 = vmul.f32 %v3878_v11, %v12156_v63  ;;  %v3906_v9 = vmul.f32 %v3878_v11, %v12158_v43  ;;  %v12332_v62 = vrot.slane %v3978_v30, 5 }
 0x3a9   : > { %v3907_v16 = vmul.f32 %v3878_v11, %v12160_v42  ;;  %v3908_v15 = vmul.f32 %v3878_v11, %v12162_v0  ;;  %v12335_v58 = vadd.f32 %v12289_v12, %v3879_v17  ;;  %v12338_v22 = vadd.f32 %v12289_v12, %v3880_v18 }
 0x3aa   : > { %14301 = vst [vmem:[#allocation28_spill] sm:$0xff] %v12332_v62  ;;  %v12341_v3 = vadd.f32 %v12289_v12, %v3881_v19  ;;  %v12344_v21 = vadd.f32 %v12289_v12, %v3882_v20  ;;  %v12347_v63 = vadd.f32 %v12289_v12, %v3883_v23  ;;  %v12350_v43 = vadd.f32 %v12289_v12, %v3884_v24 }
 0x3ab   : > { %v12353_v42 = vadd.f32 %v12289_v12, %v3885_v49  ;;  %v12356_v0 = vadd.f32 %v12289_v12, %v3886_v48  ;;  %v12359_v36 = vadd.f32 %v12289_v12, %v3887_v28  ;;  %v12362_v5 = vadd.f32 %v12289_v12, %v3888_v29 }
 0x3ac   : > { %v12365_v38 = vadd.f32 %v12289_v12, %v3889_v32  ;;  %v12368_v37 = vadd.f32 %v12289_v12, %v3890_v50  ;;  %v12371_v6 = vadd.f32 %v12289_v12, %v3891_v27  ;;  %v12374_v33 = vadd.f32 %v12289_v12, %v3892_v45 }
 0x3ad   : > { %v12377_v40 = vadd.f32 %v12289_v12, %v3893_v46  ;;  %v12380_v7 = vadd.f32 %v12289_v12, %v3894_v57  ;;  %v12383_v8 = vadd.f32 %v12289_v12, %v3895_v53  ;;  %v12386_v11 = vadd.f32 %v12289_v12, %v3896_v51 }
 0x3ae   : > { %v12389_v13 = vadd.f32 %v12289_v12, %v3897_v55  ;;  %v12392_v14 = vadd.f32 %v12289_v12, %v3898_v60  ;;  %v12395_v17 = vadd.f32 %v12289_v12, %v3899_v59  ;;  %v12398_v18 = vadd.f32 %v12289_v12, %v3900_v2 }
 0x3af   : > { %v12401_v19 = vadd.f32 %v12289_v12, %v3901_v1  ;;  %v12404_v20 = vadd.f32 %v12289_v12, %v3902_v39  ;;  %v12407_v23 = vadd.f32 %v12289_v12, %v3903_v61  ;;  %v12410_v24 = vadd.f32 %v12289_v12, %v3904_v4 }
 0x3b0   : > { %v12413_v25 = vadd.f32 %v12289_v12, %v3905_v10  ;;  %v12416_v26 = vadd.f32 %v12289_v12, %v3906_v9  ;;  %v12419_v49 = vadd.f32 %v12289_v12, %v3907_v16  ;;  %v12422_v48 = vadd.f32 %v12289_v12, %v3908_v15 }
 0x3b1   : > { %v3947_v28 = vmax.f32 %v12335_v58, 0.0  ;;  %v14126_v29 = vmax.f32 %v12338_v22, 0.0  ;;  %v3949_v32 = vmax.f32 %v12341_v3, 0.0  ;;  %v14124_v50 = vmax.f32 %v12344_v21, 0.0 }
 0x3b2   : > { %v3951_v44 = vmax.f32 %v12347_v63, 0.0  ;;  %v14125_v30 = vmax.f32 %v12350_v43, 0.0  ;;  %v3953_v27 = vmax.f32 %v12353_v42, 0.0  ;;  %v14127_v45 = vmax.f32 %v12356_v0, 0.0 }
 0x3b3   : > { %v3955_v46 = vmax.f32 %v12359_v36, 0.0  ;;  %v14128_v12 = vmax.f32 %v12362_v5, 0.0  ;;  %v3957_v57 = vmax.f32 %v12365_v38, 0.0  ;;  %v14129_v53 = vmax.f32 %v12368_v37, 0.0 }
 0x3b4   : > { %v3959_v51 = vmax.f32 %v12371_v6, 0.0  ;;  %v14132_v47 = vmax.f32 %v12374_v33, 0.0  ;;  %v3961_v56 = vmax.f32 %v12377_v40, 0.0  ;;  %v3963_v60 = vmax.f32 %v12383_v8, 0.0 }
 0x3b5   : > { %v3965_v2 = vmax.f32 %v12389_v13, 0.0  ;;  %v3967_v34 = vmax.f32 %v12395_v17, 0.0  ;;  %v3969_v39 = vmax.f32 %v12401_v19, 0.0  ;;  %v14121_v4 = vmax.f32 %v12407_v23, 0.0 }
 0x3b6   : > { %v14122_v9 = vmax.f32 %v12413_v25, 0.0  ;;  %v14123_v15 = vmax.f32 %v12419_v49, 0.0  ;;  %v12454_v3 = vrot.slane %v3949_v32, 1  ;;  %v12456_v63 = vrot.slane %v3947_v28, 1 }
 0x3b7   : > { %v12458_v42 = vrot.slane %v3951_v44, 1  ;;  %v12460_v36 = vrot.slane %v3953_v27, 1  ;;  %v12462_v38 = vrot.slane %v3955_v46, 1  ;;  %v12464_v6 = vrot.slane %v3957_v57, 1 }
 0x3b8   : > { %v12466_v40 = vrot.slane %v3959_v51, 1  ;;  %v12468_v8 = vrot.slane %v3961_v56, 1  ;;  %v12470_v13 = vrot.slane %v3963_v60, 1  ;;  %v12472_v17 = vrot.slane %v3965_v2, 1 }
 0x3b9   : > { %v12474_v19 = vrot.slane %v3967_v34, 1  ;;  %v12476_v41 = vrot.slane %v3969_v39, 1  ;;  %v12480_v58 = vrot.slane %v14121_v4, 1  ;;  %v12484_v16 = vrot.slane %v14122_v9, 1 }
 0x3ba   : > { %v12488_v10 = vrot.slane %v14123_v15, 1  ;;  %v12490_v61 = vrot.slane %v3949_v32, 7  ;;  %v12494_v35 = vrot.slane %v14124_v50, 7  ;;  %v12496_v1 = vrot.slane %v3947_v28, 7 }
 0x3bb   : > { %v12500_v4 = vrot.slane %v14126_v29, 7  ;;  %v12502_v59 = vrot.slane %v3951_v44, 7  ;;  %v12506_v9 = vrot.slane %v14125_v30, 7  ;;  %v12508_v15 = vrot.slane %v3953_v27, 7 }
 0x3bc   : > { %v4046_v32 = vsel %vm4043_vm2, %v12490_v61, %v12494_v35  ;;  %v12515_v28 = vrot.slane %v14127_v45, 7  ;;  %v12517_v50 = vrot.slane %v3955_v46, 7  ;;  %v12521_v44 = vrot.slane %v14128_v12, 7 }
 0x3bd   : > { %v4049_v30 = vsel %vm4043_vm2, %v12496_v1, %v12500_v4  ;;  %v4052_v27 = vsel %vm4043_vm2, %v12502_v59, %v12506_v9  ;;  %v12529_v29 = vrot.slane %v3957_v57, 7  ;;  %v12533_v45 = vrot.slane %v14129_v53, 7  ;;  %4205 = vst.msk [vmem:[#allocation2 + $0x8] sm:$0xff] %vm286_vm1, %v4046_v32  ;;  %4212 = vst.msk [vmem:[#allocation2 + $0x38] sm:$0xff] %vm286_vm1, %v4046_v32 }
 0x3be   : > { %14302 = vst [vmem:[#allocation30_spill] sm:$0xff] %v12521_v44  ;;  %v4055_v46 = vsel %vm4043_vm2, %v12508_v15, %v12515_v28  ;;  %v4058_v12 = vsel %vm4043_vm2, %v12517_v50, %v12521_v44  ;;  %v12543_v55 = vrot.slane %v3959_v51, 7  ;;  %v12547_v57 = vrot.slane %v14132_v47, 7  ;;  %4209 = vst.msk [vmem:[#allocation2 + $0x20] sm:$0xff] %vm286_vm1, %v4049_v30 }
 0x3bf   : > { %14303 = vst [vmem:[#allocation31_spill] sm:$0xff] %v12533_v45  ;;  %4215 = vst.msk [vmem:[#allocation2 + $0x50] sm:$0xff] %vm286_vm1, %v4052_v27  ;;  %v4061_v32 = vsel %vm4043_vm2, %v12529_v29, %v12533_v45  ;;  %v12554_v53 = vrot.slane %v3961_v56, 7  ;;  %v14305_v31 = vmax.f32 %v12380_v7, 0.0  ;;  %v12560_v51 = vrot.slane %v3963_v60, 7 }
 0x3c0   : > { %14304 = vst [vmem:[#allocation33_spill] sm:$0xff] %v12547_v57  ;;  %4218 = vst.msk [vmem:[#allocation2 + $0x68] sm:$0xff] %vm286_vm1, %v4055_v46  ;;  %v4064_v30 = vsel %vm4043_vm2, %v12543_v55, %v12547_v57  ;;  %v14307_v27 = vmax.f32 %v12386_v11, 0.0  ;;  %v4071_v56 = vrot.slane %v3965_v2, 7  ;;  %v14309_v54 = vmax.f32 %v12392_v14, 0.0 }
 0x3c1   : > { %v12558_v52 = vrot.slane %v14305_v31, 7  ;;  %4221 = vst.msk [vmem:[#allocation2 + $0x80] sm:$0xff] %vm286_vm1, %v4058_v12  ;;  %4224 = vst.msk [vmem:[#allocation2 + $0x98] sm:$0xff] %vm286_vm1, %v4061_v32  ;;  %v4074_v12 = vrot.slane %v3967_v34, 7  ;;  %v14311_v60 = vmax.f32 %v12398_v18, 0.0  ;;  %v4077_v57 = vrot.slane %v3969_v39, 7 }
 0x3c2   : > { %v12569_v47 = vrot.slane %v14307_v27, 7  ;;  %v12573_v62 = vrot.slane %v14309_v54, 7  ;;  %4227 = vst.msk [vmem:[#allocation2 + $0xb0] sm:$0xff] %vm286_vm1, %v4064_v30  ;;  %v14313_v32 = vmax.f32 %v12404_v20, 0.0  ;;  %v14315_v34 = vmax.f32 %v12407_v23, 0.0 }
 0x3c3   : > { %14306 = vst [vmem:[#allocation35_spill] sm:$0xff] %v12558_v52  ;;  %v4067_v31 = vsel %vm4043_vm2, %v12554_v53, %v12558_v52  ;;  %v12581_v46 = vrot.slane %v14311_v60, 7  ;;  %v14316_v30 = vmax.f32 %v12410_v24, 0.0  ;;  %v14319_v45 = vmax.f32 %v12416_v26, 0.0 }
 0x3c4   : > { %14308 = vst [vmem:[#allocation3_spill] sm:$0xff] %v12569_v47  ;;  %14310 = vst [vmem:[#allocation4_spill] sm:$0xff] %v12573_v62  ;;  %v4070_v2 = vsel %vm4043_vm2, %v12560_v51, %v12569_v47  ;;  %v4073_v54 = vsel %vm4043_vm2, %v4071_v56, %v12573_v62  ;;  %v12591_v27 = vrot.slane %v14313_v32, 7  ;;  %v4080_v52 = vrot.slane %v14315_v34, 7 }
 0x3c5   : > { %14312 = vst [vmem:[#allocation5_spill] sm:$0xff] %v12581_v46  ;;  %4230 = vst.msk [vmem:[#allocation2 + $0xc8] sm:$0xff] %vm286_vm1, %v4067_v31  ;;  %v4076_v39 = vsel %vm4043_vm2, %v4074_v12, %v12581_v46  ;;  %v12600_v60 = vrot.slane %v14316_v30, 7  ;;  %v14318_v47 = vmax.f32 %v12413_v25, 0.0  ;;  %v12606_v32 = vrot.slane %v14319_v45, 7 }
 0x3c6   : > { %14314 = vst [vmem:[#allocation6_spill] sm:$0xff] %v12591_v27  ;;  %4233 = vst.msk [vmem:[#allocation2 + $0xe0] sm:$0xff] %vm286_vm1, %v4070_v2  ;;  %v4079_v23 = vsel %vm4043_vm2, %v4077_v57, %v12591_v27  ;;  %v14321_v31 = vmax.f32 %v12419_v49, 0.0  ;;  %v14322_v30 = vmax.f32 %v12422_v48, 0.0  ;;  %v14323_v25 = vmax.f32 %v12344_v21, 0.0 }
 0x3c7   : > { %14317 = vst [vmem:[#allocation7_spill] sm:$0xff] %v12600_v60  ;;  %v4083_v62 = vrot.slane %v14318_v47, 7  ;;  %14320 = vst [vmem:[#allocation8_spill] sm:$0xff] %v12606_v32  ;;  %v4082_v45 = vsel %vm4043_vm2, %v4080_v52, %v12600_v60  ;;  %v14325_v49 = vmax.f32 %v12350_v43, 0.0  ;;  %v14328_v44 = vmax.f32 %v12368_v37, 0.0 }
 0x3c8   : > { %4236 = vst.msk [vmem:[#allocation2 + $0xf8] sm:$0xff] %vm286_vm1, %v4073_v54  ;;  %v4086_v34 = vrot.slane %v14321_v31, 7  ;;  %v12616_v46 = vrot.slane %v14322_v30, 7  ;;  %v4140_v47 = vrot.slane %v14323_v25, 5  ;;  %4239 = vst.msk [vmem:[#allocation2 + $0x110] sm:$0xff] %vm286_vm1, %v4076_v39  ;;  %v14324_v54 = vmax.f32 %v12338_v22, 0.0 }
 0x3c9   : > { %v4085_v2 = vsel %vm4043_vm2, %v4083_v62, %v12606_v32  ;;  %v4142_v31 = vrot.slane %v14325_v49, 5  ;;  %4242 = vst.msk [vmem:[#allocation2 + $0x128] sm:$0xff] %vm286_vm1, %v4079_v23  ;;  %v14326_v30 = vmax.f32 %v12356_v0, 0.0  ;;  %v14327_v25 = vmax.f32 %v12362_v5, 0.0  ;;  %4245 = vst.msk [vmem:[#allocation2 + $0x140] sm:$0xff] %vm286_vm1, %v4082_v45 }
 0x3ca   : > { %v4141_v27 = vrot.slane %v14324_v54, 5  ;;  %v4088_v21 = vsel %vm4043_vm2, %v4086_v34, %v12616_v46  ;;  %v4145_v32 = vrot.slane %v14328_v44, 5  ;;  %4248 = vst.msk [vmem:[#allocation2 + $0x158] sm:$0xff] %vm286_vm1, %v4085_v2  ;;  %v14329_v22 = vmax.f32 %v12374_v33, 0.0 }
 0x3cb   : > { %v4143_v39 = vrot.slane %v14326_v30, 5  ;;  %v4144_v60 = vrot.slane %v14327_v25, 5  ;;  %v14330_v23 = vmax.f32 %v12380_v7, 0.0  ;;  %v14331_v49 = vmax.f32 %v12386_v11, 0.0  ;;  %4251 = vst.msk [vmem:[#allocation2 + $0x170] sm:$0xff] %vm286_vm1, %v4088_v21  ;;  %4257 = vst.msk [vmem:[#allocation2 + $0x1a0] sm:$0xff] %vm286_vm1, %v4088_v21 }
 0x3cc   : > { %v4146_v43 = vrot.slane %v14329_v22, 5  ;;  %v14332_v30 = vmax.f32 %v12392_v14, 0.0  ;;  %v14333_v37 = vmax.f32 %v12398_v18, 0.0  ;;  %v14334_v45 = vmax.f32 %v12404_v20, 0.0 }
 0x3cd   : > { %v4147_v54 = vrot.slane %v14330_v23, 5  ;;  %v4148_v0 = vrot.slane %v14331_v49, 5  ;;  %v14335_v2 = vmax.f32 %v12410_v24, 0.0  ;;  %v14336_v25 = vmax.f32 %v12416_v26, 0.0 }
 0x3ce   : > { %v4149_v5 = vrot.slane %v14332_v30, 5  ;;  %v4150_v44 = vrot.slane %v14333_v37, 5  ;;  %v4151_v33 = vrot.slane %v14334_v45, 5  ;;  %v14337_v22 = vmax.f32 %v12422_v48, 0.0 }
 0x3cf   : > { %v4152_v7 = vrot.slane %v14335_v2, 5  ;;  %v4153_v11 = vrot.slane %v14336_v25, 5  ;;  %v4172_v23 = vsel %vm4043_vm2, %v12454_v3, %v12490_v61  ;;  %v4173_v18 = vsel %vm4043_vm2, %v12456_v63, %v12496_v1 }
 0x3d0   : > { %v4154_v14 = vrot.slane %v14337_v22, 5  ;;  %v4174_v20 = vsel %vm4043_vm2, %v12458_v42, %v12502_v59  ;;  %v4175_v24 = vsel %vm4043_vm2, %v12460_v36, %v12508_v15  ;;  %v4176_v26 = vsel %vm4043_vm2, %v12462_v38, %v12517_v50  ;;  %4204 = vst.msk [vmem:[#allocation2] sm:$0xff] %vm286_vm1, %v4172_v23  ;;  %4208 = vst.msk [vmem:[#allocation2 + $0x18] sm:$0xff] %vm286_vm1, %v4173_v18  ;;  %v14341_v42 = vld [vmem:[#allocation35_spill] sm:$0xff] }
 0x3d1   : > { %v4177_v48 = vsel %vm4043_vm2, %v12464_v6, %v12529_v29  ;;  %v4178_v1 = vsel %vm4043_vm2, %v12466_v40, %v12543_v55  ;;  %4211 = vst.msk [vmem:[#allocation2 + $0x30] sm:$0xff] %vm286_vm1, %v4172_v23  ;;  %4214 = vst.msk [vmem:[#allocation2 + $0x48] sm:$0xff] %vm286_vm1, %v4174_v20  ;;  %v4179_v50 = vsel %vm4043_vm2, %v12468_v8, %v12554_v53  ;;  %v14342_v38 = vld [vmem:[#allocation3_spill] sm:$0xff]  ;;  %v14343_v40 = vld [vmem:[#allocation4_spill] sm:$0xff] }
 0x3d2   : > { %v4180_v29 = vsel %vm4043_vm2, %v12470_v13, %v12560_v51  ;;  %v4181_v59 = vsel %vm4043_vm2, %v12472_v17, %v4071_v56  ;;  %v4182_v55 = vsel %vm4043_vm2, %v12474_v19, %v4074_v12  ;;  %4217 = vst.msk [vmem:[#allocation2 + $0x60] sm:$0xff] %vm286_vm1, %v4175_v24  ;;  %4220 = vst.msk [vmem:[#allocation2 + $0x78] sm:$0xff] %vm286_vm1, %v4176_v26  ;;  %v14344_v13 = vld [vmem:[#allocation5_spill] sm:$0xff]  ;;  %v14345_v19 = vld [vmem:[#allocation6_spill] sm:$0xff] }
 0x3d3   : > { %4223 = vst.msk [vmem:[#allocation2 + $0x90] sm:$0xff] %vm286_vm1, %v4177_v48  ;;  %4226 = vst.msk [vmem:[#allocation2 + $0xa8] sm:$0xff] %vm286_vm1, %v4178_v1  ;;  %v4183_v53 = vsel %vm4043_vm2, %v12476_v41, %v4077_v57  ;;  %v4184_v61 = vsel %vm4043_vm2, %v12480_v58, %v4080_v52  ;;  %v4185_v15 = vsel %vm4043_vm2, %v12484_v16, %v4083_v62  ;;  %v14346_v57 = vld [vmem:[#allocation7_spill] sm:$0xff]  ;;  %v14347_v56 = vld [vmem:[#allocation8_spill] sm:$0xff] }
 0x3d4   : > { %v4186_v3 = vsel %vm4043_vm2, %v12488_v10, %v4086_v34  ;;  %4229 = vst.msk [vmem:[#allocation2 + $0xc0] sm:$0xff] %vm286_vm1, %v4179_v50  ;;  %4232 = vst.msk [vmem:[#allocation2 + $0xd8] sm:$0xff] %vm286_vm1, %v4180_v29  ;;  %v4188_v41 = vsel %vm4043_vm2, %v12494_v35, %v4140_v47  ;;  %v4189_v52 = vsel %vm4043_vm2, %v12500_v4, %v4141_v27  ;;  %v14338_v35 = vld [vmem:[#allocation30_spill] sm:$0xff]  ;;  %v14339_v4 = vld [vmem:[#allocation31_spill] sm:$0xff] }
 0x3d5   : > { %4235 = vst.msk [vmem:[#allocation2 + $0xf0] sm:$0xff] %vm286_vm1, %v4181_v59  ;;  %4238 = vst.msk [vmem:[#allocation2 + $0x108] sm:$0xff] %vm286_vm1, %v4182_v55  ;;  %v4190_v62 = vsel %vm4043_vm2, %v12506_v9, %v4142_v31  ;;  %v4191_v10 = vsel %vm4043_vm2, %v12515_v28, %v4143_v39  ;;  %v4192_v16 = vsel %vm4043_vm2, %v14338_v35, %v4144_v60  ;;  %v14340_v9 = vld [vmem:[#allocation33_spill] sm:$0xff]  ;;  %v14348_v60 = vld [vmem:[#allocation28_spill] sm:$0xff] }
 0x3d6   : > { %4241 = vst.msk [vmem:[#allocation2 + $0x120] sm:$0xff] %vm286_vm1, %v4183_v53  ;;  %4244 = vst.msk [vmem:[#allocation2 + $0x138] sm:$0xff] %vm286_vm1, %v4184_v61  ;;  %v4193_v58 = vsel %vm4043_vm2, %v14339_v4, %v4145_v32  ;;  %v4194_v63 = vsel %vm4043_vm2, %v14340_v9, %v4146_v43  ;;  %v4195_v36 = vsel %vm4043_vm2, %v14341_v42, %v4147_v54  ;;  %v14349_v32 = vld [vmem:[#allocation18_spill] sm:$0xff]  ;;  %v14350_v39 = vld [vmem:[#allocation11_spill] sm:$0xff] }
 0x3d7   : > { %4247 = vst.msk [vmem:[#allocation2 + $0x150] sm:$0xff] %vm286_vm1, %v4185_v15  ;;  %4250 = vst.msk [vmem:[#allocation2 + $0x168] sm:$0xff] %vm286_vm1, %v4186_v3  ;;  %v4196_v6 = vsel %vm4043_vm2, %v14342_v38, %v4148_v0  ;;  %v4197_v8 = vsel %vm4043_vm2, %v14343_v40, %v4149_v5  ;;  %v4198_v17 = vsel %vm4043_vm2, %v14344_v13, %v4150_v44  ;;  %v12771_v31 = vld [vmem:[%s14055_s2 + $0x8] sm:$0xf]  ;;  %v12774_v21 = vld [vmem:[#allocation2 + $0x19] sm:$0xff] }
 0x3d8   : > { %4256 = vst.msk [vmem:[#allocation2 + $0x198] sm:$0xff] %vm286_vm1, %v4186_v3  ;;  %v4199_v28 = vsel %vm4043_vm2, %v14345_v19, %v4151_v33  ;;  %v4200_v51 = vsel %vm4043_vm2, %v14346_v57, %v4152_v7  ;;  %v4201_v12 = vsel %vm4043_vm2, %v14347_v56, %v4153_v11  ;;  %v4202_v27 = vsel %vm4043_vm2, %v12616_v46, %v4154_v14  ;;  %v4292_v46 = vld [vmem:[#allocation2 + $0x1] sm:$0xff]  ;;  %v12786_v54 = vld [vmem:[#allocation2 + $0x31] sm:$0xff]  ;;  %v12794_v0 = vld [vmem:[#allocation2 + $0x49] sm:$0xff] }
 0x3d9   : > { %4207 = vst.msk [vmem:[#allocation2 + $0x10] sm:$0x3] %vm4206_vm3, %v4188_v41  ;;  %4210 = vst.msk [vmem:[#allocation2 + $0x28] sm:$0x3] %vm4206_vm3, %v4189_v52  ;;  %v4203_v34 = vsel %vm4043_vm2, %v14349_v32, %v14348_v60  ;;  %10041 = vmatprep.mubr.msk.f32.mxu1 %vm286_vm1, %v4292_v46  ;;  %v12802_v5 = vld [vmem:[#allocation2 + $0x61] sm:$0xff]  ;;  %v12810_v44 = vld [vmem:[#allocation2 + $0x79] sm:$0xff] }
 0x3da   : > { %4213 = vst.msk [vmem:[#allocation2 + $0x40] sm:$0x3] %vm4206_vm3, %v4188_v41  ;;  %4216 = vst.msk [vmem:[#allocation2 + $0x58] sm:$0x3] %vm4206_vm3, %v4190_v62  ;;  %v12818_v33 = vld [vmem:[#allocation2 + $0x91] sm:$0xff]  ;;  %v12826_v7 = vld [vmem:[#allocation2 + $0xa9] sm:$0xff] }
 0x3db   : > { %4219 = vst.msk [vmem:[#allocation2 + $0x70] sm:$0x3] %vm4206_vm3, %v4191_v10  ;;  %4222 = vst.msk [vmem:[#allocation2 + $0x88] sm:$0x3] %vm4206_vm3, %v4192_v16  ;;  %v12834_v11 = vld [vmem:[#allocation2 + $0xc1] sm:$0xff]  ;;  %v12842_v14 = vld [vmem:[#allocation2 + $0xd9] sm:$0xff] }
 0x3dc   : > { %4225 = vst.msk [vmem:[#allocation2 + $0xa0] sm:$0x3] %vm4206_vm3, %v4193_v58  ;;  %4228 = vst.msk [vmem:[#allocation2 + $0xb8] sm:$0x3] %vm4206_vm3, %v4194_v63  ;;  %v12850_v18 = vld [vmem:[#allocation2 + $0xf1] sm:$0xff]  ;;  %v12858_v24 = vld [vmem:[#allocation2 + $0x109] sm:$0xff] }
 0x3dd   : > { %4231 = vst.msk [vmem:[#allocation2 + $0xd0] sm:$0x3] %vm4206_vm3, %v4195_v36  ;;  %4234 = vst.msk [vmem:[#allocation2 + $0xe8] sm:$0x3] %vm4206_vm3, %v4196_v6  ;;  %v12866_v48 = vld [vmem:[#allocation2 + $0x121] sm:$0xff]  ;;  %v12874_v50 = vld [vmem:[#allocation2 + $0x139] sm:$0xff] }
 0x3de   : > { %4237 = vst.msk [vmem:[#allocation2 + $0x100] sm:$0x3] %vm4206_vm3, %v4197_v8  ;;  %4240 = vst.msk [vmem:[#allocation2 + $0x118] sm:$0x3] %vm4206_vm3, %v4198_v17  ;;  %v12882_v59 = vld [vmem:[#allocation2 + $0x151] sm:$0xff]  ;;  %v12890_v53 = vld [vmem:[#allocation2 + $0x169] sm:$0xff] }
 0x3df   : > { %4243 = vst.msk [vmem:[#allocation2 + $0x130] sm:$0x3] %vm4206_vm3, %v4199_v28  ;;  %4246 = vst.msk [vmem:[#allocation2 + $0x148] sm:$0x3] %vm4206_vm3, %v4200_v51  ;;  %v4259_v15 = vld [vmem:[#allocation2] sm:$0xff]  ;;  %v4260_v3 = vld [vmem:[#allocation2 + $0x8] sm:$0xff] }
 0x3e0   : > { %4249 = vst.msk [vmem:[#allocation2 + $0x160] sm:$0x3] %vm4206_vm3, %v4201_v12  ;;  %4252 = vst.msk [vmem:[#allocation2 + $0x178] sm:$0x3] %vm4206_vm3, %v4202_v27  ;;  %v4293_v47 = vld [vmem:[#allocation2 + $0x9] sm:$0xff]  ;;  %v12782_v43 = vld [vmem:[#allocation2 + $0x21] sm:$0xff] }
 0x3e1   : > { %4255 = vst.msk [vmem:[#allocation2 + $0x190] sm:$0x3] %vm4206_vm3, %v4203_v34  ;;  %4258 = vst.msk [vmem:[#allocation2 + $0x1a8] sm:$0x3] %vm4206_vm3, %v4202_v27  ;;  %10042 = vmatmul.mubr.msk.f32.vlgmr.msra.gmra.mrb[0].mxu1 %vm286_vm1, %v4293_v47  ;;  %v12790_v49 = vld [vmem:[#allocation2 + $0x39] sm:$0xff]  ;;  %v12798_v30 = vld [vmem:[#allocation2 + $0x51] sm:$0xff] }
 0x3e2   : > { %10090 = vmatpush3.msk.msra.mxu1 %vm383_vm0, %v14350_v39  ;;  %10044 = vmatprep.mubr.msk.f32.mxu1 %vm286_vm1, %v12774_v21  ;;  %v12806_v37 = vld [vmem:[#allocation2 + $0x69] sm:$0xff]  ;;  %v12814_v45 = vld [vmem:[#allocation2 + $0x81] sm:$0xff]  ;;  %14352 = vst [vmem:[#allocation10_spill] sm:$0xff] %v12874_v50  ;;  %14354 = vst [vmem:[#allocation38_spill] sm:$0xff] %v12882_v59 }
 0x3e3   : > { %10139 = vmatprep.subr.msk.mxu1 %vm383_vm0, %v12771_v31  ;;  %v12822_v2 = vld [vmem:[#allocation2 + $0x99] sm:$0xff]  ;;  %v12830_v25 = vld [vmem:[#allocation2 + $0xb1] sm:$0xff]  ;;  %14356 = vst [vmem:[#allocation14_spill] sm:$0xff] %v12890_v53  ;;  %v12902_v41 = vld [vmem:[%s14055_s2 + $0xc] sm:$0xf] }
 0x3e4   : > { %v12838_v22 = vld [vmem:[#allocation2 + $0xc9] sm:$0xff]  ;;  %v12846_v23 = vld [vmem:[#allocation2 + $0xe1] sm:$0xff]  ;;  %v12905_v52 = vld [vmem:[#allocation2 + $0x18] sm:$0xff] }
 0x3e5   : > { %10045 = vmatmul.mubr.msk.f32.gmra.mrb[2].mxu1 %vm286_vm1, %v12782_v43  ;;  %v12854_v20 = vld [vmem:[#allocation2 + $0xf9] sm:$0xff]  ;;  %v12862_v26 = vld [vmem:[#allocation2 + $0x111] sm:$0xff]  ;;  %v12925_v16 = vld [vmem:[#allocation2 + $0x48] sm:$0xff] }
 0x3e6   : > { %10047 = vmatprep.mubr.msk.f32.mxu1 %vm286_vm1, %v12786_v54  ;;  %v12870_v1 = vld [vmem:[#allocation2 + $0x129] sm:$0xff]  ;;  %v12878_v29 = vld [vmem:[#allocation2 + $0x141] sm:$0xff]  ;;  %v12921_v35 = vld [vmem:[#allocation2 + $0x38] sm:$0xff] }
 0x3e7   : > { %14351 = vst [vmem:[#allocation9_spill] sm:$0xff] %v12870_v1  ;;  %14353 = vst [vmem:[#allocation37_spill] sm:$0xff] %v12878_v29  ;;  %v12886_v55 = vld [vmem:[#allocation2 + $0x159] sm:$0xff]  ;;  %v12894_v61 = vld [vmem:[#allocation2 + $0x171] sm:$0xff] }
 0x3e8   : > { %14355 = vst [vmem:[#allocation13_spill] sm:$0xff] %v12886_v55  ;;  %14357 = vst [vmem:[#allocation15_spill] sm:$0xff] %v12894_v61  ;;  %v12913_v62 = vld [vmem:[#allocation2 + $0x20] sm:$0xff]  ;;  %v12917_v10 = vld [vmem:[#allocation2 + $0x30] sm:$0xff] }
 0x3e9   : > { %10048 = vmatmul.mubr.msk.f32.gmra.mrb[4].mxu1 %vm286_vm1, %v12790_v49  ;;  %v12929_v4 = vld [vmem:[#allocation2 + $0x50] sm:$0xff]  ;;  %v12933_v58 = vld [vmem:[#allocation2 + $0x60] sm:$0xff]  ;;  %v12937_v9 = vld [vmem:[#allocation2 + $0x68] sm:$0xff] }
 0x3ea   : > { %10050 = vmatprep.mubr.msk.f32.mxu1 %vm286_vm1, %v12794_v0  ;;  %v12941_v63 = vld [vmem:[#allocation2 + $0x78] sm:$0xff]  ;;  %v12945_v42 = vld [vmem:[#allocation2 + $0x80] sm:$0xff]  ;;  %v12949_v36 = vld [vmem:[#allocation2 + $0x90] sm:$0xff] }
 0x3eb   : > { %v12953_v38 = vld [vmem:[#allocation2 + $0x98] sm:$0xff]  ;;  %v12957_v6 = vld [vmem:[#allocation2 + $0xa8] sm:$0xff]  ;;  %v12961_v40 = vld [vmem:[#allocation2 + $0xb0] sm:$0xff] }
 0x3ec   : > { %v12965_v8 = vld [vmem:[#allocation2 + $0xc0] sm:$0xff]  ;;  %v12969_v13 = vld [vmem:[#allocation2 + $0xc8] sm:$0xff]  ;;  %v12973_v17 = vld [vmem:[#allocation2 + $0xd8] sm:$0xff] }
 0x3ed   : > { %10051 = vmatmul.mubr.msk.f32.gmra.mrb[6].mxu1 %vm286_vm1, %v12798_v30  ;;  %v12977_v19 = vld [vmem:[#allocation2 + $0xe0] sm:$0xff]  ;;  %v12981_v28 = vld [vmem:[#allocation2 + $0xf0] sm:$0xff]  ;;  %v12985_v57 = vld [vmem:[#allocation2 + $0xf8] sm:$0xff] }
 0x3ee   : > { %10053 = vmatprep.mubr.msk.f32.mxu1 %vm286_vm1, %v12802_v5  ;;  %v12989_v51 = vld [vmem:[#allocation2 + $0x108] sm:$0xff]  ;;  %v12993_v56 = vld [vmem:[#allocation2 + $0x110] sm:$0xff]  ;;  %v12997_v12 = vld [vmem:[#allocation2 + $0x120] sm:$0xff] }
 0x3ef   : > { %v13001_v27 = vld [vmem:[#allocation2 + $0x128] sm:$0xff]  ;;  %v13005_v60 = vld [vmem:[#allocation2 + $0x138] sm:$0xff]  ;;  %v13009_v32 = vld [vmem:[#allocation2 + $0x140] sm:$0xff] }
 0x3f0   : > { %v13013_v34 = vld [vmem:[#allocation2 + $0x150] sm:$0xff]  ;;  %v13017_v46 = vld [vmem:[#allocation2 + $0x158] sm:$0xff]  ;;  %v13021_v47 = vld [vmem:[#allocation2 + $0x168] sm:$0xff] }
 0x3f1   : > { %10054 = vmatmul.mubr.msk.f32.gmra.mrb[8].mxu1 %vm286_vm1, %v12806_v37  ;;  %v4974_v39 = vld [vmem:[#allocation2 + $0x2] sm:$0xff] }
 0x3f2   : > { %10056 = vmatprep.mubr.msk.f32.mxu1 %vm286_vm1, %v12810_v44 }
 0x3f5   : > { %10057 = vmatmul.mubr.msk.f32.gmra.mrb[10].mxu1 %vm286_vm1, %v12814_v45 }
 0x3f6   : > { %10059 = vmatprep.mubr.msk.f32.mxu1 %vm286_vm1, %v12818_v33 }
 0x3f9   : > { %10060 = vmatmul.mubr.msk.f32.gmra.mrb[12].mxu1 %vm286_vm1, %v12822_v2 }
 0x3fa   : > { %10062 = vmatprep.mubr.msk.f32.mxu1 %vm286_vm1, %v12826_v7 }
 0x3fd   : > { %10063 = vmatmul.mubr.msk.f32.gmra.mrb[14].mxu1 %vm286_vm1, %v12830_v25 }
 0x3fe   : > { %10065 = vmatprep.mubr.msk.f32.mxu1 %vm286_vm1, %v12834_v11 }
 0x401   : > { %10066 = vmatmul.mubr.msk.f32.gmra.mrb[16].mxu1 %vm286_vm1, %v12838_v22 }
 0x402   : > { %10068 = vmatprep.mubr.msk.f32.mxu1 %vm286_vm1, %v12842_v14 }
 0x405   : > { %10069 = vmatmul.mubr.msk.f32.gmra.mrb[18].mxu1 %vm286_vm1, %v12846_v23 }
 0x406   : > { %10071 = vmatprep.mubr.msk.f32.mxu1 %vm286_vm1, %v12850_v18 }
 0x409   : > { %10072 = vmatmul.mubr.msk.f32.gmra.mrb[20].mxu1 %vm286_vm1, %v12854_v20 }
 0x40a   : > { %10074 = vmatprep.mubr.msk.f32.mxu1 %vm286_vm1, %v12858_v24 }
 0x40d   : > { %10075 = vmatmul.mubr.msk.f32.gmra.mrb[22].mxu1 %vm286_vm1, %v12862_v26 }
 0x40e   : > { %10077 = vmatprep.mubr.msk.f32.mxu1 %vm286_vm1, %v12866_v48 }
 0x411   : > { %10078 = vmatmul.mubr.msk.f32.gmra.mrb[24].mxu1 %vm286_vm1, %v12870_v1 }
 0x412   : > { %10080 = vmatprep.mubr.msk.f32.mxu1 %vm286_vm1, %v12874_v50 }
 0x415   : > { %10081 = vmatmul.mubr.msk.f32.gmra.mrb[26].mxu1 %vm286_vm1, %v12878_v29 }
 0x416   : > { %10083 = vmatprep.mubr.msk.f32.mxu1 %vm286_vm1, %v12882_v59 }
 0x419   : > { %10084 = vmatmul.mubr.msk.f32.gmra.mrb[28].mxu1 %vm286_vm1, %v12886_v55 }
 0x41a   : > { %10086 = vmatprep.mubr.msk.f32.mxu1 %vm286_vm1, %v12890_v53  ;;  %v13048_v53 = vld [vmem:[#allocation2 + $0x32] sm:$0xff] }
 0x41b   : > { %14360 = vst [vmem:[#allocation19_spill] sm:$0xff] %v13048_v53 }
 0x41d   : > { %10087 = vmatmul.mubr.msk.f32.gmra.mrb[30].mxu1 %vm286_vm1, %v12894_v61  ;;  %v13036_v61 = vld [vmem:[#allocation2 + $0x1a] sm:$0xff] }
 0x41e   : > { %10091 = vmatprep.mubr.msk.f32.mxu1 %vm286_vm1, %v4259_v15  ;;  %v4975_v15 = vld [vmem:[#allocation2 + $0xa] sm:$0xff]  ;;  %14358 = vst [vmem:[#allocation16_spill] sm:$0xff] %v13036_v61 }
 0x421   : > { %10092 = vmatmul.mubr.msk.f32.vlgmr.msra.gmra.mrb[0].mxu1 %vm286_vm1, %v4260_v3  ;;  %v13033_v3 = vld [vmem:[%s14055_s2 + $0x10] sm:$0xf] }
 0x422   : > { %10140 = vmatpush3.msk.msra.mxu1 %vm383_vm0, %v12771_v31  ;;  %10094 = vmatprep.mubr.msk.f32.mxu1 %vm286_vm1, %v12905_v52  ;;  %v13025_v31 = vld [vmem:[#allocation2 + $0x170] sm:$0xff] }
 0x423   : > { %10189 = vmatprep.subr.msk.mxu1 %vm383_vm0, %v12902_v41 }
 0x425   : > { %10095 = vmatmul.mubr.msk.f32.gmra.mrb[2].mxu1 %vm286_vm1, %v12913_v62 }
 0x426   : > { %10097 = vmatprep.mubr.msk.f32.mxu1 %vm286_vm1, %v12917_v10 }
 0x429   : > { %10098 = vmatmul.mubr.msk.f32.gmra.mrb[4].mxu1 %vm286_vm1, %v12921_v35 }
 0x42a   : > { %10100 = vmatprep.mubr.msk.f32.mxu1 %vm286_vm1, %v12925_v16 }
 0x42d   : > { %10101 = vmatmul.mubr.msk.f32.gmra.mrb[6].mxu1 %vm286_vm1, %v12929_v4 }
 0x42e   : > { %10103 = vmatprep.mubr.msk.f32.mxu1 %vm286_vm1, %v12933_v58 }
 0x431   : > { %10104 = vmatmul.mubr.msk.f32.gmra.mrb[8].mxu1 %vm286_vm1, %v12937_v9 }
 0x432   : > { %10106 = vmatprep.mubr.msk.f32.mxu1 %vm286_vm1, %v12941_v63 }
 0x435   : > { %10107 = vmatmul.mubr.msk.f32.gmra.mrb[10].mxu1 %vm286_vm1, %v12945_v42 }
 0x436   : > { %10109 = vmatprep.mubr.msk.f32.mxu1 %vm286_vm1, %v12949_v36 }
 0x439   : > { %10110 = vmatmul.mubr.msk.f32.gmra.mrb[12].mxu1 %vm286_vm1, %v12953_v38 }
 0x43a   : > { %10112 = vmatprep.mubr.msk.f32.mxu1 %vm286_vm1, %v12957_v6 }
 0x43d   : > { %10113 = vmatmul.mubr.msk.f32.gmra.mrb[14].mxu1 %vm286_vm1, %v12961_v40 }
 0x43e   : > { %10115 = vmatprep.mubr.msk.f32.mxu1 %vm286_vm1, %v12965_v8 }
 0x441   : > { %10116 = vmatmul.mubr.msk.f32.gmra.mrb[16].mxu1 %vm286_vm1, %v12969_v13 }
 0x442   : > { %10118 = vmatprep.mubr.msk.f32.mxu1 %vm286_vm1, %v12973_v17 }
 0x445   : > { %10119 = vmatmul.mubr.msk.f32.gmra.mrb[18].mxu1 %vm286_vm1, %v12977_v19 }
 0x446   : > { %10121 = vmatprep.mubr.msk.f32.mxu1 %vm286_vm1, %v12981_v28 }
 0x449   : > { %10122 = vmatmul.mubr.msk.f32.gmra.mrb[20].mxu1 %vm286_vm1, %v12985_v57 }
 0x44a   : > { %10124 = vmatprep.mubr.msk.f32.mxu1 %vm286_vm1, %v12989_v51 }
 0x44d   : > { %10125 = vmatmul.mubr.msk.f32.gmra.mrb[22].mxu1 %vm286_vm1, %v12993_v56 }
 0x44e   : > { %10127 = vmatprep.mubr.msk.f32.mxu1 %vm286_vm1, %v12997_v12 }
 0x451   : > { %10128 = vmatmul.mubr.msk.f32.gmra.mrb[24].mxu1 %vm286_vm1, %v13001_v27 }
 0x452   : > { %10130 = vmatprep.mubr.msk.f32.mxu1 %vm286_vm1, %v13005_v60 }
 0x455   : > { %10131 = vmatmul.mubr.msk.f32.gmra.mrb[26].mxu1 %vm286_vm1, %v13009_v32 }
 0x456   : > { %10133 = vmatprep.mubr.msk.f32.mxu1 %vm286_vm1, %v13013_v34 }
 0x459   : > { %10134 = vmatmul.mubr.msk.f32.gmra.mrb[28].mxu1 %vm286_vm1, %v13017_v46 }
 0x45a   : > { %10136 = vmatprep.mubr.msk.f32.mxu1 %vm286_vm1, %v13021_v47 }
 0x45d   : > { %10137 = vmatmul.mubr.msk.f32.gmra.mrb[30].mxu1 %vm286_vm1, %v13025_v31 }
 0x45e   : > { %10141 = vmatprep.mubr.msk.f32.mxu1 %vm286_vm1, %v4974_v39  ;;  %v13044_v39 = vld [vmem:[#allocation2 + $0x22] sm:$0xff] }
 0x45f   : > { %14359 = vst [vmem:[#allocation17_spill] sm:$0xff] %v13044_v39 }
 0x461   : > { %10142 = vmatmul.mubr.msk.f32.vlgmr.msra.gmra.mrb[0].mxu1 %vm286_vm1, %v4975_v15  ;;  %v13052_v15 = vld [vmem:[#allocation2 + $0x3a] sm:$0xff] }
 0x462   : > { %10190 = vmatpush3.msk.msra.mxu1 %vm383_vm0, %v12902_v41  ;;  %10144 = vmatprep.mubr.msk.f32.mxu1 %vm286_vm1, %v13036_v61  ;;  %14361 = vst [vmem:[#allocation20_spill] sm:$0xff] %v13052_v15  ;;  %v13056_v41 = vld [vmem:[#allocation2 + $0x4a] sm:$0xff]  ;;  %v13060_v61 = vld [vmem:[#allocation2 + $0x52] sm:$0xff] }
 0x463   : > { %10239 = vmatprep.subr.msk.mxu1 %vm383_vm0, %v13033_v3  ;;  %14362 = vst [vmem:[#allocation21_spill] sm:$0xff] %v13056_v41  ;;  %14363 = vst [vmem:[#allocation22_spill] sm:$0xff] %v13060_v61 }
 0x465   : > { %10145 = vmatmul.mubr.msk.f32.gmra.mrb[2].mxu1 %vm286_vm1, %v13044_v39  ;;  %v13064_v39 = vld [vmem:[#allocation2 + $0x62] sm:$0xff] }
 0x466   : > { %10147 = vmatprep.mubr.msk.f32.mxu1 %vm286_vm1, %v13048_v53  ;;  %14364 = vst [vmem:[#allocation23_spill] sm:$0xff] %v13064_v39  ;;  %v13068_v53 = vld [vmem:[#allocation2 + $0x6a] sm:$0xff] }
 0x467   : > { %14365 = vst [vmem:[#allocation24_spill] sm:$0xff] %v13068_v53 }
 0x469   : > { %10148 = vmatmul.mubr.msk.f32.gmra.mrb[4].mxu1 %vm286_vm1, %v13052_v15  ;;  %v13072_v15 = vld [vmem:[#allocation2 + $0x7a] sm:$0xff] }
 0x46a   : > { %10150 = vmatprep.mubr.msk.f32.mxu1 %vm286_vm1, %v13056_v41  ;;  %14366 = vst [vmem:[#allocation25_spill] sm:$0xff] %v13072_v15  ;;  %v13076_v41 = vld [vmem:[#allocation2 + $0x82] sm:$0xff] }
 0x46b   : > { %14367 = vst [vmem:[#allocation26_spill] sm:$0xff] %v13076_v41 }
 0x46d   : > { %10151 = vmatmul.mubr.msk.f32.gmra.mrb[6].mxu1 %vm286_vm1, %v13060_v61  ;;  %v13080_v61 = vld [vmem:[#allocation2 + $0x92] sm:$0xff] }
 0x46e   : > { %10153 = vmatprep.mubr.msk.f32.mxu1 %vm286_vm1, %v13064_v39  ;;  %14368 = vst [vmem:[#allocation27_spill] sm:$0xff] %v13080_v61  ;;  %v13084_v39 = vld [vmem:[#allocation2 + $0x9a] sm:$0xff] }
 0x46f   : > { %14369 = vst [vmem:[#allocation29_spill] sm:$0xff] %v13084_v39 }
 0x471   : > { %10154 = vmatmul.mubr.msk.f32.gmra.mrb[8].mxu1 %vm286_vm1, %v13068_v53  ;;  %v13088_v53 = vld [vmem:[#allocation2 + $0xaa] sm:$0xff] }
 0x472   : > { %10156 = vmatprep.mubr.msk.f32.mxu1 %vm286_vm1, %v13072_v15  ;;  %14370 = vst [vmem:[#allocation32_spill] sm:$0xff] %v13088_v53  ;;  %v13092_v15 = vld [vmem:[#allocation2 + $0xb2] sm:$0xff] }
 0x473   : > { %14371 = vst [vmem:[#allocation34_spill] sm:$0xff] %v13092_v15 }
 0x475   : > { %10157 = vmatmul.mubr.msk.f32.gmra.mrb[10].mxu1 %vm286_vm1, %v13076_v41  ;;  %v13096_v41 = vld [vmem:[#allocation2 + $0xc2] sm:$0xff] }
 0x476   : > { %10159 = vmatprep.mubr.msk.f32.mxu1 %vm286_vm1, %v13080_v61  ;;  %14372 = vst [vmem:[#allocation36_spill] sm:$0xff] %v13096_v41  ;;  %v13100_v61 = vld [vmem:[#allocation2 + $0xca] sm:$0xff] }
 0x477   : > { %14373 = vst [vmem:[#allocation30_spill] sm:$0xff] %v13100_v61 }
 0x479   : > { %10160 = vmatmul.mubr.msk.f32.gmra.mrb[12].mxu1 %vm286_vm1, %v13084_v39  ;;  %v13104_v39 = vld [vmem:[#allocation2 + $0xda] sm:$0xff] }
 0x47a   : > { %10162 = vmatprep.mubr.msk.f32.mxu1 %vm286_vm1, %v13088_v53  ;;  %14374 = vst [vmem:[#allocation31_spill] sm:$0xff] %v13104_v39  ;;  %v13108_v53 = vld [vmem:[#allocation2 + $0xe2] sm:$0xff] }
 0x47b   : > { %14375 = vst [vmem:[#allocation33_spill] sm:$0xff] %v13108_v53 }
 0x47d   : > { %10163 = vmatmul.mubr.msk.f32.gmra.mrb[14].mxu1 %vm286_vm1, %v13092_v15  ;;  %v13112_v15 = vld [vmem:[#allocation2 + $0xf2] sm:$0xff] }
 0x47e   : > { %10165 = vmatprep.mubr.msk.f32.mxu1 %vm286_vm1, %v13096_v41  ;;  %14376 = vst [vmem:[#allocation35_spill] sm:$0xff] %v13112_v15  ;;  %v13116_v41 = vld [vmem:[#allocation2 + $0xfa] sm:$0xff] }
 0x47f   : > { %14377 = vst [vmem:[#allocation3_spill] sm:$0xff] %v13116_v41 }
 0x481   : > { %10166 = vmatmul.mubr.msk.f32.gmra.mrb[16].mxu1 %vm286_vm1, %v13100_v61  ;;  %v13120_v61 = vld [vmem:[#allocation2 + $0x10a] sm:$0xff] }
 0x482   : > { %10168 = vmatprep.mubr.msk.f32.mxu1 %vm286_vm1, %v13104_v39  ;;  %14378 = vst [vmem:[#allocation4_spill] sm:$0xff] %v13120_v61  ;;  %v13124_v39 = vld [vmem:[#allocation2 + $0x112] sm:$0xff] }
 0x483   : > { %14379 = vst [vmem:[#allocation5_spill] sm:$0xff] %v13124_v39 }
 0x485   : > { %10169 = vmatmul.mubr.msk.f32.gmra.mrb[18].mxu1 %vm286_vm1, %v13108_v53  ;;  %v13128_v53 = vld [vmem:[#allocation2 + $0x122] sm:$0xff] }
 0x486   : > { %10171 = vmatprep.mubr.msk.f32.mxu1 %vm286_vm1, %v13112_v15  ;;  %14380 = vst [vmem:[#allocation6_spill] sm:$0xff] %v13128_v53  ;;  %v13132_v15 = vld [vmem:[#allocation2 + $0x12a] sm:$0xff] }
 0x487   : > { %14381 = vst [vmem:[#allocation7_spill] sm:$0xff] %v13132_v15 }
 0x489   : > { %10172 = vmatmul.mubr.msk.f32.gmra.mrb[20].mxu1 %vm286_vm1, %v13116_v41  ;;  %v13136_v41 = vld [vmem:[#allocation2 + $0x13a] sm:$0xff] }
 0x48a   : > { %10174 = vmatprep.mubr.msk.f32.mxu1 %vm286_vm1, %v13120_v61  ;;  %14382 = vst [vmem:[#allocation8_spill] sm:$0xff] %v13136_v41  ;;  %v13140_v61 = vld [vmem:[#allocation2 + $0x142] sm:$0xff] }
 0x48d   : > { %10175 = vmatmul.mubr.msk.f32.gmra.mrb[22].mxu1 %vm286_vm1, %v13124_v39  ;;  %v13144_v39 = vld [vmem:[#allocation2 + $0x152] sm:$0xff] }
 0x48e   : > { %10177 = vmatprep.mubr.msk.f32.mxu1 %vm286_vm1, %v13128_v53  ;;  %14383 = vst [vmem:[#allocation28_spill] sm:$0xff] %v13144_v39  ;;  %v13148_v53 = vld [vmem:[#allocation2 + $0x15a] sm:$0xff] }
 0x491   : > { %10178 = vmatmul.mubr.msk.f32.gmra.mrb[24].mxu1 %vm286_vm1, %v13132_v15  ;;  %v13152_v15 = vld [vmem:[#allocation2 + $0x16a] sm:$0xff] }
 0x492   : > { %10180 = vmatprep.mubr.msk.f32.mxu1 %vm286_vm1, %v13136_v41  ;;  %14384 = vst [vmem:[#allocation18_spill] sm:$0xff] %v13152_v15  ;;  %v13156_v41 = vld [vmem:[#allocation2 + $0x172] sm:$0xff] }
 0x495   : > { %10181 = vmatmul.mubr.msk.f32.gmra.mrb[26].mxu1 %vm286_vm1, %v13140_v61 }
 0x496   : > { %10183 = vmatprep.mubr.msk.f32.mxu1 %vm286_vm1, %v13144_v39  ;;  %v8823_v39 = vld [vmem:[%s14055_s2 + $0x14] sm:$0xf] }
 0x499   : > { %10184 = vmatmul.mubr.msk.f32.gmra.mrb[28].mxu1 %vm286_vm1, %v13148_v53 }
 0x49a   : > { %10186 = vmatprep.mubr.msk.f32.mxu1 %vm286_vm1, %v13152_v15 }
 0x49d   : > { %10187 = vmatmul.mubr.msk.f32.gmra.mrb[30].mxu1 %vm286_vm1, %v13156_v41 }
 0x49e   : > { %10191 = vmatprep.mubr.msk.f32.mxu1 %vm286_vm1, %v12905_v52  ;;  %v13226_v52 = vld [vmem:[#allocation2 + $0x180] sm:$0xff] }
 0x4a1   : > { %10192 = vmatmul.mubr.msk.f32.vlgmr.msra.gmra.mrb[0].mxu1 %vm286_vm1, %v12913_v62  ;;  %v13230_v62 = vld [vmem:[#allocation2 + $0x188] sm:$0xff] }
 0x4a2   : > { %10240 = vmatpush3.msk.msra.mxu1 %vm383_vm0, %v13033_v3  ;;  %10194 = vmatprep.mubr.msk.f32.mxu1 %vm286_vm1, %v12917_v10  ;;  %v8857_v3 = vld [vmem:[%s14055_s2 + $0x18] sm:$0xf] }
 0x4a3   : > { %10289 = vmatprep.subr.msk.mxu1 %vm383_vm0, %v8823_v39 }
 0x4a5   : > { %10195 = vmatmul.mubr.msk.f32.gmra.mrb[2].mxu1 %vm286_vm1, %v12921_v35 }
 0x4a6   : > { %10197 = vmatprep.mubr.msk.f32.mxu1 %vm286_vm1, %v12925_v16 }
 0x4a9   : > { %10198 = vmatmul.mubr.msk.f32.gmra.mrb[4].mxu1 %vm286_vm1, %v12929_v4 }
 0x4aa   : > { %10200 = vmatprep.mubr.msk.f32.mxu1 %vm286_vm1, %v12933_v58 }
 0x4ad   : > { %10201 = vmatmul.mubr.msk.f32.gmra.mrb[6].mxu1 %vm286_vm1, %v12937_v9 }
 0x4ae   : > { %10203 = vmatprep.mubr.msk.f32.mxu1 %vm286_vm1, %v12941_v63 }
 0x4b1   : > { %10204 = vmatmul.mubr.msk.f32.gmra.mrb[8].mxu1 %vm286_vm1, %v12945_v42 }
 0x4b2   : > { %10206 = vmatprep.mubr.msk.f32.mxu1 %vm286_vm1, %v12949_v36 }
 0x4b5   : > { %10207 = vmatmul.mubr.msk.f32.gmra.mrb[10].mxu1 %vm286_vm1, %v12953_v38 }
 0x4b6   : > { %10209 = vmatprep.mubr.msk.f32.mxu1 %vm286_vm1, %v12957_v6 }
 0x4b9   : > { %10210 = vmatmul.mubr.msk.f32.gmra.mrb[12].mxu1 %vm286_vm1, %v12961_v40 }
 0x4ba   : > { %10212 = vmatprep.mubr.msk.f32.mxu1 %vm286_vm1, %v12965_v8 }
 0x4bd   : > { %10213 = vmatmul.mubr.msk.f32.gmra.mrb[14].mxu1 %vm286_vm1, %v12969_v13 }
 0x4be   : > { %10215 = vmatprep.mubr.msk.f32.mxu1 %vm286_vm1, %v12973_v17 }
 0x4c1   : > { %10216 = vmatmul.mubr.msk.f32.gmra.mrb[16].mxu1 %vm286_vm1, %v12977_v19 }
 0x4c2   : > { %10218 = vmatprep.mubr.msk.f32.mxu1 %vm286_vm1, %v12981_v28 }
 0x4c5   : > { %10219 = vmatmul.mubr.msk.f32.gmra.mrb[18].mxu1 %vm286_vm1, %v12985_v57 }
 0x4c6   : > { %10221 = vmatprep.mubr.msk.f32.mxu1 %vm286_vm1, %v12989_v51 }
 0x4c9   : > { %10222 = vmatmul.mubr.msk.f32.gmra.mrb[20].mxu1 %vm286_vm1, %v12993_v56 }
 0x4ca   : > { %10224 = vmatprep.mubr.msk.f32.mxu1 %vm286_vm1, %v12997_v12 }
 0x4cd   : > { %10225 = vmatmul.mubr.msk.f32.gmra.mrb[22].mxu1 %vm286_vm1, %v13001_v27 }
 0x4ce   : > { %10227 = vmatprep.mubr.msk.f32.mxu1 %vm286_vm1, %v13005_v60 }
 0x4d1   : > { %10228 = vmatmul.mubr.msk.f32.gmra.mrb[24].mxu1 %vm286_vm1, %v13009_v32 }
 0x4d2   : > { %10230 = vmatprep.mubr.msk.f32.mxu1 %vm286_vm1, %v13013_v34 }
 0x4d5   : > { %10231 = vmatmul.mubr.msk.f32.gmra.mrb[26].mxu1 %vm286_vm1, %v13017_v46 }
 0x4d6   : > { %10233 = vmatprep.mubr.msk.f32.mxu1 %vm286_vm1, %v13021_v47 }
 0x4d9   : > { %10234 = vmatmul.mubr.msk.f32.gmra.mrb[28].mxu1 %vm286_vm1, %v13025_v31 }
 0x4da   : > { %10236 = vmatprep.mubr.msk.f32.mxu1 %vm286_vm1, %v13226_v52 }
 0x4dd   : > { %10237 = vmatmul.mubr.msk.f32.gmra.mrb[30].mxu1 %vm286_vm1, %v13230_v62 }
 0x4de   : > { %10241 = vmatprep.mubr.msk.f32.mxu1 %vm286_vm1, %v12774_v21  ;;  %v14385_v21 = vld [vmem:[#allocation14_spill] sm:$0xff] }
 0x4e1   : > { %10242 = vmatmul.mubr.msk.f32.vlgmr.msra.gmra.mrb[0].mxu1 %vm286_vm1, %v12782_v43  ;;  %v14386_v43 = vld [vmem:[#allocation15_spill] sm:$0xff] }
 0x4e2   : > { %10290 = vmatpush3.msk.msra.mxu1 %vm383_vm0, %v8823_v39  ;;  %10244 = vmatprep.mubr.msk.f32.mxu1 %vm286_vm1, %v12786_v54  ;;  %v13299_v39 = vld [vmem:[#allocation2 + $0x181] sm:$0xff] }
 0x4e3   : > { %10339 = vmatprep.subr.msk.mxu1 %vm383_vm0, %v8857_v3  ;;  %14387 = vst [vmem:[#allocation11_spill] sm:$0xff] %v13299_v39 }
 0x4e5   : > { %10245 = vmatmul.mubr.msk.f32.gmra.mrb[2].mxu1 %vm286_vm1, %v12790_v49 }
 0x4e6   : > { %10247 = vmatprep.mubr.msk.f32.mxu1 %vm286_vm1, %v12794_v0 }
 0x4e9   : > { %10248 = vmatmul.mubr.msk.f32.gmra.mrb[4].mxu1 %vm286_vm1, %v12798_v30 }
 0x4ea   : > { %10250 = vmatprep.mubr.msk.f32.mxu1 %vm286_vm1, %v12802_v5 }
 0x4ed   : > { %10251 = vmatmul.mubr.msk.f32.gmra.mrb[6].mxu1 %vm286_vm1, %v12806_v37 }
 0x4ee   : > { %10253 = vmatprep.mubr.msk.f32.mxu1 %vm286_vm1, %v12810_v44 }
 0x4f1   : > { %10254 = vmatmul.mubr.msk.f32.gmra.mrb[8].mxu1 %vm286_vm1, %v12814_v45 }
 0x4f2   : > { %10256 = vmatprep.mubr.msk.f32.mxu1 %vm286_vm1, %v12818_v33 }
 0x4f5   : > { %10257 = vmatmul.mubr.msk.f32.gmra.mrb[10].mxu1 %vm286_vm1, %v12822_v2 }
 0x4f6   : > { %10259 = vmatprep.mubr.msk.f32.mxu1 %vm286_vm1, %v12826_v7 }
 0x4f9   : > { %10260 = vmatmul.mubr.msk.f32.gmra.mrb[12].mxu1 %vm286_vm1, %v12830_v25 }
 0x4fa   : > { %10262 = vmatprep.mubr.msk.f32.mxu1 %vm286_vm1, %v12834_v11 }
 0x4fd   : > { %10263 = vmatmul.mubr.msk.f32.gmra.mrb[14].mxu1 %vm286_vm1, %v12838_v22 }
 0x4fe   : > { %10265 = vmatprep.mubr.msk.f32.mxu1 %vm286_vm1, %v12842_v14 }
 0x501   : > { %10266 = vmatmul.mubr.msk.f32.gmra.mrb[16].mxu1 %vm286_vm1, %v12846_v23 }
 0x502   : > { %10268 = vmatprep.mubr.msk.f32.mxu1 %vm286_vm1, %v12850_v18 }
 0x505   : > { %10269 = vmatmul.mubr.msk.f32.gmra.mrb[18].mxu1 %vm286_vm1, %v12854_v20 }
 0x506   : > { %10271 = vmatprep.mubr.msk.f32.mxu1 %vm286_vm1, %v12858_v24 }
 0x509   : > { %10272 = vmatmul.mubr.msk.f32.gmra.mrb[20].mxu1 %vm286_vm1, %v12862_v26 }
 0x50a   : > { %10274 = vmatprep.mubr.msk.f32.mxu1 %vm286_vm1, %v12866_v48 }
 0x50d   : > { %10275 = vmatmul.mubr.msk.f32.gmra.mrb[22].mxu1 %vm286_vm1, %v12870_v1  ;;  %v14399_v1 = vld [vmem:[#allocation27_spill] sm:$0xff] }
 0x50e   : > { %10277 = vmatprep.mubr.msk.f32.mxu1 %vm286_vm1, %v12874_v50  ;;  %v13303_v50 = vld [vmem:[#allocation2 + $0x189] sm:$0xff] }
 0x50f   : > { %14388 = vst [vmem:[#allocation39_spill] sm:$0xff] %v13303_v50 }
 0x511   : > { %10278 = vmatmul.mubr.msk.f32.gmra.mrb[24].mxu1 %vm286_vm1, %v12878_v29  ;;  %v14395_v29 = vld [vmem:[#allocation23_spill] sm:$0xff] }
 0x512   : > { %10280 = vmatprep.mubr.msk.f32.mxu1 %vm286_vm1, %v12882_v59  ;;  %v14389_v59 = vld [vmem:[#allocation16_spill] sm:$0xff] }
 0x515   : > { %10281 = vmatmul.mubr.msk.f32.gmra.mrb[26].mxu1 %vm286_vm1, %v12886_v55  ;;  %v14390_v55 = vld [vmem:[#allocation17_spill] sm:$0xff] }
 0x516   : > { %10283 = vmatprep.mubr.msk.f32.mxu1 %vm286_vm1, %v14385_v21  ;;  %v8891_v21 = vld [vmem:[%s14055_s2 + $0x1c] sm:$0xf] }
 0x519   : > { %10284 = vmatmul.mubr.msk.f32.gmra.mrb[28].mxu1 %vm286_vm1, %v14386_v43  ;;  %v14391_v43 = vld [vmem:[#allocation19_spill] sm:$0xff] }
 0x51a   : > { %10286 = vmatprep.mubr.msk.f32.mxu1 %vm286_vm1, %v13299_v39  ;;  %v14392_v39 = vld [vmem:[#allocation20_spill] sm:$0xff] }
 0x51d   : > { %10287 = vmatmul.mubr.msk.f32.gmra.mrb[30].mxu1 %vm286_vm1, %v13303_v50  ;;  %v14393_v50 = vld [vmem:[#allocation21_spill] sm:$0xff] }
 0x51e   : > { %10291 = vmatprep.mubr.msk.f32.mxu1 %vm286_vm1, %v14389_v59  ;;  %v14394_v59 = vld [vmem:[#allocation22_spill] sm:$0xff] }
 0x521   : > { %10292 = vmatmul.mubr.msk.f32.vlgmr.msra.gmra.mrb[0].mxu1 %vm286_vm1, %v14390_v55  ;;  %v14396_v55 = vld [vmem:[#allocation24_spill] sm:$0xff] }
 0x522   : > { %10340 = vmatpush3.msk.msra.mxu1 %vm383_vm0, %v8857_v3  ;;  %10294 = vmatprep.mubr.msk.f32.mxu1 %vm286_vm1, %v14391_v43  ;;  %v14397_v3 = vld [vmem:[#allocation25_spill] sm:$0xff]  ;;  %v14398_v43 = vld [vmem:[#allocation26_spill] sm:$0xff] }
 0x523   : > { %10389 = vmatprep.subr.msk.mxu1 %vm383_vm0, %v8891_v21 }
 0x525   : > { %10295 = vmatmul.mubr.msk.f32.gmra.mrb[2].mxu1 %vm286_vm1, %v14392_v39  ;;  %v14400_v39 = vld [vmem:[#allocation29_spill] sm:$0xff] }
 0x526   : > { %10297 = vmatprep.mubr.msk.f32.mxu1 %vm286_vm1, %v14393_v50  ;;  %v14401_v50 = vld [vmem:[#allocation32_spill] sm:$0xff] }
 0x529   : > { %10298 = vmatmul.mubr.msk.f32.gmra.mrb[4].mxu1 %vm286_vm1, %v14394_v59  ;;  %v14402_v59 = vld [vmem:[#allocation34_spill] sm:$0xff] }
 0x52a   : > { %10300 = vmatprep.mubr.msk.f32.mxu1 %vm286_vm1, %v14395_v29  ;;  %v14403_v29 = vld [vmem:[#allocation36_spill] sm:$0xff] }
 0x52d   : > { %10301 = vmatmul.mubr.msk.f32.gmra.mrb[6].mxu1 %vm286_vm1, %v14396_v55  ;;  %v14404_v55 = vld [vmem:[#allocation30_spill] sm:$0xff] }
 0x52e   : > { %10303 = vmatprep.mubr.msk.f32.mxu1 %vm286_vm1, %v14397_v3  ;;  %v14405_v3 = vld [vmem:[#allocation31_spill] sm:$0xff] }
 0x531   : > { %10304 = vmatmul.mubr.msk.f32.gmra.mrb[8].mxu1 %vm286_vm1, %v14398_v43  ;;  %v14406_v43 = vld [vmem:[#allocation33_spill] sm:$0xff] }
 0x532   : > { %10306 = vmatprep.mubr.msk.f32.mxu1 %vm286_vm1, %v14399_v1  ;;  %v14407_v1 = vld [vmem:[#allocation35_spill] sm:$0xff] }
 0x535   : > { %10307 = vmatmul.mubr.msk.f32.gmra.mrb[10].mxu1 %vm286_vm1, %v14400_v39  ;;  %v14408_v39 = vld [vmem:[#allocation3_spill] sm:$0xff] }
 0x536   : > { %10309 = vmatprep.mubr.msk.f32.mxu1 %vm286_vm1, %v14401_v50  ;;  %v14409_v50 = vld [vmem:[#allocation4_spill] sm:$0xff] }
 0x539   : > { %10310 = vmatmul.mubr.msk.f32.gmra.mrb[12].mxu1 %vm286_vm1, %v14402_v59  ;;  %v14410_v59 = vld [vmem:[#allocation5_spill] sm:$0xff] }
 0x53a   : > { %10312 = vmatprep.mubr.msk.f32.mxu1 %vm286_vm1, %v14403_v29  ;;  %v14411_v29 = vld [vmem:[#allocation6_spill] sm:$0xff] }
 0x53d   : > { %10313 = vmatmul.mubr.msk.f32.gmra.mrb[14].mxu1 %vm286_vm1, %v14404_v55  ;;  %v14412_v55 = vld [vmem:[#allocation7_spill] sm:$0xff] }
 0x53e   : > { %10315 = vmatprep.mubr.msk.f32.mxu1 %vm286_vm1, %v14405_v3  ;;  %v14413_v3 = vld [vmem:[#allocation8_spill] sm:$0xff] }
 0x541   : > { %10316 = vmatmul.mubr.msk.f32.gmra.mrb[16].mxu1 %vm286_vm1, %v14406_v43 }
 0x542   : > { %10318 = vmatprep.mubr.msk.f32.mxu1 %vm286_vm1, %v14407_v1  ;;  %v14414_v1 = vld [vmem:[#allocation28_spill] sm:$0xff] }
 0x545   : > { %10319 = vmatmul.mubr.msk.f32.gmra.mrb[18].mxu1 %vm286_vm1, %v14408_v39 }
 0x546   : > { %10321 = vmatprep.mubr.msk.f32.mxu1 %vm286_vm1, %v14409_v50 }
 0x549   : > { %10322 = vmatmul.mubr.msk.f32.gmra.mrb[20].mxu1 %vm286_vm1, %v14410_v59 }
 0x54a   : > { %10324 = vmatprep.mubr.msk.f32.mxu1 %vm286_vm1, %v14411_v29  ;;  %v13372_v29 = vld [vmem:[#allocation2 + $0x182] sm:$0xff] }
 0x54d   : > { %10325 = vmatmul.mubr.msk.f32.gmra.mrb[22].mxu1 %vm286_vm1, %v14412_v55 }
 0x54e   : > { %10327 = vmatprep.mubr.msk.f32.mxu1 %vm286_vm1, %v14413_v3  ;;  %v13376_v3 = vld [vmem:[#allocation2 + $0x18a] sm:$0xff] }
 0x551   : > { %10328 = vmatmul.mubr.msk.f32.gmra.mrb[24].mxu1 %vm286_vm1, %v13140_v61 }
 0x552   : > { %10330 = vmatprep.mubr.msk.f32.mxu1 %vm286_vm1, %v14414_v1 }
 0x555   : > { %10331 = vmatmul.mubr.msk.f32.gmra.mrb[26].mxu1 %vm286_vm1, %v13148_v53 }
 0x556   : > { %10333 = vmatprep.mubr.msk.f32.mxu1 %vm286_vm1, %v13152_v15  ;;  %v8925_v15 = vld [vmem:[%s14055_s2 + $0x20] sm:$0xf] }
 0x559   : > { %10334 = vmatmul.mubr.msk.f32.gmra.mrb[28].mxu1 %vm286_vm1, %v13156_v41 }
 0x55a   : > { %10336 = vmatprep.mubr.msk.f32.mxu1 %vm286_vm1, %v13372_v29 }
 0x55d   : > { %10337 = vmatmul.mubr.msk.f32.gmra.mrb[30].mxu1 %vm286_vm1, %v13376_v3 }
 0x55e   : > { %10341 = vmatprep.mubr.msk.f32.mxu1 %vm286_vm1, %v12917_v10  ;;  %v6566_v10 = vld [vmem:[#allocation2 + $0x198] sm:$0xff] }
 0x561   : > { %10342 = vmatmul.mubr.msk.f32.vlgmr.msra.gmra.mrb[0].mxu1 %vm286_vm1, %v12921_v35  ;;  %v6567_v35 = vld [vmem:[#allocation2 + $0x1a0] sm:$0xff] }
 0x562   : > { %10390 = vmatpush3.msk.msra.mxu1 %vm383_vm0, %v8891_v21  ;;  %10344 = vmatprep.mubr.msk.f32.mxu1 %vm286_vm1, %v12925_v16  ;;  %v14434_v16 = vld [vmem:[#allocation32_spill] sm:$0xff] }
 0x563   : > { %10439 = vmatprep.subr.msk.mxu1 %vm383_vm0, %v8925_v15 }
 0x565   : > { %10345 = vmatmul.mubr.msk.f32.gmra.mrb[2].mxu1 %vm286_vm1, %v12929_v4  ;;  %v14435_v4 = vld [vmem:[#allocation34_spill] sm:$0xff] }
 0x566   : > { %10347 = vmatprep.mubr.msk.f32.mxu1 %vm286_vm1, %v12933_v58  ;;  %v14436_v58 = vld [vmem:[#allocation36_spill] sm:$0xff] }
 0x569   : > { %10348 = vmatmul.mubr.msk.f32.gmra.mrb[4].mxu1 %vm286_vm1, %v12937_v9  ;;  %v14437_v9 = vld [vmem:[#allocation30_spill] sm:$0xff] }
 0x56a   : > { %10350 = vmatprep.mubr.msk.f32.mxu1 %vm286_vm1, %v12941_v63  ;;  %v14438_v63 = vld [vmem:[#allocation31_spill] sm:$0xff] }
 0x56d   : > { %10351 = vmatmul.mubr.msk.f32.gmra.mrb[6].mxu1 %vm286_vm1, %v12945_v42  ;;  %v14439_v42 = vld [vmem:[#allocation35_spill] sm:$0xff] }
 0x56e   : > { %10353 = vmatprep.mubr.msk.f32.mxu1 %vm286_vm1, %v12949_v36  ;;  %v14440_v36 = vld [vmem:[#allocation6_spill] sm:$0xff] }
 0x571   : > { %10354 = vmatmul.mubr.msk.f32.gmra.mrb[8].mxu1 %vm286_vm1, %v12953_v38  ;;  %v14441_v38 = vld [vmem:[#allocation8_spill] sm:$0xff] }
 0x572   : > { %10356 = vmatprep.mubr.msk.f32.mxu1 %vm286_vm1, %v12957_v6  ;;  %v7346_v6 = vld [vmem:[#allocation2 + $0x19a] sm:$0xff] }
 0x575   : > { %10357 = vmatmul.mubr.msk.f32.gmra.mrb[10].mxu1 %vm286_vm1, %v12961_v40 }
 0x576   : > { %10359 = vmatprep.mubr.msk.f32.mxu1 %vm286_vm1, %v12965_v8 }
 0x579   : > { %10360 = vmatmul.mubr.msk.f32.gmra.mrb[12].mxu1 %vm286_vm1, %v12969_v13 }
 0x57a   : > { %10362 = vmatprep.mubr.msk.f32.mxu1 %vm286_vm1, %v12973_v17 }
 0x57d   : > { %10363 = vmatmul.mubr.msk.f32.gmra.mrb[14].mxu1 %vm286_vm1, %v12977_v19 }
 0x57e   : > { %10365 = vmatprep.mubr.msk.f32.mxu1 %vm286_vm1, %v12981_v28 }
 0x581   : > { %10366 = vmatmul.mubr.msk.f32.gmra.mrb[16].mxu1 %vm286_vm1, %v12985_v57 }
 0x582   : > { %10368 = vmatprep.mubr.msk.f32.mxu1 %vm286_vm1, %v12989_v51 }
 0x585   : > { %10369 = vmatmul.mubr.msk.f32.gmra.mrb[18].mxu1 %vm286_vm1, %v12993_v56 }
 0x586   : > { %10371 = vmatprep.mubr.msk.f32.mxu1 %vm286_vm1, %v12997_v12 }
 0x589   : > { %10372 = vmatmul.mubr.msk.f32.gmra.mrb[20].mxu1 %vm286_vm1, %v13001_v27 }
 0x58a   : > { %10374 = vmatprep.mubr.msk.f32.mxu1 %vm286_vm1, %v13005_v60 }
 0x58d   : > { %10375 = vmatmul.mubr.msk.f32.gmra.mrb[22].mxu1 %vm286_vm1, %v13009_v32 }
 0x58e   : > { %10377 = vmatprep.mubr.msk.f32.mxu1 %vm286_vm1, %v13013_v34 }
 0x591   : > { %10378 = vmatmul.mubr.msk.f32.gmra.mrb[24].mxu1 %vm286_vm1, %v13017_v46 }
 0x592   : > { %10380 = vmatprep.mubr.msk.f32.mxu1 %vm286_vm1, %v13021_v47 }
 0x595   : > { %10381 = vmatmul.mubr.msk.f32.gmra.mrb[26].mxu1 %vm286_vm1, %v13025_v31 }
 0x596   : > { %10383 = vmatprep.mubr.msk.f32.mxu1 %vm286_vm1, %v13226_v52 }
 0x599   : > { %10384 = vmatmul.mubr.msk.f32.gmra.mrb[28].mxu1 %vm286_vm1, %v13230_v62 }
 0x59a   : > { %10386 = vmatprep.mubr.msk.f32.mxu1 %vm286_vm1, %v6566_v10 }
 0x59d   : > { %10387 = vmatmul.mubr.msk.f32.gmra.mrb[30].mxu1 %vm286_vm1, %v6567_v35 }
 0x59e   : > { %10391 = vmatprep.mubr.msk.f32.mxu1 %vm286_vm1, %v12786_v54  ;;  %v14415_v54 = vld [vmem:[#allocation9_spill] sm:$0xff] }
 0x5a1   : > { %10392 = vmatmul.mubr.msk.f32.vlgmr.msra.gmra.mrb[0].mxu1 %vm286_vm1, %v12790_v49  ;;  %v14416_v49 = vld [vmem:[#allocation10_spill] sm:$0xff] }
 0x5a2   : > { %10440 = vmatpush3.msk.msra.mxu1 %vm383_vm0, %v8925_v15  ;;  %10394 = vmatprep.mubr.msk.f32.mxu1 %vm286_vm1, %v12794_v0  ;;  %v14417_v0 = vld [vmem:[#allocation37_spill] sm:$0xff] }
 0x5a5   : > { %10395 = vmatmul.mubr.msk.f32.gmra.mrb[2].mxu1 %vm286_vm1, %v12798_v30  ;;  %v14418_v30 = vld [vmem:[#allocation38_spill] sm:$0xff] }
 0x5a6   : > { %10397 = vmatprep.mubr.msk.f32.mxu1 %vm286_vm1, %v12802_v5  ;;  %v14419_v5 = vld [vmem:[#allocation13_spill] sm:$0xff] }
 0x5a9   : > { %10398 = vmatmul.mubr.msk.f32.gmra.mrb[4].mxu1 %vm286_vm1, %v12806_v37  ;;  %v14420_v37 = vld [vmem:[#allocation14_spill] sm:$0xff] }
 0x5aa   : > { %10400 = vmatprep.mubr.msk.f32.mxu1 %vm286_vm1, %v12810_v44  ;;  %v14421_v44 = vld [vmem:[#allocation15_spill] sm:$0xff] }
 0x5ad   : > { %10401 = vmatmul.mubr.msk.f32.gmra.mrb[6].mxu1 %vm286_vm1, %v12814_v45  ;;  %v14422_v45 = vld [vmem:[#allocation11_spill] sm:$0xff] }
 0x5ae   : > { %10403 = vmatprep.mubr.msk.f32.mxu1 %vm286_vm1, %v12818_v33  ;;  %v14423_v33 = vld [vmem:[#allocation39_spill] sm:$0xff] }
 0x5b1   : > { %10404 = vmatmul.mubr.msk.f32.gmra.mrb[8].mxu1 %vm286_vm1, %v12822_v2  ;;  %v6956_v2 = vld [vmem:[#allocation2 + $0x199] sm:$0xff] }
 0x5b2   : > { %10406 = vmatprep.mubr.msk.f32.mxu1 %vm286_vm1, %v12826_v7  ;;  %v6957_v7 = vld [vmem:[#allocation2 + $0x1a1] sm:$0xff] }
 0x5b5   : > { %10407 = vmatmul.mubr.msk.f32.gmra.mrb[10].mxu1 %vm286_vm1, %v12830_v25  ;;  %v14424_v25 = vld [vmem:[#allocation19_spill] sm:$0xff] }
 0x5b6   : > { %10409 = vmatprep.mubr.msk.f32.mxu1 %vm286_vm1, %v12834_v11  ;;  %v14425_v11 = vld [vmem:[#allocation20_spill] sm:$0xff] }
 0x5b9   : > { %10410 = vmatmul.mubr.msk.f32.gmra.mrb[12].mxu1 %vm286_vm1, %v12838_v22  ;;  %v14426_v22 = vld [vmem:[#allocation21_spill] sm:$0xff] }
 0x5ba   : > { %10412 = vmatprep.mubr.msk.f32.mxu1 %vm286_vm1, %v12842_v14  ;;  %v14427_v14 = vld [vmem:[#allocation22_spill] sm:$0xff] }
 0x5bd   : > { %10413 = vmatmul.mubr.msk.f32.gmra.mrb[14].mxu1 %vm286_vm1, %v12846_v23  ;;  %v14428_v23 = vld [vmem:[#allocation23_spill] sm:$0xff] }
 0x5be   : > { %10415 = vmatprep.mubr.msk.f32.mxu1 %vm286_vm1, %v12850_v18  ;;  %v14429_v18 = vld [vmem:[#allocation24_spill] sm:$0xff] }
 0x5c1   : > { %10416 = vmatmul.mubr.msk.f32.gmra.mrb[16].mxu1 %vm286_vm1, %v12854_v20  ;;  %v14430_v20 = vld [vmem:[#allocation25_spill] sm:$0xff] }
 0x5c2   : > { %10418 = vmatprep.mubr.msk.f32.mxu1 %vm286_vm1, %v12858_v24  ;;  %v14431_v24 = vld [vmem:[#allocation26_spill] sm:$0xff] }
 0x5c5   : > { %10419 = vmatmul.mubr.msk.f32.gmra.mrb[18].mxu1 %vm286_vm1, %v12862_v26  ;;  %v14432_v26 = vld [vmem:[#allocation27_spill] sm:$0xff] }
 0x5c6   : > { %10421 = vmatprep.mubr.msk.f32.mxu1 %vm286_vm1, %v12866_v48  ;;  %v14433_v48 = vld [vmem:[#allocation29_spill] sm:$0xff] }
 0x5c9   : > { %10422 = vmatmul.mubr.msk.f32.gmra.mrb[20].mxu1 %vm286_vm1, %v14415_v54 }
 0x5ca   : > { %10424 = vmatprep.mubr.msk.f32.mxu1 %vm286_vm1, %v14416_v49 }
 0x5cd   : > { %10425 = vmatmul.mubr.msk.f32.gmra.mrb[22].mxu1 %vm286_vm1, %v14417_v0 }
 0x5ce   : > { %10427 = vmatprep.mubr.msk.f32.mxu1 %vm286_vm1, %v14418_v30 }
 0x5d1   : > { %10428 = vmatmul.mubr.msk.f32.gmra.mrb[24].mxu1 %vm286_vm1, %v14419_v5 }
 0x5d2   : > { %10430 = vmatprep.mubr.msk.f32.mxu1 %vm286_vm1, %v14420_v37 }
 0x5d5   : > { %10431 = vmatmul.mubr.msk.f32.gmra.mrb[26].mxu1 %vm286_vm1, %v14421_v44 }
 0x5d6   : > { %10433 = vmatprep.mubr.msk.f32.mxu1 %vm286_vm1, %v14422_v45 }
 0x5d9   : > { %10434 = vmatmul.mubr.msk.f32.gmra.mrb[28].mxu1 %vm286_vm1, %v14423_v33 }
 0x5da   : > { %10436 = vmatprep.mubr.msk.f32.mxu1 %vm286_vm1, %v6956_v2 }
 0x5dd   : > { %10437 = vmatmul.mubr.msk.f32.gmra.mrb[30].mxu1 %vm286_vm1, %v6957_v7 }
 0x5de   : > { %10441 = vmatprep.mubr.msk.f32.mxu1 %vm286_vm1, %v14424_v25 }
 0x5e1   : > { %10442 = vmatmul.mubr.msk.f32.vlgmr.msra.gmra.mrb[0].mxu1 %vm286_vm1, %v14425_v11 }
 0x5e2   : > { %10444 = vmatprep.mubr.msk.f32.mxu1 %vm286_vm1, %v14426_v22 }
 0x5e5   : > { %10445 = vmatmul.mubr.msk.f32.gmra.mrb[2].mxu1 %vm286_vm1, %v14427_v14 }
 0x5e6   : > { %10447 = vmatprep.mubr.msk.f32.mxu1 %vm286_vm1, %v14428_v23 }
 0x5e9   : > { %10448 = vmatmul.mubr.msk.f32.gmra.mrb[4].mxu1 %vm286_vm1, %v14429_v18 }
 0x5ea   : > { %10450 = vmatprep.mubr.msk.f32.mxu1 %vm286_vm1, %v14430_v20 }
 0x5ed   : > { %10451 = vmatmul.mubr.msk.f32.gmra.mrb[6].mxu1 %vm286_vm1, %v14431_v24 }
 0x5ee   : > { %10453 = vmatprep.mubr.msk.f32.mxu1 %vm286_vm1, %v14432_v26 }
 0x5f1   : > { %10454 = vmatmul.mubr.msk.f32.gmra.mrb[8].mxu1 %vm286_vm1, %v14433_v48 }
 0x5f2   : > { %10456 = vmatprep.mubr.msk.f32.mxu1 %vm286_vm1, %v14434_v16 }
 0x5f5   : > { %10457 = vmatmul.mubr.msk.f32.gmra.mrb[10].mxu1 %vm286_vm1, %v14435_v4 }
 0x5f6   : > { %10459 = vmatprep.mubr.msk.f32.mxu1 %vm286_vm1, %v14436_v58 }
 0x5f9   : > { %10460 = vmatmul.mubr.msk.f32.gmra.mrb[12].mxu1 %vm286_vm1, %v14437_v9 }
 0x5fa   : > { %10462 = vmatprep.mubr.msk.f32.mxu1 %vm286_vm1, %v14438_v63 }
 0x5fd   : > { %10463 = vmatmul.mubr.msk.f32.gmra.mrb[14].mxu1 %vm286_vm1, %v14406_v43 }
 0x5fe   : > { %10465 = vmatprep.mubr.msk.f32.mxu1 %vm286_vm1, %v14439_v42 }
 0x601   : > { %10466 = vmatmul.mubr.msk.f32.gmra.mrb[16].mxu1 %vm286_vm1, %v14408_v39 }
 0x602   : > { %10468 = vmatprep.mubr.msk.f32.mxu1 %vm286_vm1, %v14409_v50  ;;  %v14442_v50 = vld [vmem:[#allocation18_spill] sm:$0xff] }
 0x605   : > { %10469 = vmatmul.mubr.msk.f32.gmra.mrb[18].mxu1 %vm286_vm1, %v14410_v59 }
 0x606   : > { %10471 = vmatprep.mubr.msk.f32.mxu1 %vm286_vm1, %v14440_v36 }
 0x609   : > { %10472 = vmatmul.mubr.msk.f32.gmra.mrb[20].mxu1 %vm286_vm1, %v14412_v55 }
 0x60a   : > { %10474 = vmatprep.mubr.msk.f32.mxu1 %vm286_vm1, %v14441_v38 }
 0x60d   : > { %10475 = vmatmul.mubr.msk.f32.gmra.mrb[22].mxu1 %vm286_vm1, %v13140_v61  ;;  %v7347_v61 = vld [vmem:[#allocation2 + $0x1a2] sm:$0xff] }
 0x60e   : > { %10477 = vmatprep.mubr.msk.f32.mxu1 %vm286_vm1, %v14414_v1 }
 0x611   : > { %10478 = vmatmul.mubr.msk.f32.gmra.mrb[24].mxu1 %vm286_vm1, %v13148_v53 }
 0x612   : > { %10480 = vmatprep.mubr.msk.f32.mxu1 %vm286_vm1, %v14442_v50 }
 0x615   : > { %10481 = vmatmul.mubr.msk.f32.gmra.mrb[26].mxu1 %vm286_vm1, %v13156_v41 }
 0x616   : > { %10483 = vmatprep.mubr.msk.f32.mxu1 %vm286_vm1, %v13372_v29 }
 0x619   : > { %10484 = vmatmul.mubr.msk.f32.gmra.mrb[28].mxu1 %vm286_vm1, %v13376_v3 }
 0x61a   : > { %10486 = vmatprep.mubr.msk.f32.mxu1 %vm286_vm1, %v7346_v6 }
 0x61d   : > { %10487 = vmatmul.mubr.msk.f32.gmra.mrb[30].mxu1 %vm286_vm1, %v7347_v61 }
 0x6b4   : > { %v13572_v1 = vpop.f32.mrb[0].mxu1 }
 0x6b5   : > { %v7707_v53 = vsel %vm286_vm1, %v13572_v1, 0.0  ;;  %v13576_v40 = vpop.f32.mrb[1].mxu1 }
 0x6b6   : > { %v7706_v8 = vsel %vm286_vm1, %v13576_v40, 0.0 }
 0x6b7   : > { %v7708_v29 = vadd.f32 %v7707_v53, %v7706_v8 }
 0x6b8   : > { %v13580_v13 = vpop.f32.mrb[2].mxu1 }
 0x6b9   : > { %v13582_v17 = vpop.f32.mrb[3].mxu1  ;;  %v7711_v57 = vsel %vm286_vm1, %v13580_v13, 0.0 }
 0x6ba   : > { %v7709_v19 = vsel %vm286_vm1, %v13582_v17, 0.0 }
 0x6bb   : > { %v7710_v28 = vadd.f32 %v7709_v19, %v7708_v29 }
 0x6bc   : > { %v13588_v51 = vpop.f32.mrb[4].mxu1 }
 0x6bd   : > { %v13590_v56 = vpop.f32.mrb[5].mxu1  ;;  %v7712_v12 = vadd.f32 %v7711_v57, %v7710_v28  ;;  %v7715_v32 = vsel %vm286_vm1, %v13588_v51, 0.0 }
 0x6be   : > { %v7713_v27 = vsel %vm286_vm1, %v13590_v56, 0.0 }
 0x6bf   : > { %v7714_v60 = vadd.f32 %v7713_v27, %v7712_v12 }
 0x6c0   : > { %v13596_v34 = vpop.f32.mrb[6].mxu1 }
 0x6c1   : > { %v13598_v46 = vpop.f32.mrb[7].mxu1  ;;  %v7716_v47 = vadd.f32 %v7715_v32, %v7714_v60  ;;  %v7719_v41 = vsel %vm286_vm1, %v13596_v34, 0.0 }
 0x6c2   : > { %v7717_v31 = vsel %vm286_vm1, %v13598_v46, 0.0 }
 0x6c3   : > { %v7718_v15 = vadd.f32 %v7717_v31, %v7716_v47 }
 0x6c4   : > { %v13604_v52 = vpop.f32.mrb[8].mxu1 }
 0x6c5   : > { %v13606_v62 = vpop.f32.mrb[9].mxu1  ;;  %v7720_v21 = vadd.f32 %v7719_v41, %v7718_v15  ;;  %v7723_v59 = vsel %vm286_vm1, %v13604_v52, 0.0 }
 0x6c6   : > { %v7721_v43 = vsel %vm286_vm1, %v13606_v62, 0.0 }
 0x6c7   : > { %v7722_v39 = vadd.f32 %v7721_v43, %v7720_v21 }
 0x6c8   : > { %v13612_v55 = vpop.f32.mrb[10].mxu1 }
 0x6c9   : > { %v13614_v3 = vpop.f32.mrb[11].mxu1  ;;  %v7724_v10 = vadd.f32 %v7723_v59, %v7722_v39  ;;  %v7727_v49 = vsel %vm286_vm1, %v13612_v55, 0.0 }
 0x6ca   : > { %v7725_v35 = vsel %vm286_vm1, %v13614_v3, 0.0 }
 0x6cb   : > { %v7726_v54 = vadd.f32 %v7725_v35, %v7724_v10 }
 0x6cc   : > { %v13620_v0 = vpop.f32.mrb[12].mxu1 }
 0x6cd   : > { %v13622_v30 = vpop.f32.mrb[13].mxu1  ;;  %v7728_v5 = vadd.f32 %v7727_v49, %v7726_v54  ;;  %v7731_v45 = vsel %vm286_vm1, %v13620_v0, 0.0 }
 0x6ce   : > { %v7729_v37 = vsel %vm286_vm1, %v13622_v30, 0.0 }
 0x6cf   : > { %v7730_v44 = vadd.f32 %v7729_v37, %v7728_v5 }
 0x6d0   : > { %v13628_v33 = vpop.f32.mrb[14].mxu1 }
 0x6d1   : > { %v13630_v2 = vpop.f32.mrb[15].mxu1  ;;  %v7732_v7 = vadd.f32 %v7731_v45, %v7730_v44  ;;  %v7735_v22 = vsel %vm286_vm1, %v13628_v33, 0.0 }
 0x6d2   : > { %v7733_v25 = vsel %vm286_vm1, %v13630_v2, 0.0 }
 0x6d3   : > { %v7734_v11 = vadd.f32 %v7733_v25, %v7732_v7 }
 0x6d4   : > { %v13636_v14 = vpop.f32.mrb[16].mxu1 }
 0x6d5   : > { %v13638_v23 = vpop.f32.mrb[17].mxu1  ;;  %v7736_v18 = vadd.f32 %v7735_v22, %v7734_v11  ;;  %v7739_v26 = vsel %vm286_vm1, %v13636_v14, 0.0 }
 0x6d6   : > { %v7737_v20 = vsel %vm286_vm1, %v13638_v23, 0.0 }
 0x6d7   : > { %v7738_v24 = vadd.f32 %v7737_v20, %v7736_v18 }
 0x6d8   : > { %v13644_v48 = vpop.f32.mrb[18].mxu1 }
 0x6d9   : > { %v13646_v16 = vpop.f32.mrb[19].mxu1  ;;  %v7740_v4 = vadd.f32 %v7739_v26, %v7738_v24  ;;  %v7743_v63 = vsel %vm286_vm1, %v13644_v48, 0.0 }
 0x6da   : > { %v7741_v58 = vsel %vm286_vm1, %v13646_v16, 0.0 }
 0x6db   : > { %v7742_v9 = vadd.f32 %v7741_v58, %v7740_v4 }
 0x6dc   : > { %v13652_v42 = vpop.f32.mrb[20].mxu1 }
 0x6dd   : > { %v13654_v36 = vpop.f32.mrb[21].mxu1  ;;  %v7744_v38 = vadd.f32 %v7743_v63, %v7742_v9  ;;  %v7747_v61 = vsel %vm286_vm1, %v13652_v42, 0.0 }
 0x6de   : > { %v7745_v50 = vsel %vm286_vm1, %v13654_v36, 0.0 }
 0x6df   : > { %v7746_v6 = vadd.f32 %v7745_v50, %v7744_v38 }
 0x6e0   : > { %v10476_v53 = vpop.f32.mrb[22].mxu1 }
 0x6e1   : > { %v7625_v8 = vpop.f32.mrb[23].mxu1  ;;  %v7748_v29 = vadd.f32 %v7747_v61, %v7746_v6  ;;  %v7751_v57 = vsel %vm286_vm1, %v10476_v53, 0.0 }
 0x6e2   : > { %v7749_v19 = vsel %vm286_vm1, %v7625_v8, 0.0 }
 0x6e3   : > { %v7750_v28 = vadd.f32 %v7749_v19, %v7748_v29 }
 0x6e4   : > { %v10479_v12 = vpop.f32.mrb[24].mxu1 }
 0x6e5   : > { %v7635_v27 = vpop.f32.mrb[25].mxu1  ;;  %v7752_v60 = vadd.f32 %v7751_v57, %v7750_v28  ;;  %v7755_v31 = vsel %vm286_vm1, %v10479_v12, 0.0 }
 0x6e6   : > { %v7753_v32 = vsel %vm286_vm1, %v7635_v27, 0.0 }
 0x6e7   : > { %v7754_v47 = vadd.f32 %v7753_v32, %v7752_v60 }
 0x6e8   : > { %v10482_v15 = vpop.f32.mrb[26].mxu1 }
 0x6e9   : > { %v7645_v41 = vpop.f32.mrb[27].mxu1  ;;  %v7756_v21 = vadd.f32 %v7755_v31, %v7754_v47  ;;  %v7759_v59 = vsel %vm286_vm1, %v10482_v15, 0.0 }
 0x6ea   : > { %v7757_v43 = vsel %vm286_vm1, %v7645_v41, 0.0 }
 0x6eb   : > { %v7758_v39 = vadd.f32 %v7757_v43, %v7756_v21 }
 0x6ec   : > { %v10485_v10 = vpop.f32.mrb[28].mxu1 }
 0x6ed   : > { %v7655_v35 = vpop.f32.mrb[29].mxu1  ;;  %v7760_v54 = vadd.f32 %v7759_v59, %v7758_v39  ;;  %v7763_v37 = vsel %vm286_vm1, %v10485_v10, 0.0 }
 0x6ee   : > { %v7761_v49 = vsel %vm286_vm1, %v7655_v35, 0.0 }
 0x6ef   : > { %v7762_v5 = vadd.f32 %v7761_v49, %v7760_v54 }
 0x6f0   : > { %v10488_v44 = vpop.f32.mrb[30].mxu1 }
 0x6f1   : > { %v7665_v45 = vpop.f32.mrb[31].mxu1  ;;  %v7764_v7 = vadd.f32 %v7763_v37, %v7762_v5  ;;  %v7767_v22 = vsel %vm286_vm1, %v10488_v44, 0.0 }
 0x6f2   : > { %v7765_v25 = vsel %vm286_vm1, %v7665_v45, 0.0 }
 0x6f3   : > { %v7766_v11 = vadd.f32 %v7765_v25, %v7764_v7 }
 0x6f5   : > { %v7768_v18 = vadd.f32 %v7767_v22, %v7766_v11 }
 0x6f7   : > { %v7769_v20 = vrot.slane %v7768_v18, 4 }
 0x6f9   : > { %v7770_v24 = vadd.f32 %v7769_v20, %v7768_v18 }
 0x6fb   : > { %v7771_v26 = vrot.slane %v7770_v24, 2 }
 0x6fd   : > { %v7772_v4 = vadd.f32 %v7771_v26, %v7770_v24 }
 0x6ff   : > { %v7773_v58 = vrot.slane %v7772_v4, 1 }
 0x701   : > { %v7774_v9 = vadd.f32 %v7773_v58, %v7772_v4 }
 0x703   : > { %v7775_v63 = vmul.f32 0.00390625, %v7774_v9 }
 0x705   : > { %v13671_v38 = vsub.f32 %v13576_v40, %v7775_v63  ;;  %v13674_v50 = vsub.f32 %v13572_v1, %v7775_v63  ;;  %v13677_v6 = vsub.f32 %v13582_v17, %v7775_v63  ;;  %v13680_v61 = vsub.f32 %v13580_v13, %v7775_v63 }
 0x706   : > { %v13683_v29 = vsub.f32 %v13590_v56, %v7775_v63  ;;  %v13686_v19 = vsub.f32 %v13588_v51, %v7775_v63  ;;  %v13689_v28 = vsub.f32 %v13598_v46, %v7775_v63  ;;  %v13692_v40 = vsub.f32 %v13596_v34, %v7775_v63 }
 0x707   : > { %v13695_v1 = vsub.f32 %v13606_v62, %v7775_v63  ;;  %v13698_v17 = vsub.f32 %v13604_v52, %v7775_v63  ;;  %v13701_v13 = vsub.f32 %v13614_v3, %v7775_v63  ;;  %v13704_v56 = vsub.f32 %v13612_v55, %v7775_v63 }
 0x708   : > { %v13707_v51 = vsub.f32 %v13622_v30, %v7775_v63  ;;  %v13710_v46 = vsub.f32 %v13620_v0, %v7775_v63  ;;  %v13713_v34 = vsub.f32 %v13630_v2, %v7775_v63  ;;  %v13716_v62 = vsub.f32 %v13628_v33, %v7775_v63 }
 0x709   : > { %v13719_v52 = vsub.f32 %v13638_v23, %v7775_v63  ;;  %v13722_v3 = vsub.f32 %v13636_v14, %v7775_v63  ;;  %v13725_v55 = vsub.f32 %v13646_v16, %v7775_v63  ;;  %v13728_v30 = vsub.f32 %v13644_v48, %v7775_v63 }
 0x70a   : > { %v13731_v0 = vsub.f32 %v13654_v36, %v7775_v63  ;;  %v13734_v2 = vsub.f32 %v13652_v42, %v7775_v63  ;;  %v13736_v33 = vsub.f32 %v7625_v8, %v7775_v63  ;;  %v13738_v57 = vsub.f32 %v10476_v53, %v7775_v63 }
 0x70b   : > { %v13740_v23 = vsub.f32 %v7635_v27, %v7775_v63  ;;  %v13742_v14 = vsub.f32 %v10479_v12, %v7775_v63  ;;  %v13744_v60 = vsub.f32 %v7645_v41, %v7775_v63  ;;  %v13746_v16 = vsub.f32 %v10482_v15, %v7775_v63 }
 0x70c   : > { %v13748_v48 = vsub.f32 %v7655_v35, %v7775_v63  ;;  %v13750_v32 = vsub.f32 %v10485_v10, %v7775_v63  ;;  %v13752_v36 = vsub.f32 %v7665_v45, %v7775_v63  ;;  %v13754_v42 = vsub.f32 %v10488_v44, %v7775_v63 }
 0x70d   : > { %v7808_v53 = vmul.f32 %v13671_v38, %v13671_v38  ;;  %v7809_v8 = vmul.f32 %v13674_v50, %v13674_v50  ;;  %v7810_v12 = vmul.f32 %v13677_v6, %v13677_v6  ;;  %v7811_v27 = vmul.f32 %v13680_v61, %v13680_v61 }
 0x70e   : > { %v7812_v41 = vmul.f32 %v13683_v29, %v13683_v29  ;;  %v7813_v39 = vmul.f32 %v13686_v19, %v13686_v19  ;;  %v7814_v35 = vmul.f32 %v13689_v28, %v13689_v28  ;;  %v7815_v5 = vmul.f32 %v13692_v40, %v13692_v40 }
 0x70f   : > { %v7840_v47 = vsel %vm286_vm1, %v7808_v53, 0.0  ;;  %v7841_v31 = vsel %vm286_vm1, %v7809_v8, 0.0  ;;  %v7843_v21 = vsel %vm286_vm1, %v7810_v12, 0.0  ;;  %v7845_v59 = vsel %vm286_vm1, %v7811_v27, 0.0 }
 0x710   : > { %v7842_v15 = vadd.f32 %v7841_v31, %v7840_v47  ;;  %v7847_v54 = vsel %vm286_vm1, %v7812_v41, 0.0  ;;  %v7849_v37 = vsel %vm286_vm1, %v7813_v39, 0.0  ;;  %v7816_v45 = vmul.f32 %v13695_v1, %v13695_v1 }
 0x711   : > { %v7851_v7 = vsel %vm286_vm1, %v7814_v35, 0.0  ;;  %v7817_v11 = vmul.f32 %v13698_v17, %v13698_v17  ;;  %v7853_v22 = vsel %vm286_vm1, %v7815_v5, 0.0  ;;  %v7818_v20 = vmul.f32 %v13701_v13, %v13701_v13 }
 0x712   : > { %v7844_v43 = vadd.f32 %v7843_v21, %v7842_v15  ;;  %v7855_v24 = vsel %vm286_vm1, %v7816_v45, 0.0  ;;  %v7819_v4 = vmul.f32 %v13704_v56, %v13704_v56  ;;  %v7820_v63 = vmul.f32 %v13707_v51, %v13707_v51 }
 0x713   : > { %v7857_v58 = vsel %vm286_vm1, %v7817_v11, 0.0  ;;  %v7859_v53 = vsel %vm286_vm1, %v7818_v20, 0.0  ;;  %v7821_v12 = vmul.f32 %v13710_v46, %v13710_v46  ;;  %v7822_v31 = vmul.f32 %v13713_v34, %v13713_v34 }
 0x714   : > { %v7846_v10 = vadd.f32 %v7845_v59, %v7844_v43  ;;  %v7861_v27 = vsel %vm286_vm1, %v7819_v4, 0.0  ;;  %v7863_v15 = vsel %vm286_vm1, %v7820_v63, 0.0  ;;  %v7823_v21 = vmul.f32 %v13716_v62, %v13716_v62 }
 0x715   : > { %v7865_v43 = vsel %vm286_vm1, %v7821_v12, 0.0  ;;  %v7824_v59 = vmul.f32 %v13719_v52, %v13719_v52 }
 0x716   : > { %v7848_v49 = vadd.f32 %v7847_v54, %v7846_v10  ;;  %v7867_v10 = vsel %vm286_vm1, %v7822_v31, 0.0  ;;  %v7825_v54 = vmul.f32 %v13722_v3, %v13722_v3 }
 0x718   : > { %v7850_v44 = vadd.f32 %v7849_v37, %v7848_v49  ;;  %v7869_v49 = vsel %vm286_vm1, %v7823_v21, 0.0  ;;  %v7826_v37 = vmul.f32 %v13725_v55, %v13725_v55 }
 0x71a   : > { %v7852_v25 = vadd.f32 %v7851_v7, %v7850_v44  ;;  %v7871_v44 = vsel %vm286_vm1, %v7824_v59, 0.0  ;;  %v7827_v7 = vmul.f32 %v13728_v30, %v13728_v30 }
 0x71c   : > { %v7854_v18 = vadd.f32 %v7853_v22, %v7852_v25  ;;  %v7873_v25 = vsel %vm286_vm1, %v7825_v54, 0.0  ;;  %v7828_v22 = vmul.f32 %v13731_v0, %v13731_v0 }
 0x71e   : > { %v7856_v26 = vadd.f32 %v7855_v24, %v7854_v18  ;;  %v7875_v18 = vsel %vm286_vm1, %v7826_v37, 0.0  ;;  %v7829_v24 = vmul.f32 %v13734_v2, %v13734_v2 }
 0x720   : > { %v7858_v9 = vadd.f32 %v7857_v58, %v7856_v26  ;;  %v7877_v26 = vsel %vm286_vm1, %v7827_v7, 0.0  ;;  %v7830_v58 = vmul.f32 %v13736_v33, %v13736_v33 }
 0x722   : > { %v7860_v8 = vadd.f32 %v7859_v53, %v7858_v9  ;;  %v7879_v9 = vsel %vm286_vm1, %v7828_v22, 0.0  ;;  %v7831_v53 = vmul.f32 %v13738_v57, %v13738_v57 }
 0x724   : > { %v7862_v47 = vadd.f32 %v7861_v27, %v7860_v8  ;;  %v7881_v8 = vsel %vm286_vm1, %v7829_v24, 0.0  ;;  %v7832_v27 = vmul.f32 %v13740_v23, %v13740_v23 }
 0x726   : > { %v7864_v41 = vadd.f32 %v7863_v15, %v7862_v47  ;;  %v7883_v47 = vsel %vm286_vm1, %v7830_v58, 0.0  ;;  %v7833_v15 = vmul.f32 %v13742_v14, %v13742_v14 }
 0x728   : > { %v7866_v39 = vadd.f32 %v7865_v43, %v7864_v41  ;;  %v7885_v41 = vsel %vm286_vm1, %v7831_v53, 0.0  ;;  %v7834_v43 = vmul.f32 %v13744_v60, %v13744_v60 }
 0x72a   : > { %v7868_v35 = vadd.f32 %v7867_v10, %v7866_v39  ;;  %v7887_v39 = vsel %vm286_vm1, %v7832_v27, 0.0  ;;  %v7835_v10 = vmul.f32 %v13746_v16, %v13746_v16 }
 0x72c   : > { %v7870_v5 = vadd.f32 %v7869_v49, %v7868_v35  ;;  %v7889_v35 = vsel %vm286_vm1, %v7833_v15, 0.0  ;;  %v7836_v49 = vmul.f32 %v13748_v48, %v13748_v48  ;;  %v217_v15 = vld [vmem:[%s12280_s22 + $0x2] sm:$0x1] }
 0x72e   : > { %v7872_v45 = vadd.f32 %v7871_v44, %v7870_v5  ;;  %v7891_v5 = vsel %vm286_vm1, %v7834_v43, 0.0  ;;  %v7837_v44 = vmul.f32 %v13750_v32, %v13750_v32  ;;  %v14443_v43 = vld [vmem:[#allocation12_spill] sm:$0xff] }
 0x730   : > { %v7874_v11 = vadd.f32 %v7873_v25, %v7872_v45  ;;  %v7893_v45 = vsel %vm286_vm1, %v7835_v10, 0.0  ;;  %v7838_v25 = vmul.f32 %v13752_v36, %v13752_v36 }
 0x732   : > { %v7876_v20 = vadd.f32 %v7875_v18, %v7874_v11  ;;  %v7895_v11 = vsel %vm286_vm1, %v7836_v49, 0.0  ;;  %v7839_v18 = vmul.f32 %v13754_v42, %v13754_v42 }
 0x734   : > { %v7878_v4 = vadd.f32 %v7877_v26, %v7876_v20  ;;  %v7897_v20 = vsel %vm286_vm1, %v7837_v44, 0.0  ;;  %v7899_v26 = vsel %vm286_vm1, %v7838_v25, 0.0  ;;  %v7901_v58 = vsel %vm286_vm1, %v7839_v18, 0.0 }
 0x736   : > { %v7880_v63 = vadd.f32 %v7879_v9, %v7878_v4 }
 0x738   : > { %v7882_v12 = vadd.f32 %v7881_v8, %v7880_v63 }
 0x73a   : > { %v7884_v31 = vadd.f32 %v7883_v47, %v7882_v12 }
 0x73c   : > { %v7886_v21 = vadd.f32 %v7885_v41, %v7884_v31 }
 0x73e   : > { %v7888_v59 = vadd.f32 %v7887_v39, %v7886_v21  ;;  %v14444_v39 = vsub.s32 0, %v14443_v43 }
 0x740   : > { %v7890_v54 = vadd.f32 %v7889_v35, %v7888_v59 }
 0x742   : > { %v7892_v37 = vadd.f32 %v7891_v5, %v7890_v54 }
 0x744   : > { %v7894_v7 = vadd.f32 %v7893_v45, %v7892_v37 }
 0x746   : > { %v7896_v22 = vadd.f32 %v7895_v11, %v7894_v7  ;;  %v8959_v11 = vld [vmem:[%s12280_s22 + $0x3] ss:$0 sm:$0xff] }
 0x748   : > { %v7898_v24 = vadd.f32 %v7897_v20, %v7896_v22 }
 0x74a   : > { %v7900_v4 = vadd.f32 %v7899_v26, %v7898_v24 }
 0x74c   : > { %v7902_v9 = vadd.f32 %v7901_v58, %v7900_v4  ;;  %v8960_v58 = vld [vmem:[%s11070_s24 + $0x19] sm:$0xff] }
 0x74e   : > { %v7903_v63 = vrot.slane %v7902_v9, 4 }
 0x750   : > { %v7904_v53 = vadd.f32 %v7903_v63, %v7902_v9  ;;  %v8961_v9 = vld [vmem:[%s11070_s24 + $0x21] sm:$0xff]  ;;  %v8962_v63 = vld [vmem:[%s11070_s24 + $0x31] sm:$0xff] }
 0x752   : > { %v7905_v8 = vrot.slane %v7904_v53, 2 }
 0x754   : > { %v7906_v12 = vadd.f32 %v7905_v8, %v7904_v53  ;;  %v8963_v53 = vld [vmem:[%s11070_s24 + $0x39] sm:$0xff] }
 0x756   : > { %v7907_v27 = vrot.slane %v7906_v12, 1 }
 0x758   : > { %v7908_v47 = vadd.f32 %v7907_v27, %v7906_v12 }
 0x75a   : > { %v7909_v31 = vmul.f32 0.003921569, %v7908_v47 }
 0x75c   : > { %11012 = vrsqrt.f32 %v7909_v31  ;;  %v8964_v31 = vld [vmem:[%s11070_s24 + $0x49] sm:$0xff] }
 0x766   : > { %v11013_v41 = vpop.eup %11012 }
 0x767   : > { %v7911_v21 = vmul.f32 %v11013_v41, %v217_v15  ;;  %v8965_v15 = vld [vmem:[%s11070_s24 + $0x51] sm:$0xff]  ;;  %v8966_v41 = vld [vmem:[%s11070_s24 + $0x61] sm:$0xff] }
 0x769   : > { %v7915_v59 = vrot.slane %v7911_v21, %v14444_v39  ;;  %v8967_v21 = vld [vmem:[%s11070_s24 + $0x69] sm:$0xff] }
 0x76b   : > { %v7916_v10 = vmul.f32 %v7915_v59, %v13671_v38  ;;  %v7917_v35 = vmul.f32 %v7915_v59, %v13674_v50  ;;  %v7918_v54 = vmul.f32 %v7915_v59, %v13677_v6  ;;  %v7919_v49 = vmul.f32 %v7915_v59, %v13680_v61 }
 0x76c   : > { %v7920_v5 = vmul.f32 %v7915_v59, %v13683_v29  ;;  %v7921_v37 = vmul.f32 %v7915_v59, %v13686_v19  ;;  %v7922_v44 = vmul.f32 %v7915_v59, %v13689_v28  ;;  %v7923_v45 = vmul.f32 %v7915_v59, %v13692_v40 }
 0x76d   : > { %v7924_v7 = vmul.f32 %v7915_v59, %v13695_v1  ;;  %v7925_v25 = vmul.f32 %v7915_v59, %v13698_v17  ;;  %v7926_v38 = vmul.f32 %v7915_v59, %v13701_v13  ;;  %v7927_v50 = vmul.f32 %v7915_v59, %v13704_v56 }
 0x76e   : > { %v7928_v6 = vmul.f32 %v7915_v59, %v13707_v51  ;;  %v7929_v61 = vmul.f32 %v7915_v59, %v13710_v46  ;;  %v7930_v29 = vmul.f32 %v7915_v59, %v13713_v34  ;;  %v7931_v19 = vmul.f32 %v7915_v59, %v13716_v62 }
 0x76f   : > { %v7932_v28 = vmul.f32 %v7915_v59, %v13719_v52  ;;  %v7933_v40 = vmul.f32 %v7915_v59, %v13722_v3  ;;  %v7934_v1 = vmul.f32 %v7915_v59, %v13725_v55  ;;  %v7935_v17 = vmul.f32 %v7915_v59, %v13728_v30 }
 0x770   : > { %v7936_v13 = vmul.f32 %v7915_v59, %v13731_v0  ;;  %v7937_v56 = vmul.f32 %v7915_v59, %v13734_v2  ;;  %v7938_v51 = vmul.f32 %v7915_v59, %v13736_v33  ;;  %v7939_v46 = vmul.f32 %v7915_v59, %v13738_v57 }
 0x771   : > { %v7940_v34 = vmul.f32 %v7915_v59, %v13740_v23  ;;  %v7941_v62 = vmul.f32 %v7915_v59, %v13742_v14  ;;  %v7942_v52 = vmul.f32 %v7915_v59, %v13744_v60  ;;  %v7943_v3 = vmul.f32 %v7915_v59, %v13746_v16 }
 0x772   : > { %v7944_v55 = vmul.f32 %v7915_v59, %v13748_v48  ;;  %v7945_v30 = vmul.f32 %v7915_v59, %v13750_v32  ;;  %v7946_v0 = vmul.f32 %v7915_v59, %v13752_v36  ;;  %v7947_v2 = vmul.f32 %v7915_v59, %v13754_v42 }
 0x773   : > { %v7952_v22 = vadd.f32 %v8959_v11, %v7916_v10  ;;  %v7953_v33 = vadd.f32 %v8959_v11, %v7917_v35  ;;  %v7954_v57 = vadd.f32 %v8959_v11, %v7918_v54  ;;  %v7955_v23 = vadd.f32 %v8959_v11, %v7919_v49  ;;  %v8968_v35 = vld [vmem:[%s11070_s24 + $0x79] sm:$0xff]  ;;  %v8969_v54 = vld [vmem:[%s11070_s24 + $0x81] sm:$0xff]  ;;  %v8970_v49 = vld [vmem:[%s11070_s24 + $0x91] sm:$0xff] }
 0x774   : > { %v7956_v14 = vadd.f32 %v8959_v11, %v7920_v5  ;;  %v7957_v60 = vadd.f32 %v8959_v11, %v7921_v37  ;;  %v7958_v16 = vadd.f32 %v8959_v11, %v7922_v44  ;;  %v7959_v18 = vadd.f32 %v8959_v11, %v7923_v45 }
 0x775   : > { %v7960_v48 = vadd.f32 %v8959_v11, %v7924_v7  ;;  %v7961_v20 = vadd.f32 %v8959_v11, %v7925_v25  ;;  %v7962_v32 = vadd.f32 %v8959_v11, %v7926_v38  ;;  %v7963_v36 = vadd.f32 %v8959_v11, %v7927_v50  ;;  %v8971_v7 = vld [vmem:[%s11070_s24 + $0x99] sm:$0xff]  ;;  %v8972_v25 = vld [vmem:[%s11070_s24 + $0xa9] sm:$0xff]  ;;  %v8973_v38 = vld [vmem:[%s11070_s24 + $0xb1] sm:$0xff] }
 0x776   : > { %v13888_v42 = vadd.f32 %v8959_v11, %v7928_v6  ;;  %v13890_v24 = vadd.f32 %v8959_v11, %v7929_v61  ;;  %v13892_v26 = vadd.f32 %v8959_v11, %v7930_v29  ;;  %v13894_v4 = vadd.f32 %v8959_v11, %v7931_v19  ;;  %v8974_v19 = vld [vmem:[%s11070_s24 + $0xc1] sm:$0xff] }
 0x777   : > { %v13901_v8 = vadd.f32 %v8959_v11, %v7932_v28  ;;  %v13903_v12 = vadd.f32 %v8959_v11, %v7933_v40  ;;  %v13905_v27 = vadd.f32 %v8959_v11, %v7934_v1  ;;  %v13907_v47 = vadd.f32 %v8959_v11, %v7935_v17  ;;  %v8975_v28 = vld [vmem:[%s11070_s24 + $0xc9] sm:$0xff]  ;;  %v8976_v40 = vld [vmem:[%s11070_s24 + $0xd9] sm:$0xff]  ;;  %v8977_v1 = vld [vmem:[%s11070_s24 + $0xe1] sm:$0xff] }
 0x778   : > { %v13913_v43 = vadd.f32 %v8959_v11, %v7936_v13  ;;  %v13915_v39 = vadd.f32 %v8959_v11, %v7937_v56  ;;  %v13917_v59 = vadd.f32 %v8959_v11, %v7938_v51  ;;  %v13919_v10 = vadd.f32 %v8959_v11, %v7939_v46  ;;  %v8978_v17 = vld [vmem:[%s11070_s24 + $0xf1] sm:$0xff]  ;;  %v8979_v13 = vld [vmem:[%s11070_s24 + $0xf9] sm:$0xff] }
 0x779   : > { %v13924_v5 = vadd.f32 %v8959_v11, %v7940_v34  ;;  %v13926_v37 = vadd.f32 %v8959_v11, %v7941_v62  ;;  %v13928_v44 = vadd.f32 %v8959_v11, %v7942_v52  ;;  %v13930_v45 = vadd.f32 %v8959_v11, %v7943_v3  ;;  %v8980_v62 = vld [vmem:[%s11070_s24 + $0x109] sm:$0xff]  ;;  %v8981_v52 = vld [vmem:[%s11070_s24 + $0x111] sm:$0xff] }
 0x77a   : > { %v13940_v50 = vadd.f32 %v8959_v11, %v7944_v55  ;;  %v13942_v6 = vadd.f32 %v8959_v11, %v7945_v30  ;;  %v13944_v61 = vadd.f32 %v8959_v11, %v7946_v0  ;;  %v13946_v29 = vadd.f32 %v8959_v11, %v7947_v2  ;;  %v8982_v11 = vld [vmem:[%s11070_s24 + $0x121] sm:$0xff]  ;;  %v8983_v2 = vld [vmem:[%s11070_s24 + $0x129] sm:$0xff] }
 0x77b   : > { %v8016_v56 = vadd.f32 %v8960_v58, %v7952_v22  ;;  %v8017_v51 = vadd.f32 %v8961_v9, %v7953_v33  ;;  %v8018_v46 = vadd.f32 %v8962_v63, %v7954_v57  ;;  %v8019_v34 = vadd.f32 %v8963_v53, %v7955_v23  ;;  %v8985_v22 = vld [vmem:[%s11070_s24 + $0x141] sm:$0xff] }
 0x77c   : > { %14445 = vst [vmem:[#allocation16_spill] sm:$0xff] %v13946_v29  ;;  %v8020_v3 = vadd.f32 %v8964_v31, %v7956_v14  ;;  %v8021_v55 = vadd.f32 %v8965_v15, %v7957_v60  ;;  %v8022_v30 = vadd.f32 %v8966_v41, %v7958_v16  ;;  %v8023_v0 = vadd.f32 %v8967_v21, %v7959_v18  ;;  %v8984_v29 = vld [vmem:[%s11070_s24 + $0x139] sm:$0xff]  ;;  %v8986_v14 = vld [vmem:[%s11070_s24 + $0x151] sm:$0xff]  ;;  %v8988_v16 = vld [vmem:[%s11070_s24 + $0x169] sm:$0xff] }
 0x77d   : > { %v8024_v33 = vadd.f32 %v8968_v35, %v7960_v48  ;;  %v8025_v57 = vadd.f32 %v8969_v54, %v7961_v20  ;;  %v8026_v23 = vadd.f32 %v8970_v49, %v7962_v32  ;;  %v8027_v58 = vadd.f32 %v8971_v7, %v7963_v36  ;;  %8048 = vst.msk [vmem:[%s13938_s14] sm:$0xff] %vm286_vm1, %v8016_v56  ;;  %v8987_v60 = vld [vmem:[%s11070_s24 + $0x159] sm:$0xff]  ;;  %v8989_v36 = vld [vmem:[%s11070_s24 + $0x171] sm:$0xff] }
 0x77e   : > { %8049 = vst.msk [vmem:[%s13938_s14 + $0x8] sm:$0xff] %vm286_vm1, %v8017_v51  ;;  %8050 = vst.msk [vmem:[%s13938_s14 + $0x10] sm:$0xff] %vm286_vm1, %v8018_v46  ;;  %v8028_v18 = vadd.f32 %v8972_v25, %v13888_v42  ;;  %v8029_v48 = vadd.f32 %v8973_v38, %v13890_v24  ;;  %v8030_v20 = vadd.f32 %v8974_v19, %v13892_v26  ;;  %v8990_v42 = vld [vmem:[%s11070_s24 + $0x181] sm:$0xff]  ;;  %v8991_v24 = vld [vmem:[%s11070_s24 + $0x189] sm:$0xff] }
 0x77f   : > { %8051 = vst.msk [vmem:[%s13938_s14 + $0x18] sm:$0xff] %vm286_vm1, %v8019_v34  ;;  %v8031_v32 = vadd.f32 %v8975_v28, %v13894_v4  ;;  %8052 = vst.msk [vmem:[%s13938_s14 + $0x20] sm:$0xff] %vm286_vm1, %v8020_v3  ;;  %v8032_v26 = vadd.f32 %v8976_v40, %v13901_v8  ;;  %v8033_v9 = vadd.f32 %v8977_v1, %v13903_v12 }
 0x780   : > { %8053 = vst.msk [vmem:[%s13938_s14 + $0x28] sm:$0xff] %vm286_vm1, %v8021_v55  ;;  %8054 = vst.msk [vmem:[%s13938_s14 + $0x30] sm:$0xff] %vm286_vm1, %v8022_v30  ;;  %v8034_v4 = vadd.f32 %v8978_v17, %v13905_v27  ;;  %v8035_v63 = vadd.f32 %v8979_v13, %v13907_v47  ;;  %v8036_v53 = vadd.f32 %v8980_v62, %v13913_v43 }
 0x781   : > { %8055 = vst.msk [vmem:[%s13938_s14 + $0x38] sm:$0xff] %vm286_vm1, %v8023_v0  ;;  %8056 = vst.msk [vmem:[%s13938_s14 + $0x40] sm:$0xff] %vm286_vm1, %v8024_v33  ;;  %v8037_v8 = vadd.f32 %v8981_v52, %v13915_v39  ;;  %v8038_v12 = vadd.f32 %v8982_v11, %v13917_v59  ;;  %v8039_v27 = vadd.f32 %v8983_v2, %v13919_v10 }
 0x782   : > { %8057 = vst.msk [vmem:[%s13938_s14 + $0x48] sm:$0xff] %vm286_vm1, %v8025_v57  ;;  %8058 = vst.msk [vmem:[%s13938_s14 + $0x50] sm:$0xff] %vm286_vm1, %v8026_v23  ;;  %v8040_v47 = vadd.f32 %v8984_v29, %v13924_v5  ;;  %v8041_v31 = vadd.f32 %v8985_v22, %v13926_v37  ;;  %v8042_v15 = vadd.f32 %v8986_v14, %v13928_v44 }
 0x783   : > { %8059 = vst.msk [vmem:[%s13938_s14 + $0x58] sm:$0xff] %vm286_vm1, %v8027_v58  ;;  %8060 = vst.msk [vmem:[%s13938_s14 + $0x60] sm:$0xff] %vm286_vm1, %v8028_v18  ;;  %v8043_v41 = vadd.f32 %v8987_v60, %v13930_v45  ;;  %v8044_v21 = vadd.f32 %v8988_v16, %v13940_v50  ;;  %v8045_v43 = vadd.f32 %v8989_v36, %v13942_v6  ;;  %v14446_v59 = vld [vmem:[#allocation16_spill] sm:$0xff] }
 0x784   : > { %8061 = vst.msk [vmem:[%s13938_s14 + $0x68] sm:$0xff] %vm286_vm1, %v8029_v48  ;;  %8062 = vst.msk [vmem:[%s13938_s14 + $0x70] sm:$0xff] %vm286_vm1, %v8030_v20  ;;  %v8046_v39 = vadd.f32 %v8990_v42, %v13944_v61  ;;  %v8047_v10 = vadd.f32 %v8991_v24, %v14446_v59 }
 0x785   : > { %8063 = vst.msk [vmem:[%s13938_s14 + $0x78] sm:$0xff] %vm286_vm1, %v8031_v32  ;;  %8064 = vst.msk [vmem:[%s13938_s14 + $0x80] sm:$0xff] %vm286_vm1, %v8032_v26 }
 0x786   : > { %8065 = vst.msk [vmem:[%s13938_s14 + $0x88] sm:$0xff] %vm286_vm1, %v8033_v9  ;;  %8066 = vst.msk [vmem:[%s13938_s14 + $0x90] sm:$0xff] %vm286_vm1, %v8034_v4 }
 0x787   : > { %8067 = vst.msk [vmem:[%s13938_s14 + $0x98] sm:$0xff] %vm286_vm1, %v8035_v63  ;;  %8068 = vst.msk [vmem:[%s13938_s14 + $0xa0] sm:$0xff] %vm286_vm1, %v8036_v53 }
 0x788   : > { %8069 = vst.msk [vmem:[%s13938_s14 + $0xa8] sm:$0xff] %vm286_vm1, %v8037_v8  ;;  %8070 = vst.msk [vmem:[%s13938_s14 + $0xb0] sm:$0xff] %vm286_vm1, %v8038_v12 }
 0x789   : > { %8071 = vst.msk [vmem:[%s13938_s14 + $0xb8] sm:$0xff] %vm286_vm1, %v8039_v27  ;;  %8072 = vst.msk [vmem:[%s13938_s14 + $0xc0] sm:$0xff] %vm286_vm1, %v8040_v47 }
 0x78a   : > { %8073 = vst.msk [vmem:[%s13938_s14 + $0xc8] sm:$0xff] %vm286_vm1, %v8041_v31  ;;  %8074 = vst.msk [vmem:[%s13938_s14 + $0xd0] sm:$0xff] %vm286_vm1, %v8042_v15 }
 0x78b   : > { %8075 = vst.msk [vmem:[%s13938_s14 + $0xd8] sm:$0xff] %vm286_vm1, %v8043_v41  ;;  %8076 = vst.msk [vmem:[%s13938_s14 + $0xe0] sm:$0xff] %vm286_vm1, %v8044_v21 }
 0x78c   : > { %8077 = vst.msk [vmem:[%s13938_s14 + $0xe8] sm:$0xff] %vm286_vm1, %v8045_v43  ;;  %8078 = vst.msk [vmem:[%s13938_s14 + $0xf0] sm:$0xff] %vm286_vm1, %v8046_v39 }
 0x78d   : > { %8079 = vst.msk [vmem:[%s13938_s14 + $0xf8] sm:$0xff] %vm286_vm1, %v8047_v10 }
 0x78e PF: > { %s14_s15 = sadd.s32 1, %s11020_s15  }
 0x78f   : > { %p11_p4 = scmp.ge.s32.totalorder %s14_s15, 4  }
 0x791   :  { %13 = sbr.rel (!%p11_p4) target bundleno = 1 (0x1), region = 89 }

</bundles_post_ra>
